<compile_context>
chip_gen: v7x
topology: tpu7x:2x2x1
jax: 0.10.0
libtpu: 0.0.40
codegen_flags: <defaults>
</compile_context>

<pallas_src>
import functools

import jax
import jax.numpy as jnp
from jax.experimental import pallas as pl
from jax.experimental.pallas import tpu as pltpu


def _round_up(x, m):
    return ((x + m - 1) // m) * m


def _pick_tile(dim, preferred):
    """Largest multiple of 128 <= preferred that evenly divides `dim`; else full dim."""
    if dim <= preferred:
        return dim
    t = (preferred // 128) * 128
    while t >= 128:
        if dim % t == 0:
            return t
        t -= 128
    return dim


def _gelu_tanh(x):
    # TODO(synk): tanh-approx GELU instead of PyTorch's exact erf nn.GELU.
    c = 0.7978845608028654  # sqrt(2/pi)
    return 0.5 * x * (1.0 + jnp.tanh(c * (x + 0.044715 * x * x * x)))


def _layernorm(x, g, b):
    mu = jnp.mean(x, axis=-1, keepdims=True)
    var = jnp.mean(jnp.square(x - mu), axis=-1, keepdims=True)
    return (x - mu) * jax.lax.rsqrt(var + 1e-5) * g + b


# -----------------------------------------------------------------------------
# Fused QKV projection: LayerNorm prologue + three matmuls sharing the x block
# -----------------------------------------------------------------------------
def _qkv_kernel(x_ref, g_ref, b_ref, wq_ref, wk_ref, wv_ref, q_ref, k_ref, v_ref):
    xn = _layernorm(x_ref[...].astype(jnp.float32), g_ref[...], b_ref[...])
    xn = xn.astype(wq_ref.dtype)
    q_ref[...] = jnp.dot(xn, wq_ref[...],
                         preferred_element_type=jnp.float32).astype(q_ref.dtype)
    k_ref[...] = jnp.dot(xn, wk_ref[...],
                         preferred_element_type=jnp.float32).astype(k_ref.dtype)
    v_ref[...] = jnp.dot(xn, wv_ref[...],
                         preferred_element_type=jnp.float32).astype(v_ref.dtype)


def qkv_projection(x2, ln_g, ln_b, wq, wk, wv, *, out_dtype=jnp.bfloat16,
                   tm=512, tn=512):
    R, D = x2.shape
    inner = wq.shape[1]
    tm = min(tm, _round_up(R, 8))
    tn = _pick_tile(inner, tn)
    grid = (pl.cdiv(R, tm), inner // tn)

    x_spec = pl.BlockSpec((tm, D), lambda i, j: (i, 0))
    vec_spec = pl.BlockSpec((1, D), lambda i, j: (0, 0))
    w_spec = pl.BlockSpec((D, tn), lambda i, j: (0, j))
    o_spec = pl.BlockSpec((tm, tn), lambda i, j: (i, j))
    out_sds = jax.ShapeDtypeStruct((R, inner), out_dtype)

    return pl.pallas_call(
        _qkv_kernel,
        out_shape=(out_sds, out_sds, out_sds),
        grid=grid,
        in_specs=[x_spec, vec_spec, vec_spec, w_spec, w_spec, w_spec],
        out_specs=(o_spec, o_spec, o_spec),
        compiler_params=pltpu.CompilerParams(
            dimension_semantics=("parallel", "parallel")),
    )(x2, ln_g, ln_b, wq, wk, wv)


# -----------------------------------------------------------------------------
# Tiled matmul with fused (LN-prologue / bias / GELU / residual[+LN]) epilogue
# -----------------------------------------------------------------------------
def _make_mm_kernel(has_ln, has_bias, has_res, has_res_ln, act):
    def kernel(*refs):
        it = iter(refs)
        x_ref = next(it)
        w_ref = next(it)
        lg_ref = next(it) if has_ln else None
        lb_ref = next(it) if has_ln else None
        b_ref = next(it) if has_bias else None
        r_ref = next(it) if has_res else None
        rg_ref = next(it) if has_res_ln else None
        rb_ref = next(it) if has_res_ln else None
        o_ref = next(it)
        acc_ref = next(it)

        @pl.when(pl.program_id(2) == 0)
        def _():
            acc_ref[...] = jnp.zeros_like(acc_ref)

        w = w_ref[...]
        x = x_ref[...]
        if has_ln:
            x = _layernorm(x.astype(jnp.float32), lg_ref[...], lb_ref[...])
        acc_ref[...] += jnp.dot(x.astype(w.dtype), w,
                                preferred_element_type=jnp.float32)

        @pl.when(pl.program_id(2) == pl.num_programs(2) - 1)
        def _():
            y = acc_ref[...]
            if has_bias:
                y = y + b_ref[...].astype(jnp.float32)
            if act == "gelu":
                y = _gelu_tanh(y)
            if has_res:
                r = r_ref[...].astype(jnp.float32)
                if has_res_ln:
                    r = _layernorm(r, rg_ref[...], rb_ref[...])
                y = y + r
            o_ref[...] = y.astype(o_ref.dtype)

    return kernel


def fused_linear(x2, w, bias=None, residual=None, act=None, ln=None,
                 residual_ln=None, out_dtype=jnp.float32, *, tm=512, tn=512, tk=512):
    """x2 (R,K) @ w (K,N) [LN(x) prologue] [+bias] [act] [+ residual / LN(residual)]."""
    R, K = x2.shape
    Kw, Nout = w.shape
    assert K == Kw
    tm = min(tm, _round_up(R, 8))
    tk = K if ln is not None else _pick_tile(K, tk)
    tn = Nout if (residual is not None and residual_ln is not None) else _pick_tile(Nout, tn)
    grid = (pl.cdiv(R, tm), Nout // tn, K // tk)

    in_specs = [pl.BlockSpec((tm, tk), lambda i, j, k: (i, k)),
                pl.BlockSpec((tk, tn), lambda i, j, k: (k, j))]
    operands = [x2, w]
    if ln is not None:
        assert tk == K, "LayerNorm prologue needs K in a single tile"
        in_specs += [pl.BlockSpec((1, tk), lambda i, j, k: (0, k))] * 2
        operands += [ln[0], ln[1]]
    if bias is not None:
        in_specs.append(pl.BlockSpec((1, tn), lambda i, j, k: (0, j)))
        operands.append(bias)
    has_res_ln = False
    if residual is not None:
        in_specs.append(pl.BlockSpec((tm, tn), lambda i, j, k: (i, j)))
        operands.append(residual)
        if residual_ln is not None:
            assert tn == Nout, "LayerNorm on residual needs full rows in one tile"
            has_res_ln = True
            in_specs += [pl.BlockSpec((1, tn), lambda i, j, k: (0, j))] * 2
            operands += [residual_ln[0], residual_ln[1]]

    kern = _make_mm_kernel(ln is not None, bias is not None,
                           residual is not None, has_res_ln, act)
    return pl.pallas_call(
        kern,
        out_shape=jax.ShapeDtypeStruct((R, Nout), out_dtype),
        grid=grid,
        in_specs=in_specs,
        out_specs=pl.BlockSpec((tm, tn), lambda i, j, k: (i, j)),
        scratch_shapes=[pltpu.VMEM((tm, tn), jnp.float32)],
        compiler_params=pltpu.CompilerParams(
            dimension_semantics=("parallel", "parallel", "arbitrary")),
    )(*operands)


# -----------------------------------------------------------------------------
# KAT attention — grid over (batch, head-group), cls folded into patch attention
# -----------------------------------------------------------------------------
def _attn_kernel(q_ref, k_ref, v_ref, rdpc_ref, rdmn_ref,
                 mpc_ref, kmr_ref, kmc_ref, mr_ref, o_ref,
                 *, scale, inv_denom, hg, dh, n, m):
    f32 = jnp.float32
    np1 = n + 1
    neg = f32(-1e9)

    # Soft kernel-distance weights and keep-masks, shared by the hg heads of
    # this step (block indices are head-independent so the blocks stay resident).
    soft_pc = jnp.exp(rdpc_ref[...] * f32(-inv_denom))        # (N+1, M); cls row == 1
    soft_mn = jnp.exp(rdmn_ref[...] * f32(-inv_denom))        # (M, N)
    keep_pc = (mpc_ref[...] * kmr_ref[...]) >= 0.5            # (N+1, M) — cls row uses
    keep_mn = (kmc_ref[...] * mr_ref[...]) >= 0.5             #  patch-0's mask (as ref.)

    def softmax_w(dots, keep, wmul):
        # masked_fill(-1e9): a fully-masked row degrades to a uniform softmax,
        # exactly like the PyTorch reference.
        dots = jnp.where(keep, dots, neg)
        dots = dots - jnp.max(dots, axis=-1, keepdims=True)
        e = jnp.exp(dots)
        p = e * pl.reciprocal(jnp.sum(e, axis=-1, keepdims=True), approx=True)
        return p * wmul

    outs_pc, outs_kn = [], []
    for h in range(hg):
        c0 = h * dh
        # scale folded into q (cheaper than scaling the (I, J) dots)
        q_pc = q_ref[:np1, c0:c0 + dh] * scale          # (N+1, Dh) patch + cls queries
        q_kn = q_ref[np1:, c0:c0 + dh] * scale          # (M, Dh)   kernel queries
        k_kern = k_ref[np1:, c0:c0 + dh]                # (M, Dh)   kernel keys / values
        v_kern = v_ref[np1:, c0:c0 + dh]
        k_pat = k_ref[:n, c0:c0 + dh]                   # (N, Dh)   patch keys / values
        v_pat = v_ref[:n, c0:c0 + dh]

        # (patch + cls) -> kernel attention (cls row has weight 1, per reference)
        d_pc = jax.lax.dot_general(q_pc, k_kern, (((1,), (1,)), ((), ())),
                                   preferred_element_type=f32)
        p_pc = softmax_w(d_pc, keep_pc, soft_pc)
        outs_pc.append(jnp.dot(p_pc.astype(v_kern.dtype), v_kern,
                               preferred_element_type=f32))

        # kernel -> patch attention
        d_kn = jax.lax.dot_general(q_kn, k_pat, (((1,), (1,)), ((), ())),
                                   preferred_element_type=f32)
        p_kn = softmax_w(d_kn, keep_mn, soft_mn)
        outs_kn.append(jnp.dot(p_kn.astype(v_pat.dtype), v_pat,
                               preferred_element_type=f32))

    out_pc = outs_pc[0] if hg == 1 else jnp.concatenate(outs_pc, axis=-1)
    out_kn = outs_kn[0] if hg == 1 else jnp.concatenate(outs_kn, axis=-1)
    o_ref[:np1, :] = out_pc.astype(o_ref.dtype)
    o_ref[np1:, :] = out_kn.astype(o_ref.dtype)


def _pick_head_group(heads, dim_head):
    # smallest head group whose column width is lane-dense (multiple of 128);
    # fall back to all heads (full-width block) at tiny sizes.
    for hg in range(1, heads + 1):
        if heads % hg == 0 and (hg * dim_head) % 128 == 0:
            return hg
    return heads


def kat_attention(q, k, v, rd2_pc, rd2_mn, mask_pc, kmask_row, kmask_col, mask_row,
                  *, scale, inv_denom, heads, dim_head, n, m, out_dtype=jnp.bfloat16):
    B, L, inner = q.shape
    np1 = n + 1
    hg = _pick_head_group(heads, dim_head)
    hgdh = hg * dim_head
    HG = heads // hg

    kern = functools.partial(_attn_kernel, scale=scale, inv_denom=inv_denom,
                             hg=hg, dh=dim_head, n=n, m=m)
    qkv_spec = pl.BlockSpec((None, L, hgdh), lambda b, g: (b, 0, g))
    return pl.pallas_call(
        kern,
        out_shape=jax.ShapeDtypeStruct((B, L, inner), out_dtype),
        grid=(B, HG),
        in_specs=[
            qkv_spec, qkv_spec, qkv_spec,
            pl.BlockSpec((None, np1, m), lambda b, g: (b, 0, 0)),   # rd^2 (patch+cls, M)
            pl.BlockSpec((None, m, n), lambda b, g: (b, 0, 0)),     # rd^2 (M, N)
            pl.BlockSpec((None, np1, 1), lambda b, g: (b, 0, 0)),   # mask column (patch+cls)
            pl.BlockSpec((None, 1, m), lambda b, g: (b, 0, 0)),     # kmask row
            pl.BlockSpec((None, m, 1), lambda b, g: (b, 0, 0)),     # kmask column
            pl.BlockSpec((None, 1, n), lambda b, g: (b, 0, 0)),     # mask row
        ],
        out_specs=pl.BlockSpec((None, L, hgdh), lambda b, g: (b, 0, g)),
        compiler_params=pltpu.CompilerParams(
            dimension_semantics=("parallel", "parallel"),
            vmem_limit_bytes=48 * 1024 * 1024),
    )(q, k, v, rd2_pc, rd2_mn, mask_pc, kmask_row, kmask_col, mask_row)


# -----------------------------------------------------------------------------
# KATBlocks / KAT glue (plain JAX around the Pallas kernels)
# -----------------------------------------------------------------------------
def kat_blocks_forward(params, x, kx, rd, clst, mask, kmask, *, npk, heads, dim_head):
    f32 = jnp.float32
    B, N, D = x.shape
    M = kx.shape[1]
    Np1 = N + 1
    L = Np1 + M
    inner = heads * dim_head
    scale = float(dim_head) ** -0.5

    # Token order [patch, cls, kernel] — contiguous row groups for attention,
    # and the (B, L, D) residual stream is carried through all layers untouched.
    tokens = jnp.concatenate([x.astype(f32), clst.astype(f32), kx.astype(f32)], axis=1)

    rd2 = (rd * rd).astype(f32)                                   # (B, M, N)
    rd2_pc = jnp.concatenate(
        [jnp.transpose(rd2, (0, 2, 1)), jnp.zeros((B, 1, M), f32)], axis=1)  # (B, N+1, M)
    maskf = mask.astype(f32)
    kmaskf = kmask.astype(f32)
    mask_pc = jnp.concatenate([maskf, maskf[:, :1]], axis=1)      # cls uses patch-0's mask
    kmask_row = jnp.transpose(kmaskf, (0, 2, 1))                  # (B, 1, M)
    mask_row = jnp.transpose(maskf, (0, 2, 1))                    # (B, 1, N)

    k_reps = []
    for l_idx, p in enumerate(params):
        inv_denom = 1.0 / (2.0 * npk * (2.0 ** l_idx))
        wq = p["wqkv"][:, :inner]
        wk = p["wqkv"][:, inner:2 * inner]
        wv = p["wqkv"][:, 2 * inner:]

        tok_flat = tokens.reshape(B * L, D)

        # LN1 fused into the qkv matmul prologue; no standalone LayerNorm pass.
        q, k, v = qkv_projection(tok_flat, p["ln1_g"], p["ln1_b"], wq, wk, wv)

        att = kat_attention(q.reshape(B, L, inner), k.reshape(B, L, inner),
                            v.reshape(B, L, inner), rd2_pc, rd2,
                            mask_pc, kmask_row, kmaskf, mask_row,
                            scale=scale, inv_denom=inv_denom,
                            heads=heads, dim_head=dim_head, n=N, m=M)

        # to_out projection; residual = LN1(tokens) (the reference does x = pn(x)
        # in place, so the residual base is the *normalized* tokens), LN'd in f32
        # inside the epilogue.
        res = fused_linear(att.reshape(B * L, inner), p["wout"], bias=p["bout"],
                           residual=tok_flat, residual_ln=(p["ln1_g"], p["ln1_b"]),
                           out_dtype=f32)

        # PreNorm FeedForward: LN2 fused into fc1 prologue, GELU fused, residual
        # (the f32 post-attention stream) fused into fc2's epilogue.
        ff1 = fused_linear(res, p["w1"], bias=p["b1"], act="gelu",
                           ln=(p["ln2_g"], p["ln2_b"]), out_dtype=jnp.bfloat16)
        out = fused_linear(ff1, p["w2"], bias=p["b2"], residual=res, out_dtype=f32)

        tokens = out.reshape(B, L, D)
        k_reps.append(jnp.where(kmaskf < 0.5, 0.0, tokens[:, Np1:]))

    clst_out = tokens[:, N:Np1]
    return k_reps, clst_out


def kat_forward(params, node_features, krd, mask, kmask, *, num_kernel, npk,
                heads, dim_head):
    B, N, P = node_features.shape
    dim = params["embed_w"].shape[1]

    # patch embedding (emb dropout = identity in eval)
    x = fused_linear(node_features.reshape(B * N, P).astype(jnp.float32),
                     params["embed_w"], bias=params["embed_b"],
                     out_dtype=jnp.float32).reshape(B, N, dim)
    clst = jnp.broadcast_to(params["cls_token"], (B, 1, dim))
    ktok = jnp.broadcast_to(params["kernel_token"], (B, num_kernel, dim))

    k_reps, clst_out = kat_blocks_forward(params["blocks"], x, ktok, krd, clst,
                                          mask, kmask, npk=npk, heads=heads,
                                          dim_head=dim_head)

    # mlp_head = LayerNorm + Linear on the cls token (LN fused into the prologue)
    logits = fused_linear(clst_out[:, 0], params["head_w"], bias=params["head_b"],
                          ln=(params["head_ln_g"], params["head_ln_b"]),
                          out_dtype=jnp.float32)
    return k_reps, logits


def init_kat_params(key, *, patch_dim, dim, depth, heads, dim_head, mlp_dim,
                    num_classes):
    inner = heads * dim_head
    keys = jax.random.split(key, 4 + depth)

    def w(k, shape):
        return (0.02 * jax.random.normal(k, shape, jnp.float32)).astype(jnp.bfloat16)

    blocks = []
    for i in range(depth):
        k0, k1, k2, k3 = jax.random.split(keys[4 + i], 4)
        blocks.append(dict(
            ln1_g=jnp.ones((1, dim), jnp.float32),
            ln1_b=jnp.zeros((1, dim), jnp.float32),
            wqkv=w(k0, (dim, 3 * inner)),
            wout=w(k1, (inner, dim)),
            bout=jnp.zeros((1, dim), jnp.float32),
            ln2_g=jnp.ones((1, dim), jnp.float32),
            ln2_b=jnp.zeros((1, dim), jnp.float32),
            w1=w(k2, (dim, mlp_dim)),
            b1=jnp.zeros((1, mlp_dim), jnp.float32),
            w2=w(k3, (mlp_dim, dim)),
            b2=jnp.zeros((1, dim), jnp.float32)))
    return dict(
        embed_w=w(keys[0], (patch_dim, dim)),
        embed_b=jnp.zeros((1, dim), jnp.float32),
        cls_token=jax.random.normal(keys[1], (1, 1, dim), jnp.float32),
        kernel_token=jax.random.normal(keys[2], (1, 1, dim), jnp.float32),
        blocks=blocks,
        head_ln_g=jnp.ones((1, dim), jnp.float32),
        head_ln_b=jnp.zeros((1, dim), jnp.float32),
        head_w=w(keys[3], (dim, num_classes)),
        head_b=jnp.zeros((1, num_classes), jnp.float32))


if __name__ == "__main__":
    # small shapes consistent with KAT(num_pk, patch_dim, num_classes, dim, depth,
    # heads, mlp_dim, num_kernal, dim_head)
    B, N, M, P = 2, 16, 8, 24           # batch, patch tokens, kernel tokens, patch_dim
    dim, depth, heads, dim_head = 32, 2, 4, 8
    mlp_dim, npk, num_classes = 64, 9, 5

    key = jax.random.PRNGKey(0)
    kf, kr, km, kp = jax.random.split(key, 4)
    node_features = jax.random.normal(kf, (B, N, P), jnp.float32)
    krd = jnp.abs(jax.random.normal(kr, (B, M, N), jnp.float32))   # kernel-patch distances
    mask = jnp.ones((B, N, 1), jnp.float32)                        # patch mask
    kmask = (jax.random.uniform(km, (B, M, 1)) > 0.25).astype(jnp.float32)

    params = init_kat_params(kp, patch_dim=P, dim=dim, depth=depth, heads=heads,
                             dim_head=dim_head, mlp_dim=mlp_dim,
                             num_classes=num_classes)

    fwd = jax.jit(functools.partial(kat_forward, num_kernel=M, npk=npk,
                                    heads=heads, dim_head=dim_head))
    k_reps, logits = fwd(params, node_features, krd, mask, kmask)
    jax.block_until_ready((k_reps, logits))

    assert len(k_reps) == depth and k_reps[0].shape == (B, M, dim)
    assert logits.shape == (B, num_classes)
    assert all(bool(jnp.all(jnp.isfinite(r))) for r in k_reps)
    assert bool(jnp.all(jnp.isfinite(logits)))
    print("KERNEL_OK")
</pallas_src>

<mosaic_0001>
module attributes {stable_mosaic.version = 11 : i64} {
  func.func @kernel(%arg0: i32, %arg1: i32, %arg2: i32, %arg3: memref<32x24xf32, #tpu.memory_space<vmem>>, %arg4: memref<24x32xbf16, #tpu.memory_space<vmem>>, %arg5: memref<1x32xf32, #tpu.memory_space<vmem>>, %arg6: memref<32x32xf32, #tpu.memory_space<vmem>>, %arg7: memref<32x32xf32, #tpu.memory_space<vmem>>) attributes {dimension_semantics = [#tpu.dimension_semantics<parallel>, #tpu.dimension_semantics<parallel>, #tpu.dimension_semantics<arbitrary>], iteration_bounds = array<i64: 1, 1, 1>, scalar_prefetch = 0 : i64, scratch_operands = 1 : i64, tpu.core_type = #tpu.core_type<tc>, window_params = [{transform_indices = @transform_0, window_bounds = array<i64: 32, 24>}, {transform_indices = @transform_1, window_bounds = array<i64: 24, 32>}, {transform_indices = @transform_2, window_bounds = array<i64: 1, 32>}, {transform_indices = @transform_3, window_bounds = array<i64: 32, 32>}]} {
    %c0_i32 = arith.constant 0 : i32
    %0 = arith.cmpi eq, %arg2, %c0_i32 : i32
    %1 = arith.extui %0 : i1 to i32
    %c0_i32_0 = arith.constant 0 : i32
    %2 = arith.cmpi ne, %1, %c0_i32_0 : i32
    scf.if %2 {
      %cst_10 = arith.constant 0.000000e+00 : f32
      %13 = vector.broadcast %cst_10 : f32 to vector<32x32xf32>
      %c0_11 = arith.constant 0 : index
      %c0_12 = arith.constant 0 : index
      %14 = vector.load %arg7[%c0_11, %c0_12] : memref<32x32xf32, #tpu.memory_space<vmem>>, vector<32x32xf32>
      tpu.vector_store %arg7[%c0_11, %c0_12], %13 {strides = array<i32>} : memref<32x32xf32, #tpu.memory_space<vmem>>, vector<32x32xf32>,
    } else {
    }
    %c0 = arith.constant 0 : index
    %c0_1 = arith.constant 0 : index
    %3 = vector.load %arg4[%c0, %c0_1] : memref<24x32xbf16, #tpu.memory_space<vmem>>, vector<24x32xbf16>
    %c0_2 = arith.constant 0 : index
    %c0_3 = arith.constant 0 : index
    %4 = vector.load %arg3[%c0_2, %c0_3] : memref<32x24xf32, #tpu.memory_space<vmem>>, vector<32x24xf32>
    %c0_4 = arith.constant 0 : index
    %c0_5 = arith.constant 0 : index
    %5 = vector.load %arg7[%c0_4, %c0_5] : memref<32x32xf32, #tpu.memory_space<vmem>>, vector<32x32xf32>
    %6 = arith.truncf %4 : vector<32x24xf32> to vector<32x24xbf16>
    %cst = arith.constant dense<0.000000e+00> : vector<32x32xf32>
    %7 = tpu.matmul %6, %3, %cst {dimension_numbers = #tpu.dot_dimension_numbers<[1], [0], [0], [1], [0, 0, 1, 1], [], []>} : vector<32x24xbf16>, vector<24x32xbf16>, vector<32x32xf32> -> vector<32x32xf32>
    %8 = arith.addf %5, %7 : vector<32x32xf32>
    %c0_6 = arith.constant 0 : index
    %c0_7 = arith.constant 0 : index
    %9 = vector.load %arg7[%c0_6, %c0_7] : memref<32x32xf32, #tpu.memory_space<vmem>>, vector<32x32xf32>
    tpu.vector_store %arg7[%c0_6, %c0_7], %8 {strides = array<i32>} : memref<32x32xf32, #tpu.memory_space<vmem>>, vector<32x32xf32>,
    %c0_i32_8 = arith.constant 0 : i32
    %10 = arith.cmpi eq, %arg2, %c0_i32_8 : i32
    %11 = arith.extui %10 : i1 to i32
    %c0_i32_9 = arith.constant 0 : i32
    %12 = arith.cmpi ne, %11, %c0_i32_9 : i32
    scf.if %12 {
      %c0_10 = arith.constant 0 : index
      %c0_11 = arith.constant 0 : index
      %13 = vector.load %arg7[%c0_10, %c0_11] : memref<32x32xf32, #tpu.memory_space<vmem>>, vector<32x32xf32>
      %c0_12 = arith.constant 0 : index
      %c0_13 = arith.constant 0 : index
      %14 = vector.load %arg5[%c0_12, %c0_13] : memref<1x32xf32, #tpu.memory_space<vmem>>, vector<1x32xf32>
      %15 = vector.broadcast %14 : vector<1x32xf32> to vector<32x32xf32>
      %16 = arith.addf %13, %15 : vector<32x32xf32>
      %c0_14 = arith.constant 0 : index
      %c0_15 = arith.constant 0 : index
      %17 = vector.load %arg6[%c0_14, %c0_15] : memref<32x32xf32, #tpu.memory_space<vmem>>, vector<32x32xf32>
      tpu.vector_store %arg6[%c0_14, %c0_15], %16 {strides = array<i32>} : memref<32x32xf32, #tpu.memory_space<vmem>>, vector<32x32xf32>,
    } else {
    }
    return
  }
  func.func @transform_0(%arg0: i32, %arg1: i32, %arg2: i32) -> (i32, i32) {
    %c0_i32 = arith.constant 0 : i32
    return %arg0, %arg2 : i32, i32
  }
  func.func @transform_1(%arg0: i32, %arg1: i32, %arg2: i32) -> (i32, i32) {
    %c0_i32 = arith.constant 0 : i32
    return %arg2, %arg1 : i32, i32
  }
  func.func @transform_2(%arg0: i32, %arg1: i32, %arg2: i32) -> (i32, i32) {
    %c0_i32 = arith.constant 0 : i32
    %c0_i32_0 = arith.constant 0 : i32
    return %c0_i32, %arg1 : i32, i32
  }
  func.func @transform_3(%arg0: i32, %arg1: i32, %arg2: i32) -> (i32, i32) {
    %c0_i32 = arith.constant 0 : i32
    return %arg0, %arg1 : i32, i32
  }
}

module attributes {stable_mosaic.version = 11 : i64} {
  func.func @_qkv_kernel(%arg0: i32, %arg1: i32, %arg2: memref<56x32xf32, #tpu.memory_space<vmem>>, %arg3: memref<1x32xf32, #tpu.memory_space<vmem>>, %arg4: memref<1x32xf32, #tpu.memory_space<vmem>>, %arg5: memref<32x32xbf16, #tpu.memory_space<vmem>>, %arg6: memref<32x32xbf16, #tpu.memory_space<vmem>>, %arg7: memref<32x32xbf16, #tpu.memory_space<vmem>>, %arg8: memref<56x32xbf16, #tpu.memory_space<vmem>>, %arg9: memref<56x32xbf16, #tpu.memory_space<vmem>>, %arg10: memref<56x32xbf16, #tpu.memory_space<vmem>>) attributes {dimension_semantics = [#tpu.dimension_semantics<parallel>, #tpu.dimension_semantics<parallel>], iteration_bounds = array<i64: 1, 1>, scalar_prefetch = 0 : i64, scratch_operands = 0 : i64, tpu.core_type = #tpu.core_type<tc>, window_params = [{transform_indices = @transform_0, window_bounds = array<i64: 56, 32>}, {pipeline_mode = #tpu.pipeline_mode<synchronous>, transform_indices = @transform_1, window_bounds = array<i64: 1, 32>}, {pipeline_mode = #tpu.pipeline_mode<synchronous>, transform_indices = @transform_2, window_bounds = array<i64: 1, 32>}, {transform_indices = @transform_3, window_bounds = array<i64: 32, 32>}, {transform_indices = @transform_4, window_bounds = array<i64: 32, 32>}, {transform_indices = @transform_5, window_bounds = array<i64: 32, 32>}, {transform_indices = @transform_6, window_bounds = array<i64: 56, 32>}, {transform_indices = @transform_7, window_bounds = array<i64: 56, 32>}, {transform_indices = @transform_8, window_bounds = array<i64: 56, 32>}]} {
    %c0 = arith.constant 0 : index
    %c0_0 = arith.constant 0 : index
    %0 = vector.load %arg2[%c0, %c0_0] : memref<56x32xf32, #tpu.memory_space<vmem>>, vector<56x32xf32>
    %c0_1 = arith.constant 0 : index
    %c0_2 = arith.constant 0 : index
    %1 = vector.load %arg3[%c0_1, %c0_2] : memref<1x32xf32, #tpu.memory_space<vmem>>, vector<1x32xf32>
    %c0_3 = arith.constant 0 : index
    %c0_4 = arith.constant 0 : index
    %2 = vector.load %arg4[%c0_3, %c0_4] : memref<1x32xf32, #tpu.memory_space<vmem>>, vector<1x32xf32>
    %cst = arith.constant dense<0.000000e+00> : vector<56xf32>
    %3 = vector.multi_reduction <add>, %0, %cst [1] : vector<56x32xf32> to vector<56xf32>
    %4 = vector.shape_cast %3 : vector<56xf32> to vector<56x1xf32>
    %cst_5 = arith.constant 3.200000e+01 : f32
    %5 = vector.broadcast %cst_5 : f32 to vector<56x1xf32>
    %6 = arith.divf %4, %5 : vector<56x1xf32>
    %7 = vector.broadcast %6 : vector<56x1xf32> to vector<56x32xf32>
    %8 = arith.subf %0, %7 : vector<56x32xf32>
    %9 = arith.mulf %8, %8 : vector<56x32xf32>
    %cst_6 = arith.constant dense<0.000000e+00> : vector<56xf32>
    %10 = vector.multi_reduction <add>, %9, %cst_6 [1] : vector<56x32xf32> to vector<56xf32>
    %11 = vector.shape_cast %10 : vector<56xf32> to vector<56x1xf32>
    %cst_7 = arith.constant 3.200000e+01 : f32
    %12 = vector.broadcast %cst_7 : f32 to vector<56x1xf32>
    %13 = arith.divf %11, %12 : vector<56x1xf32>
    %14 = vector.broadcast %6 : vector<56x1xf32> to vector<56x32xf32>
    %15 = arith.subf %0, %14 : vector<56x32xf32>
    %cst_8 = arith.constant 9.99999974E-6 : f32
    %16 = vector.broadcast %cst_8 : f32 to vector<56x1xf32>
    %17 = arith.addf %13, %16 : vector<56x1xf32>
    %18 = math.rsqrt %17 : vector<56x1xf32>
    %19 = vector.broadcast %18 : vector<56x1xf32> to vector<56x32xf32>
    %20 = arith.mulf %15, %19 : vector<56x32xf32>
    %21 = vector.broadcast %1 : vector<1x32xf32> to vector<56x32xf32>
    %22 = arith.mulf %20, %21 : vector<56x32xf32>
    %23 = vector.broadcast %2 : vector<1x32xf32> to vector<56x32xf32>
    %24 = arith.addf %22, %23 : vector<56x32xf32>
    %25 = arith.truncf %24 : vector<56x32xf32> to vector<56x32xbf16>
    %c0_9 = arith.constant 0 : index
    %c0_10 = arith.constant 0 : index
    %26 = vector.load %arg5[%c0_9, %c0_10] : memref<32x32xbf16, #tpu.memory_space<vmem>>, vector<32x32xbf16>
    %cst_11 = arith.constant dense<0.000000e+00> : vector<56x32xf32>
    %27 = tpu.matmul %25, %26, %cst_11 {dimension_numbers = #tpu.dot_dimension_numbers<[1], [0], [0], [1], [0, 0, 1, 1], [], []>} : vector<56x32xbf16>, vector<32x32xbf16>, vector<56x32xf32> -> vector<56x32xf32>
    %28 = arith.truncf %27 : vector<56x32xf32> to vector<56x32xbf16>
    %c0_12 = arith.constant 0 : index
    %c0_13 = arith.constant 0 : index
    %29 = vector.load %arg8[%c0_12, %c0_13] : memref<56x32xbf16, #tpu.memory_space<vmem>>, vector<56x32xbf16>
    tpu.vector_store %arg8[%c0_12, %c0_13], %28 {strides = array<i32>} : memref<56x32xbf16, #tpu.memory_space<vmem>>, vector<56x32xbf16>,
    %c0_14 = arith.constant 0 : index
    %c0_15 = arith.constant 0 : index
    %30 = vector.load %arg6[%c0_14, %c0_15] : memref<32x32xbf16, #tpu.memory_space<vmem>>, vector<32x32xbf16>
    %cst_16 = arith.constant dense<0.000000e+00> : vector<56x32xf32>
    %31 = tpu.matmul %25, %30, %cst_16 {dimension_numbers = #tpu.dot_dimension_numbers<[1], [0], [0], [1], [0, 0, 1, 1], [], []>} : vector<56x32xbf16>, vector<32x32xbf16>, vector<56x32xf32> -> vector<56x32xf32>
    %32 = arith.truncf %31 : vector<56x32xf32> to vector<56x32xbf16>
    %c0_17 = arith.constant 0 : index
    %c0_18 = arith.constant 0 : index
    %33 = vector.load %arg9[%c0_17, %c0_18] : memref<56x32xbf16, #tpu.memory_space<vmem>>, vector<56x32xbf16>
    tpu.vector_store %arg9[%c0_17, %c0_18], %32 {strides = array<i32>} : memref<56x32xbf16, #tpu.memory_space<vmem>>, vector<56x32xbf16>,
    %c0_19 = arith.constant 0 : index
    %c0_20 = arith.constant 0 : index
    %34 = vector.load %arg7[%c0_19, %c0_20] : memref<32x32xbf16, #tpu.memory_space<vmem>>, vector<32x32xbf16>
    %cst_21 = arith.constant dense<0.000000e+00> : vector<56x32xf32>
    %35 = tpu.matmul %25, %34, %cst_21 {dimension_numbers = #tpu.dot_dimension_numbers<[1], [0], [0], [1], [0, 0, 1, 1], [], []>} : vector<56x32xbf16>, vector<32x32xbf16>, vector<56x32xf32> -> vector<56x32xf32>
    %36 = arith.truncf %35 : vector<56x32xf32> to vector<56x32xbf16>
    %c0_22 = arith.constant 0 : index
    %c0_23 = arith.constant 0 : index
    %37 = vector.load %arg10[%c0_22, %c0_23] : memref<56x32xbf16, #tpu.memory_space<vmem>>, vector<56x32xbf16>
    tpu.vector_store %arg10[%c0_22, %c0_23], %36 {strides = array<i32>} : memref<56x32xbf16, #tpu.memory_space<vmem>>, vector<56x32xbf16>,
    return
  }
  func.func @transform_0(%arg0: i32, %arg1: i32) -> (i32, i32) {
    %c0_i32 = arith.constant 0 : i32
    %c0_i32_0 = arith.constant 0 : i32
    return %arg0, %c0_i32 : i32, i32
  }
  func.func @transform_1(%arg0: i32, %arg1: i32) -> (i32, i32) {
    %c0_i32 = arith.constant 0 : i32
    %c0_i32_0 = arith.constant 0 : i32
    %c0_i32_1 = arith.constant 0 : i32
    return %c0_i32, %c0_i32_0 : i32, i32
  }
  func.func @transform_2(%arg0: i32, %arg1: i32) -> (i32, i32) {
    %c0_i32 = arith.constant 0 : i32
    %c0_i32_0 = arith.constant 0 : i32
    %c0_i32_1 = arith.constant 0 : i32
    return %c0_i32, %c0_i32_0 : i32, i32
  }
  func.func @transform_3(%arg0: i32, %arg1: i32) -> (i32, i32) {
    %c0_i32 = arith.constant 0 : i32
    %c0_i32_0 = arith.constant 0 : i32
    return %c0_i32, %arg1 : i32, i32
  }
  func.func @transform_4(%arg0: i32, %arg1: i32) -> (i32, i32) {
    %c0_i32 = arith.constant 0 : i32
    %c0_i32_0 = arith.constant 0 : i32
    return %c0_i32, %arg1 : i32, i32
  }
  func.func @transform_5(%arg0: i32, %arg1: i32) -> (i32, i32) {
    %c0_i32 = arith.constant 0 : i32
    %c0_i32_0 = arith.constant 0 : i32
    return %c0_i32, %arg1 : i32, i32
  }
  func.func @transform_6(%arg0: i32, %arg1: i32) -> (i32, i32) {
    %c0_i32 = arith.constant 0 : i32
    return %arg0, %arg1 : i32, i32
  }
  func.func @transform_7(%arg0: i32, %arg1: i32) -> (i32, i32) {
    %c0_i32 = arith.constant 0 : i32
    return %arg0, %arg1 : i32, i32
  }
  func.func @transform_8(%arg0: i32, %arg1: i32) -> (i32, i32) {
    %c0_i32 = arith.constant 0 : i32
    return %arg0, %arg1 : i32, i32
  }
}

module attributes {stable_mosaic.version = 11 : i64} {
  func.func @kernel(%arg0: i32, %arg1: i32, %arg2: i32, %arg3: memref<56x32xf32, #tpu.memory_space<vmem>>, %arg4: memref<32x64xbf16, #tpu.memory_space<vmem>>, %arg5: memref<1x32xf32, #tpu.memory_space<vmem>>, %arg6: memref<1x32xf32, #tpu.memory_space<vmem>>, %arg7: memref<1x64xf32, #tpu.memory_space<vmem>>, %arg8: memref<56x64xbf16, #tpu.memory_space<vmem>>, %arg9: memref<56x64xf32, #tpu.memory_space<vmem>>) attributes {dimension_semantics = [#tpu.dimension_semantics<parallel>, #tpu.dimension_semantics<parallel>, #tpu.dimension_semantics<arbitrary>], iteration_bounds = array<i64: 1, 1, 1>, scalar_prefetch = 0 : i64, scratch_operands = 1 : i64, tpu.core_type = #tpu.core_type<tc>, window_params = [{transform_indices = @transform_0, window_bounds = array<i64: 56, 32>}, {transform_indices = @transform_1, window_bounds = array<i64: 32, 64>}, {transform_indices = @transform_2, window_bounds = array<i64: 1, 32>}, {transform_indices = @transform_3, window_bounds = array<i64: 1, 32>}, {transform_indices = @transform_4, window_bounds = array<i64: 1, 64>}, {transform_indices = @transform_5, window_bounds = array<i64: 56, 64>}]} {
    %c0_i32 = arith.constant 0 : i32
    %0 = arith.cmpi eq, %arg2, %c0_i32 : i32
    %1 = arith.extui %0 : i1 to i32
    %c0_i32_0 = arith.constant 0 : i32
    %2 = arith.cmpi ne, %1, %c0_i32_0 : i32
    scf.if %2 {
      %cst_19 = arith.constant 0.000000e+00 : f32
      %37 = vector.broadcast %cst_19 : f32 to vector<56x64xf32>
      %c0_20 = arith.constant 0 : index
      %c0_21 = arith.constant 0 : index
      %38 = vector.load %arg9[%c0_20, %c0_21] : memref<56x64xf32, #tpu.memory_space<vmem>>, vector<56x64xf32>
      tpu.vector_store %arg9[%c0_20, %c0_21], %37 {strides = array<i32>} : memref<56x64xf32, #tpu.memory_space<vmem>>, vector<56x64xf32>,
    } else {
    }
    %c0 = arith.constant 0 : index
    %c0_1 = arith.constant 0 : index
    %3 = vector.load %arg4[%c0, %c0_1] : memref<32x64xbf16, #tpu.memory_space<vmem>>, vector<32x64xbf16>
    %c0_2 = arith.constant 0 : index
    %c0_3 = arith.constant 0 : index
    %4 = vector.load %arg3[%c0_2, %c0_3] : memref<56x32xf32, #tpu.memory_space<vmem>>, vector<56x32xf32>
    %c0_4 = arith.constant 0 : index
    %c0_5 = arith.constant 0 : index
    %5 = vector.load %arg5[%c0_4, %c0_5] : memref<1x32xf32, #tpu.memory_space<vmem>>, vector<1x32xf32>
    %c0_6 = arith.constant 0 : index
    %c0_7 = arith.constant 0 : index
    %6 = vector.load %arg6[%c0_6, %c0_7] : memref<1x32xf32, #tpu.memory_space<vmem>>, vector<1x32xf32>
    %cst = arith.constant dense<0.000000e+00> : vector<56xf32>
    %7 = vector.multi_reduction <add>, %4, %cst [1] : vector<56x32xf32> to vector<56xf32>
    %8 = vector.shape_cast %7 : vector<56xf32> to vector<56x1xf32>
    %cst_8 = arith.constant 3.200000e+01 : f32
    %9 = vector.broadcast %cst_8 : f32 to vector<56x1xf32>
    %10 = arith.divf %8, %9 : vector<56x1xf32>
    %11 = vector.broadcast %10 : vector<56x1xf32> to vector<56x32xf32>
    %12 = arith.subf %4, %11 : vector<56x32xf32>
    %13 = arith.mulf %12, %12 : vector<56x32xf32>
    %cst_9 = arith.constant dense<0.000000e+00> : vector<56xf32>
    %14 = vector.multi_reduction <add>, %13, %cst_9 [1] : vector<56x32xf32> to vector<56xf32>
    %15 = vector.shape_cast %14 : vector<56xf32> to vector<56x1xf32>
    %cst_10 = arith.constant 3.200000e+01 : f32
    %16 = vector.broadcast %cst_10 : f32 to vector<56x1xf32>
    %17 = arith.divf %15, %16 : vector<56x1xf32>
    %18 = vector.broadcast %10 : vector<56x1xf32> to vector<56x32xf32>
    %19 = arith.subf %4, %18 : vector<56x32xf32>
    %cst_11 = arith.constant 9.99999974E-6 : f32
    %20 = vector.broadcast %cst_11 : f32 to vector<56x1xf32>
    %21 = arith.addf %17, %20 : vector<56x1xf32>
    %22 = math.rsqrt %21 : vector<56x1xf32>
    %23 = vector.broadcast %22 : vector<56x1xf32> to vector<56x32xf32>
    %24 = arith.mulf %19, %23 : vector<56x32xf32>
    %25 = vector.broadcast %5 : vector<1x32xf32> to vector<56x32xf32>
    %26 = arith.mulf %24, %25 : vector<56x32xf32>
    %27 = vector.broadcast %6 : vector<1x32xf32> to vector<56x32xf32>
    %28 = arith.addf %26, %27 : vector<56x32xf32>
    %c0_12 = arith.constant 0 : index
    %c0_13 = arith.constant 0 : index
    %29 = vector.load %arg9[%c0_12, %c0_13] : memref<56x64xf32, #tpu.memory_space<vmem>>, vector<56x64xf32>
    %30 = arith.truncf %28 : vector<56x32xf32> to vector<56x32xbf16>
    %cst_14 = arith.constant dense<0.000000e+00> : vector<56x64xf32>
    %31 = tpu.matmul %30, %3, %cst_14 {dimension_numbers = #tpu.dot_dimension_numbers<[1], [0], [0], [1], [0, 0, 1, 1], [], []>} : vector<56x32xbf16>, vector<32x64xbf16>, vector<56x64xf32> -> vector<56x64xf32>
    %32 = arith.addf %29, %31 : vector<56x64xf32>
    %c0_15 = arith.constant 0 : index
    %c0_16 = arith.constant 0 : index
    %33 = vector.load %arg9[%c0_15, %c0_16] : memref<56x64xf32, #tpu.memory_space<vmem>>, vector<56x64xf32>
    tpu.vector_store %arg9[%c0_15, %c0_16], %32 {strides = array<i32>} : memref<56x64xf32, #tpu.memory_space<vmem>>, vector<56x64xf32>,
    %c0_i32_17 = arith.constant 0 : i32
    %34 = arith.cmpi eq, %arg2, %c0_i32_17 : i32
    %35 = arith.extui %34 : i1 to i32
    %c0_i32_18 = arith.constant 0 : i32
    %36 = arith.cmpi ne, %35, %c0_i32_18 : i32
    scf.if %36 {
      %c0_19 = arith.constant 0 : index
      %c0_20 = arith.constant 0 : index
      %37 = vector.load %arg9[%c0_19, %c0_20] : memref<56x64xf32, #tpu.memory_space<vmem>>, vector<56x64xf32>
      %c0_21 = arith.constant 0 : index
      %c0_22 = arith.constant 0 : index
      %38 = vector.load %arg7[%c0_21, %c0_22] : memref<1x64xf32, #tpu.memory_space<vmem>>, vector<1x64xf32>
      %39 = vector.broadcast %38 : vector<1x64xf32> to vector<56x64xf32>
      %40 = arith.addf %37, %39 : vector<56x64xf32>
      %cst_23 = arith.constant 5.000000e-01 : f32
      %41 = vector.broadcast %cst_23 : f32 to vector<56x64xf32>
      %42 = arith.mulf %41, %40 : vector<56x64xf32>
      %cst_24 = arith.constant 4.471500e-02 : f32
      %43 = vector.broadcast %cst_24 : f32 to vector<56x64xf32>
      %44 = arith.mulf %43, %40 : vector<56x64xf32>
      %45 = arith.mulf %44, %40 : vector<56x64xf32>
      %46 = arith.mulf %45, %40 : vector<56x64xf32>
      %47 = arith.addf %40, %46 : vector<56x64xf32>
      %cst_25 = arith.constant 0.797884583 : f32
      %48 = vector.broadcast %cst_25 : f32 to vector<56x64xf32>
      %49 = arith.mulf %48, %47 : vector<56x64xf32>
      %50 = math.tanh %49 : vector<56x64xf32>
      %cst_26 = arith.constant 1.000000e+00 : f32
      %51 = vector.broadcast %cst_26 : f32 to vector<56x64xf32>
      %52 = arith.addf %51, %50 : vector<56x64xf32>
      %53 = arith.mulf %42, %52 : vector<56x64xf32>
      %54 = arith.truncf %53 : vector<56x64xf32> to vector<56x64xbf16>
      %c0_27 = arith.constant 0 : index
      %c0_28 = arith.constant 0 : index
      %55 = vector.load %arg8[%c0_27, %c0_28] : memref<56x64xbf16, #tpu.memory_space<vmem>>, vector<56x64xbf16>
      tpu.vector_store %arg8[%c0_27, %c0_28], %54 {strides = array<i32>} : memref<56x64xbf16, #tpu.memory_space<vmem>>, vector<56x64xbf16>,
    } else {
    }
    return
  }
  func.func @transform_0(%arg0: i32, %arg1: i32, %arg2: i32) -> (i32, i32) {
    %c0_i32 = arith.constant 0 : i32
    return %arg0, %arg2 : i32, i32
  }
  func.func @transform_1(%arg0: i32, %arg1: i32, %arg2: i32) -> (i32, i32) {
    %c0_i32 = arith.constant 0 : i32
    return %arg2, %arg1 : i32, i32
  }
  func.func @transform_2(%arg0: i32, %arg1: i32, %arg2: i32) -> (i32, i32) {
    %c0_i32 = arith.constant 0 : i32
    %c0_i32_0 = arith.constant 0 : i32
    return %c0_i32, %arg2 : i32, i32
  }
  func.func @transform_3(%arg0: i32, %arg1: i32, %arg2: i32) -> (i32, i32) {
    %c0_i32 = arith.constant 0 : i32
    %c0_i32_0 = arith.constant 0 : i32
    return %c0_i32, %arg2 : i32, i32
  }
  func.func @transform_4(%arg0: i32, %arg1: i32, %arg2: i32) -> (i32, i32) {
    %c0_i32 = arith.constant 0 : i32
    %c0_i32_0 = arith.constant 0 : i32
    return %c0_i32, %arg1 : i32, i32
  }
  func.func @transform_5(%arg0: i32, %arg1: i32, %arg2: i32) -> (i32, i32) {
    %c0_i32 = arith.constant 0 : i32
    return %arg0, %arg1 : i32, i32
  }
}

module attributes {stable_mosaic.version = 11 : i64} {
  func.func @kernel(%arg0: i32, %arg1: i32, %arg2: i32, %arg3: memref<56x32xbf16, #tpu.memory_space<vmem>>, %arg4: memref<32x32xbf16, #tpu.memory_space<vmem>>, %arg5: memref<1x32xf32, #tpu.memory_space<vmem>>, %arg6: memref<56x32xf32, #tpu.memory_space<vmem>>, %arg7: memref<1x32xf32, #tpu.memory_space<vmem>>, %arg8: memref<1x32xf32, #tpu.memory_space<vmem>>, %arg9: memref<56x32xf32, #tpu.memory_space<vmem>>, %arg10: memref<56x32xf32, #tpu.memory_space<vmem>>) attributes {dimension_semantics = [#tpu.dimension_semantics<parallel>, #tpu.dimension_semantics<parallel>, #tpu.dimension_semantics<arbitrary>], iteration_bounds = array<i64: 1, 1, 1>, scalar_prefetch = 0 : i64, scratch_operands = 1 : i64, tpu.core_type = #tpu.core_type<tc>, window_params = [{transform_indices = @transform_0, window_bounds = array<i64: 56, 32>}, {transform_indices = @transform_1, window_bounds = array<i64: 32, 32>}, {transform_indices = @transform_2, window_bounds = array<i64: 1, 32>}, {transform_indices = @transform_3, window_bounds = array<i64: 56, 32>}, {transform_indices = @transform_4, window_bounds = array<i64: 1, 32>}, {transform_indices = @transform_5, window_bounds = array<i64: 1, 32>}, {transform_indices = @transform_6, window_bounds = array<i64: 56, 32>}]} {
    %c0_i32 = arith.constant 0 : i32
    %0 = arith.cmpi eq, %arg2, %c0_i32 : i32
    %1 = arith.extui %0 : i1 to i32
    %c0_i32_0 = arith.constant 0 : i32
    %2 = arith.cmpi ne, %1, %c0_i32_0 : i32
    scf.if %2 {
      %cst_10 = arith.constant 0.000000e+00 : f32
      %12 = vector.broadcast %cst_10 : f32 to vector<56x32xf32>
      %c0_11 = arith.constant 0 : index
      %c0_12 = arith.constant 0 : index
      %13 = vector.load %arg10[%c0_11, %c0_12] : memref<56x32xf32, #tpu.memory_space<vmem>>, vector<56x32xf32>
      tpu.vector_store %arg10[%c0_11, %c0_12], %12 {strides = array<i32>} : memref<56x32xf32, #tpu.memory_space<vmem>>, vector<56x32xf32>,
    } else {
    }
    %c0 = arith.constant 0 : index
    %c0_1 = arith.constant 0 : index
    %3 = vector.load %arg4[%c0, %c0_1] : memref<32x32xbf16, #tpu.memory_space<vmem>>, vector<32x32xbf16>
    %c0_2 = arith.constant 0 : index
    %c0_3 = arith.constant 0 : index
    %4 = vector.load %arg3[%c0_2, %c0_3] : memref<56x32xbf16, #tpu.memory_space<vmem>>, vector<56x32xbf16>
    %c0_4 = arith.constant 0 : index
    %c0_5 = arith.constant 0 : index
    %5 = vector.load %arg10[%c0_4, %c0_5] : memref<56x32xf32, #tpu.memory_space<vmem>>, vector<56x32xf32>
    %cst = arith.constant dense<0.000000e+00> : vector<56x32xf32>
    %6 = tpu.matmul %4, %3, %cst {dimension_numbers = #tpu.dot_dimension_numbers<[1], [0], [0], [1], [0, 0, 1, 1], [], []>} : vector<56x32xbf16>, vector<32x32xbf16>, vector<56x32xf32> -> vector<56x32xf32>
    %7 = arith.addf %5, %6 : vector<56x32xf32>
    %c0_6 = arith.constant 0 : index
    %c0_7 = arith.constant 0 : index
    %8 = vector.load %arg10[%c0_6, %c0_7] : memref<56x32xf32, #tpu.memory_space<vmem>>, vector<56x32xf32>
    tpu.vector_store %arg10[%c0_6, %c0_7], %7 {strides = array<i32>} : memref<56x32xf32, #tpu.memory_space<vmem>>, vector<56x32xf32>,
    %c0_i32_8 = arith.constant 0 : i32
    %9 = arith.cmpi eq, %arg2, %c0_i32_8 : i32
    %10 = arith.extui %9 : i1 to i32
    %c0_i32_9 = arith.constant 0 : i32
    %11 = arith.cmpi ne, %10, %c0_i32_9 : i32
    scf.if %11 {
      %c0_10 = arith.constant 0 : index
      %c0_11 = arith.constant 0 : index
      %12 = vector.load %arg10[%c0_10, %c0_11] : memref<56x32xf32, #tpu.memory_space<vmem>>, vector<56x32xf32>
      %c0_12 = arith.constant 0 : index
      %c0_13 = arith.constant 0 : index
      %13 = vector.load %arg5[%c0_12, %c0_13] : memref<1x32xf32, #tpu.memory_space<vmem>>, vector<1x32xf32>
      %14 = vector.broadcast %13 : vector<1x32xf32> to vector<56x32xf32>
      %15 = arith.addf %12, %14 : vector<56x32xf32>
      %c0_14 = arith.constant 0 : index
      %c0_15 = arith.constant 0 : index
      %16 = vector.load %arg6[%c0_14, %c0_15] : memref<56x32xf32, #tpu.memory_space<vmem>>, vector<56x32xf32>
      %c0_16 = arith.constant 0 : index
      %c0_17 = arith.constant 0 : index
      %17 = vector.load %arg7[%c0_16, %c0_17] : memref<1x32xf32, #tpu.memory_space<vmem>>, vector<1x32xf32>
      %c0_18 = arith.constant 0 : index
      %c0_19 = arith.constant 0 : index
      %18 = vector.load %arg8[%c0_18, %c0_19] : memref<1x32xf32, #tpu.memory_space<vmem>>, vector<1x32xf32>
      %cst_20 = arith.constant dense<0.000000e+00> : vector<56xf32>
      %19 = vector.multi_reduction <add>, %16, %cst_20 [1] : vector<56x32xf32> to vector<56xf32>
      %20 = vector.shape_cast %19 : vector<56xf32> to vector<56x1xf32>
      %cst_21 = arith.constant 3.200000e+01 : f32
      %21 = vector.broadcast %cst_21 : f32 to vector<56x1xf32>
      %22 = arith.divf %20, %21 : vector<56x1xf32>
      %23 = vector.broadcast %22 : vector<56x1xf32> to vector<56x32xf32>
      %24 = arith.subf %16, %23 : vector<56x32xf32>
      %25 = arith.mulf %24, %24 : vector<56x32xf32>
      %cst_22 = arith.constant dense<0.000000e+00> : vector<56xf32>
      %26 = vector.multi_reduction <add>, %25, %cst_22 [1] : vector<56x32xf32> to vector<56xf32>
      %27 = vector.shape_cast %26 : vector<56xf32> to vector<56x1xf32>
      %cst_23 = arith.constant 3.200000e+01 : f32
      %28 = vector.broadcast %cst_23 : f32 to vector<56x1xf32>
      %29 = arith.divf %27, %28 : vector<56x1xf32>
      %30 = vector.broadcast %22 : vector<56x1xf32> to vector<56x32xf32>
      %31 = arith.subf %16, %30 : vector<56x32xf32>
      %cst_24 = arith.constant 9.99999974E-6 : f32
      %32 = vector.broadcast %cst_24 : f32 to vector<56x1xf32>
      %33 = arith.addf %29, %32 : vector<56x1xf32>
      %34 = math.rsqrt %33 : vector<56x1xf32>
      %35 = vector.broadcast %34 : vector<56x1xf32> to vector<56x32xf32>
      %36 = arith.mulf %31, %35 : vector<56x32xf32>
      %37 = vector.broadcast %17 : vector<1x32xf32> to vector<56x32xf32>
      %38 = arith.mulf %36, %37 : vector<56x32xf32>
      %39 = vector.broadcast %18 : vector<1x32xf32> to vector<56x32xf32>
      %40 = arith.addf %38, %39 : vector<56x32xf32>
      %41 = arith.addf %15, %40 : vector<56x32xf32>
      %c0_25 = arith.constant 0 : index
      %c0_26 = arith.constant 0 : index
      %42 = vector.load %arg9[%c0_25, %c0_26] : memref<56x32xf32, #tpu.memory_space<vmem>>, vector<56x32xf32>
      tpu.vector_store %arg9[%c0_25, %c0_26], %41 {strides = array<i32>} : memref<56x32xf32, #tpu.memory_space<vmem>>, vector<56x32xf32>,
    } else {
    }
    return
  }
  func.func @transform_0(%arg0: i32, %arg1: i32, %arg2: i32) -> (i32, i32) {
    %c0_i32 = arith.constant 0 : i32
    return %arg0, %arg2 : i32, i32
  }
  func.func @transform_1(%arg0: i32, %arg1: i32, %arg2: i32) -> (i32, i32) {
    %c0_i32 = arith.constant 0 : i32
    return %arg2, %arg1 : i32, i32
  }
  func.func @transform_2(%arg0: i32, %arg1: i32, %arg2: i32) -> (i32, i32) {
    %c0_i32 = arith.constant 0 : i32
    %c0_i32_0 = arith.constant 0 : i32
    return %c0_i32, %arg1 : i32, i32
  }
  func.func @transform_3(%arg0: i32, %arg1: i32, %arg2: i32) -> (i32, i32) {
    %c0_i32 = arith.constant 0 : i32
    return %arg0, %arg1 : i32, i32
  }
  func.func @transform_4(%arg0: i32, %arg1: i32, %arg2: i32) -> (i32, i32) {
    %c0_i32 = arith.constant 0 : i32
    %c0_i32_0 = arith.constant 0 : i32
    return %c0_i32, %arg1 : i32, i32
  }
  func.func @transform_5(%arg0: i32, %arg1: i32, %arg2: i32) -> (i32, i32) {
    %c0_i32 = arith.constant 0 : i32
    %c0_i32_0 = arith.constant 0 : i32
    return %c0_i32, %arg1 : i32, i32
  }
  func.func @transform_6(%arg0: i32, %arg1: i32, %arg2: i32) -> (i32, i32) {
    %c0_i32 = arith.constant 0 : i32
    return %arg0, %arg1 : i32, i32
  }
}

module attributes {stable_mosaic.version = 11 : i64} {
  func.func @_attn_kernel(%arg0: i32, %arg1: i32, %arg2: memref<1x25x32xbf16, #tpu.memory_space<vmem>>, %arg3: memref<1x25x32xbf16, #tpu.memory_space<vmem>>, %arg4: memref<1x25x32xbf16, #tpu.memory_space<vmem>>, %arg5: memref<1x17x8xf32, #tpu.memory_space<vmem>>, %arg6: memref<1x8x16xf32, #tpu.memory_space<vmem>>, %arg7: memref<1x17x1xf32, #tpu.memory_space<vmem>>, %arg8: memref<1x1x8xf32, #tpu.memory_space<vmem>>, %arg9: memref<1x8x1xf32, #tpu.memory_space<vmem>>, %arg10: memref<1x1x16xf32, #tpu.memory_space<vmem>>, %arg11: memref<1x25x32xbf16, #tpu.memory_space<vmem>>) attributes {dimension_semantics = [#tpu.dimension_semantics<parallel>, #tpu.dimension_semantics<parallel>], iteration_bounds = array<i64: 2, 1>, scalar_prefetch = 0 : i64, scratch_operands = 0 : i64, tpu.core_type = #tpu.core_type<tc>, window_params = [{transform_indices = @transform_0, window_bounds = array<i64: 1, 25, 32>}, {transform_indices = @transform_1, window_bounds = array<i64: 1, 25, 32>}, {transform_indices = @transform_2, window_bounds = array<i64: 1, 25, 32>}, {transform_indices = @transform_3, window_bounds = array<i64: 1, 17, 8>}, {transform_indices = @transform_4, window_bounds = array<i64: 1, 8, 16>}, {transform_indices = @transform_5, window_bounds = array<i64: 1, 17, 1>}, {transform_indices = @transform_6, window_bounds = array<i64: 1, 1, 8>}, {transform_indices = @transform_7, window_bounds = array<i64: 1, 8, 1>}, {transform_indices = @transform_8, window_bounds = array<i64: 1, 1, 16>}, {transform_indices = @transform_9, window_bounds = array<i64: 1, 25, 32>}]} {
    %c0 = arith.constant 0 : index
    %c0_0 = arith.constant 0 : index
    %c0_1 = arith.constant 0 : index
    %0 = vector.load %arg5[%c0, %c0_0, %c0_1] : memref<1x17x8xf32, #tpu.memory_space<vmem>>, vector<1x17x8xf32>
    %1 = vector.shape_cast %0 : vector<1x17x8xf32> to vector<17x8xf32>
    %cst = arith.constant -0.055555556 : f32
    %2 = vector.broadcast %cst : f32 to vector<17x8xf32>
    %3 = arith.mulf %1, %2 : vector<17x8xf32>
    %4 = math.exp %3 : vector<17x8xf32>
    %c0_2 = arith.constant 0 : index
    %c0_3 = arith.constant 0 : index
    %c0_4 = arith.constant 0 : index
    %5 = vector.load %arg6[%c0_2, %c0_3, %c0_4] : memref<1x8x16xf32, #tpu.memory_space<vmem>>, vector<1x8x16xf32>
    %6 = vector.shape_cast %5 : vector<1x8x16xf32> to vector<8x16xf32>
    %cst_5 = arith.constant -0.055555556 : f32
    %7 = vector.broadcast %cst_5 : f32 to vector<8x16xf32>
    %8 = arith.mulf %6, %7 : vector<8x16xf32>
    %9 = math.exp %8 : vector<8x16xf32>
    %c0_6 = arith.constant 0 : index
    %c0_7 = arith.constant 0 : index
    %c0_8 = arith.constant 0 : index
    %10 = vector.load %arg7[%c0_6, %c0_7, %c0_8] : memref<1x17x1xf32, #tpu.memory_space<vmem>>, vector<1x17x1xf32>
    %11 = vector.shape_cast %10 : vector<1x17x1xf32> to vector<17x1xf32>
    %c0_9 = arith.constant 0 : index
    %c0_10 = arith.constant 0 : index
    %c0_11 = arith.constant 0 : index
    %12 = vector.load %arg8[%c0_9, %c0_10, %c0_11] : memref<1x1x8xf32, #tpu.memory_space<vmem>>, vector<1x1x8xf32>
    %13 = vector.shape_cast %12 : vector<1x1x8xf32> to vector<1x8xf32>
    %14 = vector.broadcast %11 : vector<17x1xf32> to vector<17x8xf32>
    %15 = vector.broadcast %13 : vector<1x8xf32> to vector<17x8xf32>
    %16 = arith.mulf %14, %15 : vector<17x8xf32>
    %cst_12 = arith.constant 5.000000e-01 : f32
    %17 = vector.broadcast %cst_12 : f32 to vector<17x8xf32>
    %18 = arith.cmpf oge, %16, %17 : vector<17x8xf32>
    %c0_13 = arith.constant 0 : index
    %c0_14 = arith.constant 0 : index
    %c0_15 = arith.constant 0 : index
    %19 = vector.load %arg9[%c0_13, %c0_14, %c0_15] : memref<1x8x1xf32, #tpu.memory_space<vmem>>, vector<1x8x1xf32>
    %20 = vector.shape_cast %19 : vector<1x8x1xf32> to vector<8x1xf32>
    %c0_16 = arith.constant 0 : index
    %c0_17 = arith.constant 0 : index
    %c0_18 = arith.constant 0 : index
    %21 = vector.load %arg10[%c0_16, %c0_17, %c0_18] : memref<1x1x16xf32, #tpu.memory_space<vmem>>, vector<1x1x16xf32>
    %22 = vector.shape_cast %21 : vector<1x1x16xf32> to vector<1x16xf32>
    %23 = vector.broadcast %20 : vector<8x1xf32> to vector<8x16xf32>
    %24 = vector.broadcast %22 : vector<1x16xf32> to vector<8x16xf32>
    %25 = arith.mulf %23, %24 : vector<8x16xf32>
    %cst_19 = arith.constant 5.000000e-01 : f32
    %26 = vector.broadcast %cst_19 : f32 to vector<8x16xf32>
    %27 = arith.cmpf oge, %25, %26 : vector<8x16xf32>
    %c0_20 = arith.constant 0 : index
    %c0_21 = arith.constant 0 : index
    %c0_22 = arith.constant 0 : index
    %28 = vector.load %arg2[%c0_20, %c0_21, %c0_22] : memref<1x25x32xbf16, #tpu.memory_space<vmem>>, vector<1x17x8xbf16>
    %29 = vector.shape_cast %28 : vector<1x17x8xbf16> to vector<17x8xbf16>
    %cst_23 = arith.constant 3.535160e-01 : bf16
    %30 = vector.broadcast %cst_23 : bf16 to vector<17x8xbf16>
    %31 = arith.mulf %29, %30 : vector<17x8xbf16>
    %c0_24 = arith.constant 0 : index
    %c17 = arith.constant 17 : index
    %c0_25 = arith.constant 0 : index
    %32 = vector.load %arg2[%c0_24, %c17, %c0_25] : memref<1x25x32xbf16, #tpu.memory_space<vmem>>, vector<1x8x8xbf16>
    %33 = vector.shape_cast %32 : vector<1x8x8xbf16> to vector<8x8xbf16>
    %cst_26 = arith.constant 3.535160e-01 : bf16
    %34 = vector.broadcast %cst_26 : bf16 to vector<8x8xbf16>
    %35 = arith.mulf %33, %34 : vector<8x8xbf16>
    %c0_27 = arith.constant 0 : index
    %c17_28 = arith.constant 17 : index
    %c0_29 = arith.constant 0 : index
    %36 = vector.load %arg3[%c0_27, %c17_28, %c0_29] : memref<1x25x32xbf16, #tpu.memory_space<vmem>>, vector<1x8x8xbf16>
    %37 = vector.shape_cast %36 : vector<1x8x8xbf16> to vector<8x8xbf16>
    %c0_30 = arith.constant 0 : index
    %c17_31 = arith.constant 17 : index
    %c0_32 = arith.constant 0 : index
    %38 = vector.load %arg4[%c0_30, %c17_31, %c0_32] : memref<1x25x32xbf16, #tpu.memory_space<vmem>>, vector<1x8x8xbf16>
    %39 = vector.shape_cast %38 : vector<1x8x8xbf16> to vector<8x8xbf16>
    %c0_33 = arith.constant 0 : index
    %c0_34 = arith.constant 0 : index
    %c0_35 = arith.constant 0 : index
    %40 = vector.load %arg3[%c0_33, %c0_34, %c0_35] : memref<1x25x32xbf16, #tpu.memory_space<vmem>>, vector<1x16x8xbf16>
    %41 = vector.shape_cast %40 : vector<1x16x8xbf16> to vector<16x8xbf16>
    %c0_36 = arith.constant 0 : index
    %c0_37 = arith.constant 0 : index
    %c0_38 = arith.constant 0 : index
    %42 = vector.load %arg4[%c0_36, %c0_37, %c0_38] : memref<1x25x32xbf16, #tpu.memory_space<vmem>>, vector<1x16x8xbf16>
    %43 = vector.shape_cast %42 : vector<1x16x8xbf16> to vector<16x8xbf16>
    %cst_39 = arith.constant dense<0.000000e+00> : vector<17x8xf32>
    %44 = tpu.matmul %31, %37, %cst_39 {dimension_numbers = #tpu.dot_dimension_numbers<[1], [1], [0], [0], [0, 0, 1, 0], [], []>} : vector<17x8xbf16>, vector<8x8xbf16>, vector<17x8xf32> -> vector<17x8xf32>
    %cst_40 = arith.constant -1.000000e+09 : f32
    %45 = vector.broadcast %cst_40 : f32 to vector<17x8xf32>
    %46 = arith.select %18, %44, %45 : vector<17x8xi1>, vector<17x8xf32>
    %cst_41 = arith.constant dense<0xFF800000> : vector<17xf32>
    %47 = vector.multi_reduction <maximumf>, %46, %cst_41 [1] : vector<17x8xf32> to vector<17xf32>
    %48 = vector.shape_cast %47 : vector<17xf32> to vector<17x1xf32>
    %49 = vector.broadcast %48 : vector<17x1xf32> to vector<17x8xf32>
    %50 = arith.subf %46, %49 : vector<17x8xf32>
    %51 = math.exp %50 : vector<17x8xf32>
    %cst_42 = arith.constant dense<0.000000e+00> : vector<17xf32>
    %52 = vector.multi_reduction <add>, %51, %cst_42 [1] : vector<17x8xf32> to vector<17xf32>
    %53 = vector.shape_cast %52 : vector<17xf32> to vector<17x1xf32>
    %54 = tpu.reciprocal %53 {approx = true} : vector<17x1xf32> -> vector<17x1xf32>
    %55 = vector.broadcast %54 : vector<17x1xf32> to vector<17x8xf32>
    %56 = arith.mulf %51, %55 : vector<17x8xf32>
    %57 = arith.mulf %56, %4 : vector<17x8xf32>
    %58 = arith.truncf %57 : vector<17x8xf32> to vector<17x8xbf16>
    %cst_43 = arith.constant dense<0.000000e+00> : vector<17x8xf32>
    %59 = tpu.matmul %58, %39, %cst_43 {dimension_numbers = #tpu.dot_dimension_numbers<[1], [0], [0], [1], [0, 0, 1, 1], [], []>} : vector<17x8xbf16>, vector<8x8xbf16>, vector<17x8xf32> -> vector<17x8xf32>
    %cst_44 = arith.constant dense<0.000000e+00> : vector<8x16xf32>
    %60 = tpu.matmul %35, %41, %cst_44 {dimension_numbers = #tpu.dot_dimension_numbers<[1], [1], [0], [0], [0, 0, 1, 0], [], []>} : vector<8x8xbf16>, vector<16x8xbf16>, vector<8x16xf32> -> vector<8x16xf32>
    %cst_45 = arith.constant -1.000000e+09 : f32
    %61 = vector.broadcast %cst_45 : f32 to vector<8x16xf32>
    %62 = arith.select %27, %60, %61 : vector<8x16xi1>, vector<8x16xf32>
    %cst_46 = arith.constant dense<0xFF800000> : vector<8xf32>
    %63 = vector.multi_reduction <maximumf>, %62, %cst_46 [1] : vector<8x16xf32> to vector<8xf32>
    %64 = vector.shape_cast %63 : vector<8xf32> to vector<8x1xf32>
    %65 = vector.broadcast %64 : vector<8x1xf32> to vector<8x16xf32>
    %66 = arith.subf %62, %65 : vector<8x16xf32>
    %67 = math.exp %66 : vector<8x16xf32>
    %cst_47 = arith.constant dense<0.000000e+00> : vector<8xf32>
    %68 = vector.multi_reduction <add>, %67, %cst_47 [1] : vector<8x16xf32> to vector<8xf32>
    %69 = vector.shape_cast %68 : vector<8xf32> to vector<8x1xf32>
    %70 = tpu.reciprocal %69 {approx = true} : vector<8x1xf32> -> vector<8x1xf32>
    %71 = vector.broadcast %70 : vector<8x1xf32> to vector<8x16xf32>
    %72 = arith.mulf %67, %71 : vector<8x16xf32>
    %73 = arith.mulf %72, %9 : vector<8x16xf32>
    %74 = arith.truncf %73 : vector<8x16xf32> to vector<8x16xbf16>
    %cst_48 = arith.constant dense<0.000000e+00> : vector<8x8xf32>
    %75 = tpu.matmul %74, %43, %cst_48 {dimension_numbers = #tpu.dot_dimension_numbers<[1], [0], [0], [1], [0, 0, 1, 1], [], []>} : vector<8x16xbf16>, vector<16x8xbf16>, vector<8x8xf32> -> vector<8x8xf32>
    %c0_49 = arith.constant 0 : index
    %c0_50 = arith.constant 0 : index
    %c8 = arith.constant 8 : index
    %76 = vector.load %arg2[%c0_49, %c0_50, %c8] : memref<1x25x32xbf16, #tpu.memory_space<vmem>>, vector<1x17x8xbf16>
    %77 = vector.shape_cast %76 : vector<1x17x8xbf16> to vector<17x8xbf16>
    %cst_51 = arith.constant 3.535160e-01 : bf16
    %78 = vector.broadcast %cst_51 : bf16 to vector<17x8xbf16>
    %79 = arith.mulf %77, %78 : vector<17x8xbf16>
    %c0_52 = arith.constant 0 : index
    %c17_53 = arith.constant 17 : index
    %c8_54 = arith.constant 8 : index
    %80 = vector.load %arg2[%c0_52, %c17_53, %c8_54] : memref<1x25x32xbf16, #tpu.memory_space<vmem>>, vector<1x8x8xbf16>
    %81 = vector.shape_cast %80 : vector<1x8x8xbf16> to vector<8x8xbf16>
    %cst_55 = arith.constant 3.535160e-01 : bf16
    %82 = vector.broadcast %cst_55 : bf16 to vector<8x8xbf16>
    %83 = arith.mulf %81, %82 : vector<8x8xbf16>
    %c0_56 = arith.constant 0 : index
    %c17_57 = arith.constant 17 : index
    %c8_58 = arith.constant 8 : index
    %84 = vector.load %arg3[%c0_56, %c17_57, %c8_58] : memref<1x25x32xbf16, #tpu.memory_space<vmem>>, vector<1x8x8xbf16>
    %85 = vector.shape_cast %84 : vector<1x8x8xbf16> to vector<8x8xbf16>
    %c0_59 = arith.constant 0 : index
    %c17_60 = arith.constant 17 : index
    %c8_61 = arith.constant 8 : index
    %86 = vector.load %arg4[%c0_59, %c17_60, %c8_61] : memref<1x25x32xbf16, #tpu.memory_space<vmem>>, vector<1x8x8xbf16>
    %87 = vector.shape_cast %86 : vector<1x8x8xbf16> to vector<8x8xbf16>
    %c0_62 = arith.constant 0 : index
    %c0_63 = arith.constant 0 : index
    %c8_64 = arith.constant 8 : index
    %88 = vector.load %arg3[%c0_62, %c0_63, %c8_64] : memref<1x25x32xbf16, #tpu.memory_space<vmem>>, vector<1x16x8xbf16>
    %89 = vector.shape_cast %88 : vector<1x16x8xbf16> to vector<16x8xbf16>
    %c0_65 = arith.constant 0 : index
    %c0_66 = arith.constant 0 : index
    %c8_67 = arith.constant 8 : index
    %90 = vector.load %arg4[%c0_65, %c0_66, %c8_67] : memref<1x25x32xbf16, #tpu.memory_space<vmem>>, vector<1x16x8xbf16>
    %91 = vector.shape_cast %90 : vector<1x16x8xbf16> to vector<16x8xbf16>
    %cst_68 = arith.constant dense<0.000000e+00> : vector<17x8xf32>
    %92 = tpu.matmul %79, %85, %cst_68 {dimension_numbers = #tpu.dot_dimension_numbers<[1], [1], [0], [0], [0, 0, 1, 0], [], []>} : vector<17x8xbf16>, vector<8x8xbf16>, vector<17x8xf32> -> vector<17x8xf32>
    %cst_69 = arith.constant -1.000000e+09 : f32
    %93 = vector.broadcast %cst_69 : f32 to vector<17x8xf32>
    %94 = arith.select %18, %92, %93 : vector<17x8xi1>, vector<17x8xf32>
    %cst_70 = arith.constant dense<0xFF800000> : vector<17xf32>
    %95 = vector.multi_reduction <maximumf>, %94, %cst_70 [1] : vector<17x8xf32> to vector<17xf32>
    %96 = vector.shape_cast %95 : vector<17xf32> to vector<17x1xf32>
    %97 = vector.broadcast %96 : vector<17x1xf32> to vector<17x8xf32>
    %98 = arith.subf %94, %97 : vector<17x8xf32>
    %99 = math.exp %98 : vector<17x8xf32>
    %cst_71 = arith.constant dense<0.000000e+00> : vector<17xf32>
    %100 = vector.multi_reduction <add>, %99, %cst_71 [1] : vector<17x8xf32> to vector<17xf32>
    %101 = vector.shape_cast %100 : vector<17xf32> to vector<17x1xf32>
    %102 = tpu.reciprocal %101 {approx = true} : vector<17x1xf32> -> vector<17x1xf32>
    %103 = vector.broadcast %102 : vector<17x1xf32> to vector<17x8xf32>
    %104 = arith.mulf %99, %103 : vector<17x8xf32>
    %105 = arith.mulf %104, %4 : vector<17x8xf32>
    %106 = arith.truncf %105 : vector<17x8xf32> to vector<17x8xbf16>
    %cst_72 = arith.constant dense<0.000000e+00> : vector<17x8xf32>
    %107 = tpu.matmul %106, %87, %cst_72 {dimension_numbers = #tpu.dot_dimension_numbers<[1], [0], [0], [1], [0, 0, 1, 1], [], []>} : vector<17x8xbf16>, vector<8x8xbf16>, vector<17x8xf32> -> vector<17x8xf32>
    %cst_73 = arith.constant dense<0.000000e+00> : vector<8x16xf32>
    %108 = tpu.matmul %83, %89, %cst_73 {dimension_numbers = #tpu.dot_dimension_numbers<[1], [1], [0], [0], [0, 0, 1, 0], [], []>} : vector<8x8xbf16>, vector<16x8xbf16>, vector<8x16xf32> -> vector<8x16xf32>
    %cst_74 = arith.constant -1.000000e+09 : f32
    %109 = vector.broadcast %cst_74 : f32 to vector<8x16xf32>
    %110 = arith.select %27, %108, %109 : vector<8x16xi1>, vector<8x16xf32>
    %cst_75 = arith.constant dense<0xFF800000> : vector<8xf32>
    %111 = vector.multi_reduction <maximumf>, %110, %cst_75 [1] : vector<8x16xf32> to vector<8xf32>
    %112 = vector.shape_cast %111 : vector<8xf32> to vector<8x1xf32>
    %113 = vector.broadcast %112 : vector<8x1xf32> to vector<8x16xf32>
    %114 = arith.subf %110, %113 : vector<8x16xf32>
    %115 = math.exp %114 : vector<8x16xf32>
    %cst_76 = arith.constant dense<0.000000e+00> : vector<8xf32>
    %116 = vector.multi_reduction <add>, %115, %cst_76 [1] : vector<8x16xf32> to vector<8xf32>
    %117 = vector.shape_cast %116 : vector<8xf32> to vector<8x1xf32>
    %118 = tpu.reciprocal %117 {approx = true} : vector<8x1xf32> -> vector<8x1xf32>
    %119 = vector.broadcast %118 : vector<8x1xf32> to vector<8x16xf32>
    %120 = arith.mulf %115, %119 : vector<8x16xf32>
    %121 = arith.mulf %120, %9 : vector<8x16xf32>
    %122 = arith.truncf %121 : vector<8x16xf32> to vector<8x16xbf16>
    %cst_77 = arith.constant dense<0.000000e+00> : vector<8x8xf32>
    %123 = tpu.matmul %122, %91, %cst_77 {dimension_numbers = #tpu.dot_dimension_numbers<[1], [0], [0], [1], [0, 0, 1, 1], [], []>} : vector<8x16xbf16>, vector<16x8xbf16>, vector<8x8xf32> -> vector<8x8xf32>
    %c0_78 = arith.constant 0 : index
    %c0_79 = arith.constant 0 : index
    %c16 = arith.constant 16 : index
    %124 = vector.load %arg2[%c0_78, %c0_79, %c16] : memref<1x25x32xbf16, #tpu.memory_space<vmem>>, vector<1x17x8xbf16>
    %125 = vector.shape_cast %124 : vector<1x17x8xbf16> to vector<17x8xbf16>
    %cst_80 = arith.constant 3.535160e-01 : bf16
    %126 = vector.broadcast %cst_80 : bf16 to vector<17x8xbf16>
    %127 = arith.mulf %125, %126 : vector<17x8xbf16>
    %c0_81 = arith.constant 0 : index
    %c17_82 = arith.constant 17 : index
    %c16_83 = arith.constant 16 : index
    %128 = vector.load %arg2[%c0_81, %c17_82, %c16_83] : memref<1x25x32xbf16, #tpu.memory_space<vmem>>, vector<1x8x8xbf16>
    %129 = vector.shape_cast %128 : vector<1x8x8xbf16> to vector<8x8xbf16>
    %cst_84 = arith.constant 3.535160e-01 : bf16
    %130 = vector.broadcast %cst_84 : bf16 to vector<8x8xbf16>
    %131 = arith.mulf %129, %130 : vector<8x8xbf16>
    %c0_85 = arith.constant 0 : index
    %c17_86 = arith.constant 17 : index
    %c16_87 = arith.constant 16 : index
    %132 = vector.load %arg3[%c0_85, %c17_86, %c16_87] : memref<1x25x32xbf16, #tpu.memory_space<vmem>>, vector<1x8x8xbf16>
    %133 = vector.shape_cast %132 : vector<1x8x8xbf16> to vector<8x8xbf16>
    %c0_88 = arith.constant 0 : index
    %c17_89 = arith.constant 17 : index
    %c16_90 = arith.constant 16 : index
    %134 = vector.load %arg4[%c0_88, %c17_89, %c16_90] : memref<1x25x32xbf16, #tpu.memory_space<vmem>>, vector<1x8x8xbf16>
    %135 = vector.shape_cast %134 : vector<1x8x8xbf16> to vector<8x8xbf16>
    %c0_91 = arith.constant 0 : index
    %c0_92 = arith.constant 0 : index
    %c16_93 = arith.constant 16 : index
    %136 = vector.load %arg3[%c0_91, %c0_92, %c16_93] : memref<1x25x32xbf16, #tpu.memory_space<vmem>>, vector<1x16x8xbf16>
    %137 = vector.shape_cast %136 : vector<1x16x8xbf16> to vector<16x8xbf16>
    %c0_94 = arith.constant 0 : index
    %c0_95 = arith.constant 0 : index
    %c16_96 = arith.constant 16 : index
    %138 = vector.load %arg4[%c0_94, %c0_95, %c16_96] : memref<1x25x32xbf16, #tpu.memory_space<vmem>>, vector<1x16x8xbf16>
    %139 = vector.shape_cast %138 : vector<1x16x8xbf16> to vector<16x8xbf16>
    %cst_97 = arith.constant dense<0.000000e+00> : vector<17x8xf32>
    %140 = tpu.matmul %127, %133, %cst_97 {dimension_numbers = #tpu.dot_dimension_numbers<[1], [1], [0], [0], [0, 0, 1, 0], [], []>} : vector<17x8xbf16>, vector<8x8xbf16>, vector<17x8xf32> -> vector<17x8xf32>
    %cst_98 = arith.constant -1.000000e+09 : f32
    %141 = vector.broadcast %cst_98 : f32 to vector<17x8xf32>
    %142 = arith.select %18, %140, %141 : vector<17x8xi1>, vector<17x8xf32>
    %cst_99 = arith.constant dense<0xFF800000> : vector<17xf32>
    %143 = vector.multi_reduction <maximumf>, %142, %cst_99 [1] : vector<17x8xf32> to vector<17xf32>
    %144 = vector.shape_cast %143 : vector<17xf32> to vector<17x1xf32>
    %145 = vector.broadcast %144 : vector<17x1xf32> to vector<17x8xf32>
    %146 = arith.subf %142, %145 : vector<17x8xf32>
    %147 = math.exp %146 : vector<17x8xf32>
    %cst_100 = arith.constant dense<0.000000e+00> : vector<17xf32>
    %148 = vector.multi_reduction <add>, %147, %cst_100 [1] : vector<17x8xf32> to vector<17xf32>
    %149 = vector.shape_cast %148 : vector<17xf32> to vector<17x1xf32>
    %150 = tpu.reciprocal %149 {approx = true} : vector<17x1xf32> -> vector<17x1xf32>
    %151 = vector.broadcast %150 : vector<17x1xf32> to vector<17x8xf32>
    %152 = arith.mulf %147, %151 : vector<17x8xf32>
    %153 = arith.mulf %152, %4 : vector<17x8xf32>
    %154 = arith.truncf %153 : vector<17x8xf32> to vector<17x8xbf16>
    %cst_101 = arith.constant dense<0.000000e+00> : vector<17x8xf32>
    %155 = tpu.matmul %154, %135, %cst_101 {dimension_numbers = #tpu.dot_dimension_numbers<[1], [0], [0], [1], [0, 0, 1, 1], [], []>} : vector<17x8xbf16>, vector<8x8xbf16>, vector<17x8xf32> -> vector<17x8xf32>
    %cst_102 = arith.constant dense<0.000000e+00> : vector<8x16xf32>
    %156 = tpu.matmul %131, %137, %cst_102 {dimension_numbers = #tpu.dot_dimension_numbers<[1], [1], [0], [0], [0, 0, 1, 0], [], []>} : vector<8x8xbf16>, vector<16x8xbf16>, vector<8x16xf32> -> vector<8x16xf32>
    %cst_103 = arith.constant -1.000000e+09 : f32
    %157 = vector.broadcast %cst_103 : f32 to vector<8x16xf32>
    %158 = arith.select %27, %156, %157 : vector<8x16xi1>, vector<8x16xf32>
    %cst_104 = arith.constant dense<0xFF800000> : vector<8xf32>
    %159 = vector.multi_reduction <maximumf>, %158, %cst_104 [1] : vector<8x16xf32> to vector<8xf32>
    %160 = vector.shape_cast %159 : vector<8xf32> to vector<8x1xf32>
    %161 = vector.broadcast %160 : vector<8x1xf32> to vector<8x16xf32>
    %162 = arith.subf %158, %161 : vector<8x16xf32>
    %163 = math.exp %162 : vector<8x16xf32>
    %cst_105 = arith.constant dense<0.000000e+00> : vector<8xf32>
    %164 = vector.multi_reduction <add>, %163, %cst_105 [1] : vector<8x16xf32> to vector<8xf32>
    %165 = vector.shape_cast %164 : vector<8xf32> to vector<8x1xf32>
    %166 = tpu.reciprocal %165 {approx = true} : vector<8x1xf32> -> vector<8x1xf32>
    %167 = vector.broadcast %166 : vector<8x1xf32> to vector<8x16xf32>
    %168 = arith.mulf %163, %167 : vector<8x16xf32>
    %169 = arith.mulf %168, %9 : vector<8x16xf32>
    %170 = arith.truncf %169 : vector<8x16xf32> to vector<8x16xbf16>
    %cst_106 = arith.constant dense<0.000000e+00> : vector<8x8xf32>
    %171 = tpu.matmul %170, %139, %cst_106 {dimension_numbers = #tpu.dot_dimension_numbers<[1], [0], [0], [1], [0, 0, 1, 1], [], []>} : vector<8x16xbf16>, vector<16x8xbf16>, vector<8x8xf32> -> vector<8x8xf32>
    %c0_107 = arith.constant 0 : index
    %c0_108 = arith.constant 0 : index
    %c24 = arith.constant 24 : index
    %172 = vector.load %arg2[%c0_107, %c0_108, %c24] : memref<1x25x32xbf16, #tpu.memory_space<vmem>>, vector<1x17x8xbf16>
    %173 = vector.shape_cast %172 : vector<1x17x8xbf16> to vector<17x8xbf16>
    %cst_109 = arith.constant 3.535160e-01 : bf16
    %174 = vector.broadcast %cst_109 : bf16 to vector<17x8xbf16>
    %175 = arith.mulf %173, %174 : vector<17x8xbf16>
    %c0_110 = arith.constant 0 : index
    %c17_111 = arith.constant 17 : index
    %c24_112 = arith.constant 24 : index
    %176 = vector.load %arg2[%c0_110, %c17_111, %c24_112] : memref<1x25x32xbf16, #tpu.memory_space<vmem>>, vector<1x8x8xbf16>
    %177 = vector.shape_cast %176 : vector<1x8x8xbf16> to vector<8x8xbf16>
    %cst_113 = arith.constant 3.535160e-01 : bf16
    %178 = vector.broadcast %cst_113 : bf16 to vector<8x8xbf16>
    %179 = arith.mulf %177, %178 : vector<8x8xbf16>
    %c0_114 = arith.constant 0 : index
    %c17_115 = arith.constant 17 : index
    %c24_116 = arith.constant 24 : index
    %180 = vector.load %arg3[%c0_114, %c17_115, %c24_116] : memref<1x25x32xbf16, #tpu.memory_space<vmem>>, vector<1x8x8xbf16>
    %181 = vector.shape_cast %180 : vector<1x8x8xbf16> to vector<8x8xbf16>
    %c0_117 = arith.constant 0 : index
    %c17_118 = arith.constant 17 : index
    %c24_119 = arith.constant 24 : index
    %182 = vector.load %arg4[%c0_117, %c17_118, %c24_119] : memref<1x25x32xbf16, #tpu.memory_space<vmem>>, vector<1x8x8xbf16>
    %183 = vector.shape_cast %182 : vector<1x8x8xbf16> to vector<8x8xbf16>
    %c0_120 = arith.constant 0 : index
    %c0_121 = arith.constant 0 : index
    %c24_122 = arith.constant 24 : index
    %184 = vector.load %arg3[%c0_120, %c0_121, %c24_122] : memref<1x25x32xbf16, #tpu.memory_space<vmem>>, vector<1x16x8xbf16>
    %185 = vector.shape_cast %184 : vector<1x16x8xbf16> to vector<16x8xbf16>
    %c0_123 = arith.constant 0 : index
    %c0_124 = arith.constant 0 : index
    %c24_125 = arith.constant 24 : index
    %186 = vector.load %arg4[%c0_123, %c0_124, %c24_125] : memref<1x25x32xbf16, #tpu.memory_space<vmem>>, vector<1x16x8xbf16>
    %187 = vector.shape_cast %186 : vector<1x16x8xbf16> to vector<16x8xbf16>
    %cst_126 = arith.constant dense<0.000000e+00> : vector<17x8xf32>
    %188 = tpu.matmul %175, %181, %cst_126 {dimension_numbers = #tpu.dot_dimension_numbers<[1], [1], [0], [0], [0, 0, 1, 0], [], []>} : vector<17x8xbf16>, vector<8x8xbf16>, vector<17x8xf32> -> vector<17x8xf32>
    %cst_127 = arith.constant -1.000000e+09 : f32
    %189 = vector.broadcast %cst_127 : f32 to vector<17x8xf32>
    %190 = arith.select %18, %188, %189 : vector<17x8xi1>, vector<17x8xf32>
    %cst_128 = arith.constant dense<0xFF800000> : vector<17xf32>
    %191 = vector.multi_reduction <maximumf>, %190, %cst_128 [1] : vector<17x8xf32> to vector<17xf32>
    %192 = vector.shape_cast %191 : vector<17xf32> to vector<17x1xf32>
    %193 = vector.broadcast %192 : vector<17x1xf32> to vector<17x8xf32>
    %194 = arith.subf %190, %193 : vector<17x8xf32>
    %195 = math.exp %194 : vector<17x8xf32>
    %cst_129 = arith.constant dense<0.000000e+00> : vector<17xf32>
    %196 = vector.multi_reduction <add>, %195, %cst_129 [1] : vector<17x8xf32> to vector<17xf32>
    %197 = vector.shape_cast %196 : vector<17xf32> to vector<17x1xf32>
    %198 = tpu.reciprocal %197 {approx = true} : vector<17x1xf32> -> vector<17x1xf32>
    %199 = vector.broadcast %198 : vector<17x1xf32> to vector<17x8xf32>
    %200 = arith.mulf %195, %199 : vector<17x8xf32>
    %201 = arith.mulf %200, %4 : vector<17x8xf32>
    %202 = arith.truncf %201 : vector<17x8xf32> to vector<17x8xbf16>
    %cst_130 = arith.constant dense<0.000000e+00> : vector<17x8xf32>
    %203 = tpu.matmul %202, %183, %cst_130 {dimension_numbers = #tpu.dot_dimension_numbers<[1], [0], [0], [1], [0, 0, 1, 1], [], []>} : vector<17x8xbf16>, vector<8x8xbf16>, vector<17x8xf32> -> vector<17x8xf32>
    %cst_131 = arith.constant dense<0.000000e+00> : vector<8x16xf32>
    %204 = tpu.matmul %179, %185, %cst_131 {dimension_numbers = #tpu.dot_dimension_numbers<[1], [1], [0], [0], [0, 0, 1, 0], [], []>} : vector<8x8xbf16>, vector<16x8xbf16>, vector<8x16xf32> -> vector<8x16xf32>
    %cst_132 = arith.constant -1.000000e+09 : f32
    %205 = vector.broadcast %cst_132 : f32 to vector<8x16xf32>
    %206 = arith.select %27, %204, %205 : vector<8x16xi1>, vector<8x16xf32>
    %cst_133 = arith.constant dense<0xFF800000> : vector<8xf32>
    %207 = vector.multi_reduction <maximumf>, %206, %cst_133 [1] : vector<8x16xf32> to vector<8xf32>
    %208 = vector.shape_cast %207 : vector<8xf32> to vector<8x1xf32>
    %209 = vector.broadcast %208 : vector<8x1xf32> to vector<8x16xf32>
    %210 = arith.subf %206, %209 : vector<8x16xf32>
    %211 = math.exp %210 : vector<8x16xf32>
    %cst_134 = arith.constant dense<0.000000e+00> : vector<8xf32>
    %212 = vector.multi_reduction <add>, %211, %cst_134 [1] : vector<8x16xf32> to vector<8xf32>
    %213 = vector.shape_cast %212 : vector<8xf32> to vector<8x1xf32>
    %214 = tpu.reciprocal %213 {approx = true} : vector<8x1xf32> -> vector<8x1xf32>
    %215 = vector.broadcast %214 : vector<8x1xf32> to vector<8x16xf32>
    %216 = arith.mulf %211, %215 : vector<8x16xf32>
    %217 = arith.mulf %216, %9 : vector<8x16xf32>
    %218 = arith.truncf %217 : vector<8x16xf32> to vector<8x16xbf16>
    %cst_135 = arith.constant dense<0.000000e+00> : vector<8x8xf32>
    %219 = tpu.matmul %218, %187, %cst_135 {dimension_numbers = #tpu.dot_dimension_numbers<[1], [0], [0], [1], [0, 0, 1, 1], [], []>} : vector<8x16xbf16>, vector<16x8xbf16>, vector<8x8xf32> -> vector<8x8xf32>
    %220 = tpu.concatenate %59, %107, %155, %203 in 1 : vector<17x8xf32>, vector<17x8xf32>, vector<17x8xf32>, vector<17x8xf32> -> vector<17x32xf32>
    %221 = tpu.concatenate %75, %123, %171, %219 in 1 : vector<8x8xf32>, vector<8x8xf32>, vector<8x8xf32>, vector<8x8xf32> -> vector<8x32xf32>
    %222 = arith.truncf %220 : vector<17x32xf32> to vector<17x32xbf16>
    %c0_136 = arith.constant 0 : index
    %c0_137 = arith.constant 0 : index
    %c0_138 = arith.constant 0 : index
    %223 = vector.load %arg11[%c0_136, %c0_137, %c0_138] : memref<1x25x32xbf16, #tpu.memory_space<vmem>>, vector<1x17x32xbf16>
    %224 = vector.shape_cast %223 : vector<1x17x32xbf16> to vector<17x32xbf16>
    %225 = vector.shape_cast %222 : vector<17x32xbf16> to vector<1x17x32xbf16>
    tpu.vector_store %arg11[%c0_136, %c0_137, %c0_138], %225 {strides = array<i32>} : memref<1x25x32xbf16, #tpu.memory_space<vmem>>, vector<1x17x32xbf16>,
    %226 = arith.truncf %221 : vector<8x32xf32> to vector<8x32xbf16>
    %c0_139 = arith.constant 0 : index
    %c17_140 = arith.constant 17 : index
    %c0_141 = arith.constant 0 : index
    %227 = vector.load %arg11[%c0_139, %c17_140, %c0_141] : memref<1x25x32xbf16, #tpu.memory_space<vmem>>, vector<1x8x32xbf16>
    %228 = vector.shape_cast %227 : vector<1x8x32xbf16> to vector<8x32xbf16>
    %229 = vector.shape_cast %226 : vector<8x32xbf16> to vector<1x8x32xbf16>
    tpu.vector_store %arg11[%c0_139, %c17_140, %c0_141], %229 {strides = array<i32>} : memref<1x25x32xbf16, #tpu.memory_space<vmem>>, vector<1x8x32xbf16>,
    return
  }
  func.func @transform_0(%arg0: i32, %arg1: i32) -> (i32, i32, i32) {
    %c0_i32 = arith.constant 0 : i32
    %c0_i32_0 = arith.constant 0 : i32
    return %arg0, %c0_i32, %arg1 : i32, i32, i32
  }
  func.func @transform_1(%arg0: i32, %arg1: i32) -> (i32, i32, i32) {
    %c0_i32 = arith.constant 0 : i32
    %c0_i32_0 = arith.constant 0 : i32
    return %arg0, %c0_i32, %arg1 : i32, i32, i32
  }
  func.func @transform_2(%arg0: i32, %arg1: i32) -> (i32, i32, i32) {
    %c0_i32 = arith.constant 0 : i32
    %c0_i32_0 = arith.constant 0 : i32
    return %arg0, %c0_i32, %arg1 : i32, i32, i32
  }
  func.func @transform_3(%arg0: i32, %arg1: i32) -> (i32, i32, i32) {
    %c0_i32 = arith.constant 0 : i32
    %c0_i32_0 = arith.constant 0 : i32
    %c0_i32_1 = arith.constant 0 : i32
    return %arg0, %c0_i32, %c0_i32_0 : i32, i32, i32
  }
  func.func @transform_4(%arg0: i32, %arg1: i32) -> (i32, i32, i32) {
    %c0_i32 = arith.constant 0 : i32
    %c0_i32_0 = arith.constant 0 : i32
    %c0_i32_1 = arith.constant 0 : i32
    return %arg0, %c0_i32, %c0_i32_0 : i32, i32, i32
  }
  func.func @transform_5(%arg0: i32, %arg1: i32) -> (i32, i32, i32) {
    %c0_i32 = arith.constant 0 : i32
    %c0_i32_0 = arith.constant 0 : i32
    %c0_i32_1 = arith.constant 0 : i32
    return %arg0, %c0_i32, %c0_i32_0 : i32, i32, i32
  }
  func.func @transform_6(%arg0: i32, %arg1: i32) -> (i32, i32, i32) {
    %c0_i32 = arith.constant 0 : i32
    %c0_i32_0 = arith.constant 0 : i32
    %c0_i32_1 = arith.constant 0 : i32
    return %arg0, %c0_i32, %c0_i32_0 : i32, i32, i32
  }
  func.func @transform_7(%arg0: i32, %arg1: i32) -> (i32, i32, i32) {
    %c0_i32 = arith.constant 0 : i32
    %c0_i32_0 = arith.constant 0 : i32
    %c0_i32_1 = arith.constant 0 : i32
    return %arg0, %c0_i32, %c0_i32_0 : i32, i32, i32
  }
  func.func @transform_8(%arg0: i32, %arg1: i32) -> (i32, i32, i32) {
    %c0_i32 = arith.constant 0 : i32
    %c0_i32_0 = arith.constant 0 : i32
    %c0_i32_1 = arith.constant 0 : i32
    return %arg0, %c0_i32, %c0_i32_0 : i32, i32, i32
  }
  func.func @transform_9(%arg0: i32, %arg1: i32) -> (i32, i32, i32) {
    %c0_i32 = arith.constant 0 : i32
    %c0_i32_0 = arith.constant 0 : i32
    return %arg0, %c0_i32, %arg1 : i32, i32, i32
  }
}

module attributes {stable_mosaic.version = 11 : i64} {
  func.func @kernel(%arg0: i32, %arg1: i32, %arg2: i32, %arg3: memref<56x64xbf16, #tpu.memory_space<vmem>>, %arg4: memref<64x32xbf16, #tpu.memory_space<vmem>>, %arg5: memref<1x32xf32, #tpu.memory_space<vmem>>, %arg6: memref<56x32xf32, #tpu.memory_space<vmem>>, %arg7: memref<56x32xf32, #tpu.memory_space<vmem>>, %arg8: memref<56x32xf32, #tpu.memory_space<vmem>>) attributes {dimension_semantics = [#tpu.dimension_semantics<parallel>, #tpu.dimension_semantics<parallel>, #tpu.dimension_semantics<arbitrary>], iteration_bounds = array<i64: 1, 1, 1>, scalar_prefetch = 0 : i64, scratch_operands = 1 : i64, tpu.core_type = #tpu.core_type<tc>, window_params = [{transform_indices = @transform_0, window_bounds = array<i64: 56, 64>}, {transform_indices = @transform_1, window_bounds = array<i64: 64, 32>}, {transform_indices = @transform_2, window_bounds = array<i64: 1, 32>}, {transform_indices = @transform_3, window_bounds = array<i64: 56, 32>}, {transform_indices = @transform_4, window_bounds = array<i64: 56, 32>}]} {
    %c0_i32 = arith.constant 0 : i32
    %0 = arith.cmpi eq, %arg2, %c0_i32 : i32
    %1 = arith.extui %0 : i1 to i32
    %c0_i32_0 = arith.constant 0 : i32
    %2 = arith.cmpi ne, %1, %c0_i32_0 : i32
    scf.if %2 {
      %cst_10 = arith.constant 0.000000e+00 : f32
      %12 = vector.broadcast %cst_10 : f32 to vector<56x32xf32>
      %c0_11 = arith.constant 0 : index
      %c0_12 = arith.constant 0 : index
      %13 = vector.load %arg8[%c0_11, %c0_12] : memref<56x32xf32, #tpu.memory_space<vmem>>, vector<56x32xf32>
      tpu.vector_store %arg8[%c0_11, %c0_12], %12 {strides = array<i32>} : memref<56x32xf32, #tpu.memory_space<vmem>>, vector<56x32xf32>,
    } else {
    }
    %c0 = arith.constant 0 : index
    %c0_1 = arith.constant 0 : index
    %3 = vector.load %arg4[%c0, %c0_1] : memref<64x32xbf16, #tpu.memory_space<vmem>>, vector<64x32xbf16>
    %c0_2 = arith.constant 0 : index
    %c0_3 = arith.constant 0 : index
    %4 = vector.load %arg3[%c0_2, %c0_3] : memref<56x64xbf16, #tpu.memory_space<vmem>>, vector<56x64xbf16>
    %c0_4 = arith.constant 0 : index
    %c0_5 = arith.constant 0 : index
    %5 = vector.load %arg8[%c0_4, %c0_5] : memref<56x32xf32, #tpu.memory_space<vmem>>, vector<56x32xf32>
    %cst = arith.constant dense<0.000000e+00> : vector<56x32xf32>
    %6 = tpu.matmul %4, %3, %cst {dimension_numbers = #tpu.dot_dimension_numbers<[1], [0], [0], [1], [0, 0, 1, 1], [], []>} : vector<56x64xbf16>, vector<64x32xbf16>, vector<56x32xf32> -> vector<56x32xf32>
    %7 = arith.addf %5, %6 : vector<56x32xf32>
    %c0_6 = arith.constant 0 : index
    %c0_7 = arith.constant 0 : index
    %8 = vector.load %arg8[%c0_6, %c0_7] : memref<56x32xf32, #tpu.memory_space<vmem>>, vector<56x32xf32>
    tpu.vector_store %arg8[%c0_6, %c0_7], %7 {strides = array<i32>} : memref<56x32xf32, #tpu.memory_space<vmem>>, vector<56x32xf32>,
    %c0_i32_8 = arith.constant 0 : i32
    %9 = arith.cmpi eq, %arg2, %c0_i32_8 : i32
    %10 = arith.extui %9 : i1 to i32
    %c0_i32_9 = arith.constant 0 : i32
    %11 = arith.cmpi ne, %10, %c0_i32_9 : i32
    scf.if %11 {
      %c0_10 = arith.constant 0 : index
      %c0_11 = arith.constant 0 : index
      %12 = vector.load %arg8[%c0_10, %c0_11] : memref<56x32xf32, #tpu.memory_space<vmem>>, vector<56x32xf32>
      %c0_12 = arith.constant 0 : index
      %c0_13 = arith.constant 0 : index
      %13 = vector.load %arg5[%c0_12, %c0_13] : memref<1x32xf32, #tpu.memory_space<vmem>>, vector<1x32xf32>
      %14 = vector.broadcast %13 : vector<1x32xf32> to vector<56x32xf32>
      %15 = arith.addf %12, %14 : vector<56x32xf32>
      %c0_14 = arith.constant 0 : index
      %c0_15 = arith.constant 0 : index
      %16 = vector.load %arg6[%c0_14, %c0_15] : memref<56x32xf32, #tpu.memory_space<vmem>>, vector<56x32xf32>
      %17 = arith.addf %15, %16 : vector<56x32xf32>
      %c0_16 = arith.constant 0 : index
      %c0_17 = arith.constant 0 : index
      %18 = vector.load %arg7[%c0_16, %c0_17] : memref<56x32xf32, #tpu.memory_space<vmem>>, vector<56x32xf32>
      tpu.vector_store %arg7[%c0_16, %c0_17], %17 {strides = array<i32>} : memref<56x32xf32, #tpu.memory_space<vmem>>, vector<56x32xf32>,
    } else {
    }
    return
  }
  func.func @transform_0(%arg0: i32, %arg1: i32, %arg2: i32) -> (i32, i32) {
    %c0_i32 = arith.constant 0 : i32
    return %arg0, %arg2 : i32, i32
  }
  func.func @transform_1(%arg0: i32, %arg1: i32, %arg2: i32) -> (i32, i32) {
    %c0_i32 = arith.constant 0 : i32
    return %arg2, %arg1 : i32, i32
  }
  func.func @transform_2(%arg0: i32, %arg1: i32, %arg2: i32) -> (i32, i32) {
    %c0_i32 = arith.constant 0 : i32
    %c0_i32_0 = arith.constant 0 : i32
    return %c0_i32, %arg1 : i32, i32
  }
  func.func @transform_3(%arg0: i32, %arg1: i32, %arg2: i32) -> (i32, i32) {
    %c0_i32 = arith.constant 0 : i32
    return %arg0, %arg1 : i32, i32
  }
  func.func @transform_4(%arg0: i32, %arg1: i32, %arg2: i32) -> (i32, i32) {
    %c0_i32 = arith.constant 0 : i32
    return %arg0, %arg1 : i32, i32
  }
}

module attributes {stable_mosaic.version = 11 : i64} {
  func.func @_attn_kernel(%arg0: i32, %arg1: i32, %arg2: memref<1x25x32xbf16, #tpu.memory_space<vmem>>, %arg3: memref<1x25x32xbf16, #tpu.memory_space<vmem>>, %arg4: memref<1x25x32xbf16, #tpu.memory_space<vmem>>, %arg5: memref<1x17x8xf32, #tpu.memory_space<vmem>>, %arg6: memref<1x8x16xf32, #tpu.memory_space<vmem>>, %arg7: memref<1x17x1xf32, #tpu.memory_space<vmem>>, %arg8: memref<1x1x8xf32, #tpu.memory_space<vmem>>, %arg9: memref<1x8x1xf32, #tpu.memory_space<vmem>>, %arg10: memref<1x1x16xf32, #tpu.memory_space<vmem>>, %arg11: memref<1x25x32xbf16, #tpu.memory_space<vmem>>) attributes {dimension_semantics = [#tpu.dimension_semantics<parallel>, #tpu.dimension_semantics<parallel>], iteration_bounds = array<i64: 2, 1>, scalar_prefetch = 0 : i64, scratch_operands = 0 : i64, tpu.core_type = #tpu.core_type<tc>, window_params = [{transform_indices = @transform_0, window_bounds = array<i64: 1, 25, 32>}, {transform_indices = @transform_1, window_bounds = array<i64: 1, 25, 32>}, {transform_indices = @transform_2, window_bounds = array<i64: 1, 25, 32>}, {transform_indices = @transform_3, window_bounds = array<i64: 1, 17, 8>}, {transform_indices = @transform_4, window_bounds = array<i64: 1, 8, 16>}, {transform_indices = @transform_5, window_bounds = array<i64: 1, 17, 1>}, {transform_indices = @transform_6, window_bounds = array<i64: 1, 1, 8>}, {transform_indices = @transform_7, window_bounds = array<i64: 1, 8, 1>}, {transform_indices = @transform_8, window_bounds = array<i64: 1, 1, 16>}, {transform_indices = @transform_9, window_bounds = array<i64: 1, 25, 32>}]} {
    %c0 = arith.constant 0 : index
    %c0_0 = arith.constant 0 : index
    %c0_1 = arith.constant 0 : index
    %0 = vector.load %arg5[%c0, %c0_0, %c0_1] : memref<1x17x8xf32, #tpu.memory_space<vmem>>, vector<1x17x8xf32>
    %1 = vector.shape_cast %0 : vector<1x17x8xf32> to vector<17x8xf32>
    %cst = arith.constant -0.027777778 : f32
    %2 = vector.broadcast %cst : f32 to vector<17x8xf32>
    %3 = arith.mulf %1, %2 : vector<17x8xf32>
    %4 = math.exp %3 : vector<17x8xf32>
    %c0_2 = arith.constant 0 : index
    %c0_3 = arith.constant 0 : index
    %c0_4 = arith.constant 0 : index
    %5 = vector.load %arg6[%c0_2, %c0_3, %c0_4] : memref<1x8x16xf32, #tpu.memory_space<vmem>>, vector<1x8x16xf32>
    %6 = vector.shape_cast %5 : vector<1x8x16xf32> to vector<8x16xf32>
    %cst_5 = arith.constant -0.027777778 : f32
    %7 = vector.broadcast %cst_5 : f32 to vector<8x16xf32>
    %8 = arith.mulf %6, %7 : vector<8x16xf32>
    %9 = math.exp %8 : vector<8x16xf32>
    %c0_6 = arith.constant 0 : index
    %c0_7 = arith.constant 0 : index
    %c0_8 = arith.constant 0 : index
    %10 = vector.load %arg7[%c0_6, %c0_7, %c0_8] : memref<1x17x1xf32, #tpu.memory_space<vmem>>, vector<1x17x1xf32>
    %11 = vector.shape_cast %10 : vector<1x17x1xf32> to vector<17x1xf32>
    %c0_9 = arith.constant 0 : index
    %c0_10 = arith.constant 0 : index
    %c0_11 = arith.constant 0 : index
    %12 = vector.load %arg8[%c0_9, %c0_10, %c0_11] : memref<1x1x8xf32, #tpu.memory_space<vmem>>, vector<1x1x8xf32>
    %13 = vector.shape_cast %12 : vector<1x1x8xf32> to vector<1x8xf32>
    %14 = vector.broadcast %11 : vector<17x1xf32> to vector<17x8xf32>
    %15 = vector.broadcast %13 : vector<1x8xf32> to vector<17x8xf32>
    %16 = arith.mulf %14, %15 : vector<17x8xf32>
    %cst_12 = arith.constant 5.000000e-01 : f32
    %17 = vector.broadcast %cst_12 : f32 to vector<17x8xf32>
    %18 = arith.cmpf oge, %16, %17 : vector<17x8xf32>
    %c0_13 = arith.constant 0 : index
    %c0_14 = arith.constant 0 : index
    %c0_15 = arith.constant 0 : index
    %19 = vector.load %arg9[%c0_13, %c0_14, %c0_15] : memref<1x8x1xf32, #tpu.memory_space<vmem>>, vector<1x8x1xf32>
    %20 = vector.shape_cast %19 : vector<1x8x1xf32> to vector<8x1xf32>
    %c0_16 = arith.constant 0 : index
    %c0_17 = arith.constant 0 : index
    %c0_18 = arith.constant 0 : index
    %21 = vector.load %arg10[%c0_16, %c0_17, %c0_18] : memref<1x1x16xf32, #tpu.memory_space<vmem>>, vector<1x1x16xf32>
    %22 = vector.shape_cast %21 : vector<1x1x16xf32> to vector<1x16xf32>
    %23 = vector.broadcast %20 : vector<8x1xf32> to vector<8x16xf32>
    %24 = vector.broadcast %22 : vector<1x16xf32> to vector<8x16xf32>
    %25 = arith.mulf %23, %24 : vector<8x16xf32>
    %cst_19 = arith.constant 5.000000e-01 : f32
    %26 = vector.broadcast %cst_19 : f32 to vector<8x16xf32>
    %27 = arith.cmpf oge, %25, %26 : vector<8x16xf32>
    %c0_20 = arith.constant 0 : index
    %c0_21 = arith.constant 0 : index
    %c0_22 = arith.constant 0 : index
    %28 = vector.load %arg2[%c0_20, %c0_21, %c0_22] : memref<1x25x32xbf16, #tpu.memory_space<vmem>>, vector<1x17x8xbf16>
    %29 = vector.shape_cast %28 : vector<1x17x8xbf16> to vector<17x8xbf16>
    %cst_23 = arith.constant 3.535160e-01 : bf16
    %30 = vector.broadcast %cst_23 : bf16 to vector<17x8xbf16>
    %31 = arith.mulf %29, %30 : vector<17x8xbf16>
    %c0_24 = arith.constant 0 : index
    %c17 = arith.constant 17 : index
    %c0_25 = arith.constant 0 : index
    %32 = vector.load %arg2[%c0_24, %c17, %c0_25] : memref<1x25x32xbf16, #tpu.memory_space<vmem>>, vector<1x8x8xbf16>
    %33 = vector.shape_cast %32 : vector<1x8x8xbf16> to vector<8x8xbf16>
    %cst_26 = arith.constant 3.535160e-01 : bf16
    %34 = vector.broadcast %cst_26 : bf16 to vector<8x8xbf16>
    %35 = arith.mulf %33, %34 : vector<8x8xbf16>
    %c0_27 = arith.constant 0 : index
    %c17_28 = arith.constant 17 : index
    %c0_29 = arith.constant 0 : index
    %36 = vector.load %arg3[%c0_27, %c17_28, %c0_29] : memref<1x25x32xbf16, #tpu.memory_space<vmem>>, vector<1x8x8xbf16>
    %37 = vector.shape_cast %36 : vector<1x8x8xbf16> to vector<8x8xbf16>
    %c0_30 = arith.constant 0 : index
    %c17_31 = arith.constant 17 : index
    %c0_32 = arith.constant 0 : index
    %38 = vector.load %arg4[%c0_30, %c17_31, %c0_32] : memref<1x25x32xbf16, #tpu.memory_space<vmem>>, vector<1x8x8xbf16>
    %39 = vector.shape_cast %38 : vector<1x8x8xbf16> to vector<8x8xbf16>
    %c0_33 = arith.constant 0 : index
    %c0_34 = arith.constant 0 : index
    %c0_35 = arith.constant 0 : index
    %40 = vector.load %arg3[%c0_33, %c0_34, %c0_35] : memref<1x25x32xbf16, #tpu.memory_space<vmem>>, vector<1x16x8xbf16>
    %41 = vector.shape_cast %40 : vector<1x16x8xbf16> to vector<16x8xbf16>
    %c0_36 = arith.constant 0 : index
    %c0_37 = arith.constant 0 : index
    %c0_38 = arith.constant 0 : index
    %42 = vector.load %arg4[%c0_36, %c0_37, %c0_38] : memref<1x25x32xbf16, #tpu.memory_space<vmem>>, vector<1x16x8xbf16>
    %43 = vector.shape_cast %42 : vector<1x16x8xbf16> to vector<16x8xbf16>
    %cst_39 = arith.constant dense<0.000000e+00> : vector<17x8xf32>
    %44 = tpu.matmul %31, %37, %cst_39 {dimension_numbers = #tpu.dot_dimension_numbers<[1], [1], [0], [0], [0, 0, 1, 0], [], []>} : vector<17x8xbf16>, vector<8x8xbf16>, vector<17x8xf32> -> vector<17x8xf32>
    %cst_40 = arith.constant -1.000000e+09 : f32
    %45 = vector.broadcast %cst_40 : f32 to vector<17x8xf32>
    %46 = arith.select %18, %44, %45 : vector<17x8xi1>, vector<17x8xf32>
    %cst_41 = arith.constant dense<0xFF800000> : vector<17xf32>
    %47 = vector.multi_reduction <maximumf>, %46, %cst_41 [1] : vector<17x8xf32> to vector<17xf32>
    %48 = vector.shape_cast %47 : vector<17xf32> to vector<17x1xf32>
    %49 = vector.broadcast %48 : vector<17x1xf32> to vector<17x8xf32>
    %50 = arith.subf %46, %49 : vector<17x8xf32>
    %51 = math.exp %50 : vector<17x8xf32>
    %cst_42 = arith.constant dense<0.000000e+00> : vector<17xf32>
    %52 = vector.multi_reduction <add>, %51, %cst_42 [1] : vector<17x8xf32> to vector<17xf32>
    %53 = vector.shape_cast %52 : vector<17xf32> to vector<17x1xf32>
    %54 = tpu.reciprocal %53 {approx = true} : vector<17x1xf32> -> vector<17x1xf32>
    %55 = vector.broadcast %54 : vector<17x1xf32> to vector<17x8xf32>
    %56 = arith.mulf %51, %55 : vector<17x8xf32>
    %57 = arith.mulf %56, %4 : vector<17x8xf32>
    %58 = arith.truncf %57 : vector<17x8xf32> to vector<17x8xbf16>
    %cst_43 = arith.constant dense<0.000000e+00> : vector<17x8xf32>
    %59 = tpu.matmul %58, %39, %cst_43 {dimension_numbers = #tpu.dot_dimension_numbers<[1], [0], [0], [1], [0, 0, 1, 1], [], []>} : vector<17x8xbf16>, vector<8x8xbf16>, vector<17x8xf32> -> vector<17x8xf32>
    %cst_44 = arith.constant dense<0.000000e+00> : vector<8x16xf32>
    %60 = tpu.matmul %35, %41, %cst_44 {dimension_numbers = #tpu.dot_dimension_numbers<[1], [1], [0], [0], [0, 0, 1, 0], [], []>} : vector<8x8xbf16>, vector<16x8xbf16>, vector<8x16xf32> -> vector<8x16xf32>
    %cst_45 = arith.constant -1.000000e+09 : f32
    %61 = vector.broadcast %cst_45 : f32 to vector<8x16xf32>
    %62 = arith.select %27, %60, %61 : vector<8x16xi1>, vector<8x16xf32>
    %cst_46 = arith.constant dense<0xFF800000> : vector<8xf32>
    %63 = vector.multi_reduction <maximumf>, %62, %cst_46 [1] : vector<8x16xf32> to vector<8xf32>
    %64 = vector.shape_cast %63 : vector<8xf32> to vector<8x1xf32>
    %65 = vector.broadcast %64 : vector<8x1xf32> to vector<8x16xf32>
    %66 = arith.subf %62, %65 : vector<8x16xf32>
    %67 = math.exp %66 : vector<8x16xf32>
    %cst_47 = arith.constant dense<0.000000e+00> : vector<8xf32>
    %68 = vector.multi_reduction <add>, %67, %cst_47 [1] : vector<8x16xf32> to vector<8xf32>
    %69 = vector.shape_cast %68 : vector<8xf32> to vector<8x1xf32>
    %70 = tpu.reciprocal %69 {approx = true} : vector<8x1xf32> -> vector<8x1xf32>
    %71 = vector.broadcast %70 : vector<8x1xf32> to vector<8x16xf32>
    %72 = arith.mulf %67, %71 : vector<8x16xf32>
    %73 = arith.mulf %72, %9 : vector<8x16xf32>
    %74 = arith.truncf %73 : vector<8x16xf32> to vector<8x16xbf16>
    %cst_48 = arith.constant dense<0.000000e+00> : vector<8x8xf32>
    %75 = tpu.matmul %74, %43, %cst_48 {dimension_numbers = #tpu.dot_dimension_numbers<[1], [0], [0], [1], [0, 0, 1, 1], [], []>} : vector<8x16xbf16>, vector<16x8xbf16>, vector<8x8xf32> -> vector<8x8xf32>
    %c0_49 = arith.constant 0 : index
    %c0_50 = arith.constant 0 : index
    %c8 = arith.constant 8 : index
    %76 = vector.load %arg2[%c0_49, %c0_50, %c8] : memref<1x25x32xbf16, #tpu.memory_space<vmem>>, vector<1x17x8xbf16>
    %77 = vector.shape_cast %76 : vector<1x17x8xbf16> to vector<17x8xbf16>
    %cst_51 = arith.constant 3.535160e-01 : bf16
    %78 = vector.broadcast %cst_51 : bf16 to vector<17x8xbf16>
    %79 = arith.mulf %77, %78 : vector<17x8xbf16>
    %c0_52 = arith.constant 0 : index
    %c17_53 = arith.constant 17 : index
    %c8_54 = arith.constant 8 : index
    %80 = vector.load %arg2[%c0_52, %c17_53, %c8_54] : memref<1x25x32xbf16, #tpu.memory_space<vmem>>, vector<1x8x8xbf16>
    %81 = vector.shape_cast %80 : vector<1x8x8xbf16> to vector<8x8xbf16>
    %cst_55 = arith.constant 3.535160e-01 : bf16
    %82 = vector.broadcast %cst_55 : bf16 to vector<8x8xbf16>
    %83 = arith.mulf %81, %82 : vector<8x8xbf16>
    %c0_56 = arith.constant 0 : index
    %c17_57 = arith.constant 17 : index
    %c8_58 = arith.constant 8 : index
    %84 = vector.load %arg3[%c0_56, %c17_57, %c8_58] : memref<1x25x32xbf16, #tpu.memory_space<vmem>>, vector<1x8x8xbf16>
    %85 = vector.shape_cast %84 : vector<1x8x8xbf16> to vector<8x8xbf16>
    %c0_59 = arith.constant 0 : index
    %c17_60 = arith.constant 17 : index
    %c8_61 = arith.constant 8 : index
    %86 = vector.load %arg4[%c0_59, %c17_60, %c8_61] : memref<1x25x32xbf16, #tpu.memory_space<vmem>>, vector<1x8x8xbf16>
    %87 = vector.shape_cast %86 : vector<1x8x8xbf16> to vector<8x8xbf16>
    %c0_62 = arith.constant 0 : index
    %c0_63 = arith.constant 0 : index
    %c8_64 = arith.constant 8 : index
    %88 = vector.load %arg3[%c0_62, %c0_63, %c8_64] : memref<1x25x32xbf16, #tpu.memory_space<vmem>>, vector<1x16x8xbf16>
    %89 = vector.shape_cast %88 : vector<1x16x8xbf16> to vector<16x8xbf16>
    %c0_65 = arith.constant 0 : index
    %c0_66 = arith.constant 0 : index
    %c8_67 = arith.constant 8 : index
    %90 = vector.load %arg4[%c0_65, %c0_66, %c8_67] : memref<1x25x32xbf16, #tpu.memory_space<vmem>>, vector<1x16x8xbf16>
    %91 = vector.shape_cast %90 : vector<1x16x8xbf16> to vector<16x8xbf16>
    %cst_68 = arith.constant dense<0.000000e+00> : vector<17x8xf32>
    %92 = tpu.matmul %79, %85, %cst_68 {dimension_numbers = #tpu.dot_dimension_numbers<[1], [1], [0], [0], [0, 0, 1, 0], [], []>} : vector<17x8xbf16>, vector<8x8xbf16>, vector<17x8xf32> -> vector<17x8xf32>
    %cst_69 = arith.constant -1.000000e+09 : f32
    %93 = vector.broadcast %cst_69 : f32 to vector<17x8xf32>
    %94 = arith.select %18, %92, %93 : vector<17x8xi1>, vector<17x8xf32>
    %cst_70 = arith.constant dense<0xFF800000> : vector<17xf32>
    %95 = vector.multi_reduction <maximumf>, %94, %cst_70 [1] : vector<17x8xf32> to vector<17xf32>
    %96 = vector.shape_cast %95 : vector<17xf32> to vector<17x1xf32>
    %97 = vector.broadcast %96 : vector<17x1xf32> to vector<17x8xf32>
    %98 = arith.subf %94, %97 : vector<17x8xf32>
    %99 = math.exp %98 : vector<17x8xf32>
    %cst_71 = arith.constant dense<0.000000e+00> : vector<17xf32>
    %100 = vector.multi_reduction <add>, %99, %cst_71 [1] : vector<17x8xf32> to vector<17xf32>
    %101 = vector.shape_cast %100 : vector<17xf32> to vector<17x1xf32>
    %102 = tpu.reciprocal %101 {approx = true} : vector<17x1xf32> -> vector<17x1xf32>
    %103 = vector.broadcast %102 : vector<17x1xf32> to vector<17x8xf32>
    %104 = arith.mulf %99, %103 : vector<17x8xf32>
    %105 = arith.mulf %104, %4 : vector<17x8xf32>
    %106 = arith.truncf %105 : vector<17x8xf32> to vector<17x8xbf16>
    %cst_72 = arith.constant dense<0.000000e+00> : vector<17x8xf32>
    %107 = tpu.matmul %106, %87, %cst_72 {dimension_numbers = #tpu.dot_dimension_numbers<[1], [0], [0], [1], [0, 0, 1, 1], [], []>} : vector<17x8xbf16>, vector<8x8xbf16>, vector<17x8xf32> -> vector<17x8xf32>
    %cst_73 = arith.constant dense<0.000000e+00> : vector<8x16xf32>
    %108 = tpu.matmul %83, %89, %cst_73 {dimension_numbers = #tpu.dot_dimension_numbers<[1], [1], [0], [0], [0, 0, 1, 0], [], []>} : vector<8x8xbf16>, vector<16x8xbf16>, vector<8x16xf32> -> vector<8x16xf32>
    %cst_74 = arith.constant -1.000000e+09 : f32
    %109 = vector.broadcast %cst_74 : f32 to vector<8x16xf32>
    %110 = arith.select %27, %108, %109 : vector<8x16xi1>, vector<8x16xf32>
    %cst_75 = arith.constant dense<0xFF800000> : vector<8xf32>
    %111 = vector.multi_reduction <maximumf>, %110, %cst_75 [1] : vector<8x16xf32> to vector<8xf32>
    %112 = vector.shape_cast %111 : vector<8xf32> to vector<8x1xf32>
    %113 = vector.broadcast %112 : vector<8x1xf32> to vector<8x16xf32>
    %114 = arith.subf %110, %113 : vector<8x16xf32>
    %115 = math.exp %114 : vector<8x16xf32>
    %cst_76 = arith.constant dense<0.000000e+00> : vector<8xf32>
    %116 = vector.multi_reduction <add>, %115, %cst_76 [1] : vector<8x16xf32> to vector<8xf32>
    %117 = vector.shape_cast %116 : vector<8xf32> to vector<8x1xf32>
    %118 = tpu.reciprocal %117 {approx = true} : vector<8x1xf32> -> vector<8x1xf32>
    %119 = vector.broadcast %118 : vector<8x1xf32> to vector<8x16xf32>
    %120 = arith.mulf %115, %119 : vector<8x16xf32>
    %121 = arith.mulf %120, %9 : vector<8x16xf32>
    %122 = arith.truncf %121 : vector<8x16xf32> to vector<8x16xbf16>
    %cst_77 = arith.constant dense<0.000000e+00> : vector<8x8xf32>
    %123 = tpu.matmul %122, %91, %cst_77 {dimension_numbers = #tpu.dot_dimension_numbers<[1], [0], [0], [1], [0, 0, 1, 1], [], []>} : vector<8x16xbf16>, vector<16x8xbf16>, vector<8x8xf32> -> vector<8x8xf32>
    %c0_78 = arith.constant 0 : index
    %c0_79 = arith.constant 0 : index
    %c16 = arith.constant 16 : index
    %124 = vector.load %arg2[%c0_78, %c0_79, %c16] : memref<1x25x32xbf16, #tpu.memory_space<vmem>>, vector<1x17x8xbf16>
    %125 = vector.shape_cast %124 : vector<1x17x8xbf16> to vector<17x8xbf16>
    %cst_80 = arith.constant 3.535160e-01 : bf16
    %126 = vector.broadcast %cst_80 : bf16 to vector<17x8xbf16>
    %127 = arith.mulf %125, %126 : vector<17x8xbf16>
    %c0_81 = arith.constant 0 : index
    %c17_82 = arith.constant 17 : index
    %c16_83 = arith.constant 16 : index
    %128 = vector.load %arg2[%c0_81, %c17_82, %c16_83] : memref<1x25x32xbf16, #tpu.memory_space<vmem>>, vector<1x8x8xbf16>
    %129 = vector.shape_cast %128 : vector<1x8x8xbf16> to vector<8x8xbf16>
    %cst_84 = arith.constant 3.535160e-01 : bf16
    %130 = vector.broadcast %cst_84 : bf16 to vector<8x8xbf16>
    %131 = arith.mulf %129, %130 : vector<8x8xbf16>
    %c0_85 = arith.constant 0 : index
    %c17_86 = arith.constant 17 : index
    %c16_87 = arith.constant 16 : index
    %132 = vector.load %arg3[%c0_85, %c17_86, %c16_87] : memref<1x25x32xbf16, #tpu.memory_space<vmem>>, vector<1x8x8xbf16>
    %133 = vector.shape_cast %132 : vector<1x8x8xbf16> to vector<8x8xbf16>
    %c0_88 = arith.constant 0 : index
    %c17_89 = arith.constant 17 : index
    %c16_90 = arith.constant 16 : index
    %134 = vector.load %arg4[%c0_88, %c17_89, %c16_90] : memref<1x25x32xbf16, #tpu.memory_space<vmem>>, vector<1x8x8xbf16>
    %135 = vector.shape_cast %134 : vector<1x8x8xbf16> to vector<8x8xbf16>
    %c0_91 = arith.constant 0 : index
    %c0_92 = arith.constant 0 : index
    %c16_93 = arith.constant 16 : index
    %136 = vector.load %arg3[%c0_91, %c0_92, %c16_93] : memref<1x25x32xbf16, #tpu.memory_space<vmem>>, vector<1x16x8xbf16>
    %137 = vector.shape_cast %136 : vector<1x16x8xbf16> to vector<16x8xbf16>
    %c0_94 = arith.constant 0 : index
    %c0_95 = arith.constant 0 : index
    %c16_96 = arith.constant 16 : index
    %138 = vector.load %arg4[%c0_94, %c0_95, %c16_96] : memref<1x25x32xbf16, #tpu.memory_space<vmem>>, vector<1x16x8xbf16>
    %139 = vector.shape_cast %138 : vector<1x16x8xbf16> to vector<16x8xbf16>
    %cst_97 = arith.constant dense<0.000000e+00> : vector<17x8xf32>
    %140 = tpu.matmul %127, %133, %cst_97 {dimension_numbers = #tpu.dot_dimension_numbers<[1], [1], [0], [0], [0, 0, 1, 0], [], []>} : vector<17x8xbf16>, vector<8x8xbf16>, vector<17x8xf32> -> vector<17x8xf32>
    %cst_98 = arith.constant -1.000000e+09 : f32
    %141 = vector.broadcast %cst_98 : f32 to vector<17x8xf32>
    %142 = arith.select %18, %140, %141 : vector<17x8xi1>, vector<17x8xf32>
    %cst_99 = arith.constant dense<0xFF800000> : vector<17xf32>
    %143 = vector.multi_reduction <maximumf>, %142, %cst_99 [1] : vector<17x8xf32> to vector<17xf32>
    %144 = vector.shape_cast %143 : vector<17xf32> to vector<17x1xf32>
    %145 = vector.broadcast %144 : vector<17x1xf32> to vector<17x8xf32>
    %146 = arith.subf %142, %145 : vector<17x8xf32>
    %147 = math.exp %146 : vector<17x8xf32>
    %cst_100 = arith.constant dense<0.000000e+00> : vector<17xf32>
    %148 = vector.multi_reduction <add>, %147, %cst_100 [1] : vector<17x8xf32> to vector<17xf32>
    %149 = vector.shape_cast %148 : vector<17xf32> to vector<17x1xf32>
    %150 = tpu.reciprocal %149 {approx = true} : vector<17x1xf32> -> vector<17x1xf32>
    %151 = vector.broadcast %150 : vector<17x1xf32> to vector<17x8xf32>
    %152 = arith.mulf %147, %151 : vector<17x8xf32>
    %153 = arith.mulf %152, %4 : vector<17x8xf32>
    %154 = arith.truncf %153 : vector<17x8xf32> to vector<17x8xbf16>
    %cst_101 = arith.constant dense<0.000000e+00> : vector<17x8xf32>
    %155 = tpu.matmul %154, %135, %cst_101 {dimension_numbers = #tpu.dot_dimension_numbers<[1], [0], [0], [1], [0, 0, 1, 1], [], []>} : vector<17x8xbf16>, vector<8x8xbf16>, vector<17x8xf32> -> vector<17x8xf32>
    %cst_102 = arith.constant dense<0.000000e+00> : vector<8x16xf32>
    %156 = tpu.matmul %131, %137, %cst_102 {dimension_numbers = #tpu.dot_dimension_numbers<[1], [1], [0], [0], [0, 0, 1, 0], [], []>} : vector<8x8xbf16>, vector<16x8xbf16>, vector<8x16xf32> -> vector<8x16xf32>
    %cst_103 = arith.constant -1.000000e+09 : f32
    %157 = vector.broadcast %cst_103 : f32 to vector<8x16xf32>
    %158 = arith.select %27, %156, %157 : vector<8x16xi1>, vector<8x16xf32>
    %cst_104 = arith.constant dense<0xFF800000> : vector<8xf32>
    %159 = vector.multi_reduction <maximumf>, %158, %cst_104 [1] : vector<8x16xf32> to vector<8xf32>
    %160 = vector.shape_cast %159 : vector<8xf32> to vector<8x1xf32>
    %161 = vector.broadcast %160 : vector<8x1xf32> to vector<8x16xf32>
    %162 = arith.subf %158, %161 : vector<8x16xf32>
    %163 = math.exp %162 : vector<8x16xf32>
    %cst_105 = arith.constant dense<0.000000e+00> : vector<8xf32>
    %164 = vector.multi_reduction <add>, %163, %cst_105 [1] : vector<8x16xf32> to vector<8xf32>
    %165 = vector.shape_cast %164 : vector<8xf32> to vector<8x1xf32>
    %166 = tpu.reciprocal %165 {approx = true} : vector<8x1xf32> -> vector<8x1xf32>
    %167 = vector.broadcast %166 : vector<8x1xf32> to vector<8x16xf32>
    %168 = arith.mulf %163, %167 : vector<8x16xf32>
    %169 = arith.mulf %168, %9 : vector<8x16xf32>
    %170 = arith.truncf %169 : vector<8x16xf32> to vector<8x16xbf16>
    %cst_106 = arith.constant dense<0.000000e+00> : vector<8x8xf32>
    %171 = tpu.matmul %170, %139, %cst_106 {dimension_numbers = #tpu.dot_dimension_numbers<[1], [0], [0], [1], [0, 0, 1, 1], [], []>} : vector<8x16xbf16>, vector<16x8xbf16>, vector<8x8xf32> -> vector<8x8xf32>
    %c0_107 = arith.constant 0 : index
    %c0_108 = arith.constant 0 : index
    %c24 = arith.constant 24 : index
    %172 = vector.load %arg2[%c0_107, %c0_108, %c24] : memref<1x25x32xbf16, #tpu.memory_space<vmem>>, vector<1x17x8xbf16>
    %173 = vector.shape_cast %172 : vector<1x17x8xbf16> to vector<17x8xbf16>
    %cst_109 = arith.constant 3.535160e-01 : bf16
    %174 = vector.broadcast %cst_109 : bf16 to vector<17x8xbf16>
    %175 = arith.mulf %173, %174 : vector<17x8xbf16>
    %c0_110 = arith.constant 0 : index
    %c17_111 = arith.constant 17 : index
    %c24_112 = arith.constant 24 : index
    %176 = vector.load %arg2[%c0_110, %c17_111, %c24_112] : memref<1x25x32xbf16, #tpu.memory_space<vmem>>, vector<1x8x8xbf16>
    %177 = vector.shape_cast %176 : vector<1x8x8xbf16> to vector<8x8xbf16>
    %cst_113 = arith.constant 3.535160e-01 : bf16
    %178 = vector.broadcast %cst_113 : bf16 to vector<8x8xbf16>
    %179 = arith.mulf %177, %178 : vector<8x8xbf16>
    %c0_114 = arith.constant 0 : index
    %c17_115 = arith.constant 17 : index
    %c24_116 = arith.constant 24 : index
    %180 = vector.load %arg3[%c0_114, %c17_115, %c24_116] : memref<1x25x32xbf16, #tpu.memory_space<vmem>>, vector<1x8x8xbf16>
    %181 = vector.shape_cast %180 : vector<1x8x8xbf16> to vector<8x8xbf16>
    %c0_117 = arith.constant 0 : index
    %c17_118 = arith.constant 17 : index
    %c24_119 = arith.constant 24 : index
    %182 = vector.load %arg4[%c0_117, %c17_118, %c24_119] : memref<1x25x32xbf16, #tpu.memory_space<vmem>>, vector<1x8x8xbf16>
    %183 = vector.shape_cast %182 : vector<1x8x8xbf16> to vector<8x8xbf16>
    %c0_120 = arith.constant 0 : index
    %c0_121 = arith.constant 0 : index
    %c24_122 = arith.constant 24 : index
    %184 = vector.load %arg3[%c0_120, %c0_121, %c24_122] : memref<1x25x32xbf16, #tpu.memory_space<vmem>>, vector<1x16x8xbf16>
    %185 = vector.shape_cast %184 : vector<1x16x8xbf16> to vector<16x8xbf16>
    %c0_123 = arith.constant 0 : index
    %c0_124 = arith.constant 0 : index
    %c24_125 = arith.constant 24 : index
    %186 = vector.load %arg4[%c0_123, %c0_124, %c24_125] : memref<1x25x32xbf16, #tpu.memory_space<vmem>>, vector<1x16x8xbf16>
    %187 = vector.shape_cast %186 : vector<1x16x8xbf16> to vector<16x8xbf16>
    %cst_126 = arith.constant dense<0.000000e+00> : vector<17x8xf32>
    %188 = tpu.matmul %175, %181, %cst_126 {dimension_numbers = #tpu.dot_dimension_numbers<[1], [1], [0], [0], [0, 0, 1, 0], [], []>} : vector<17x8xbf16>, vector<8x8xbf16>, vector<17x8xf32> -> vector<17x8xf32>
    %cst_127 = arith.constant -1.000000e+09 : f32
    %189 = vector.broadcast %cst_127 : f32 to vector<17x8xf32>
    %190 = arith.select %18, %188, %189 : vector<17x8xi1>, vector<17x8xf32>
    %cst_128 = arith.constant dense<0xFF800000> : vector<17xf32>
    %191 = vector.multi_reduction <maximumf>, %190, %cst_128 [1] : vector<17x8xf32> to vector<17xf32>
    %192 = vector.shape_cast %191 : vector<17xf32> to vector<17x1xf32>
    %193 = vector.broadcast %192 : vector<17x1xf32> to vector<17x8xf32>
    %194 = arith.subf %190, %193 : vector<17x8xf32>
    %195 = math.exp %194 : vector<17x8xf32>
    %cst_129 = arith.constant dense<0.000000e+00> : vector<17xf32>
    %196 = vector.multi_reduction <add>, %195, %cst_129 [1] : vector<17x8xf32> to vector<17xf32>
    %197 = vector.shape_cast %196 : vector<17xf32> to vector<17x1xf32>
    %198 = tpu.reciprocal %197 {approx = true} : vector<17x1xf32> -> vector<17x1xf32>
    %199 = vector.broadcast %198 : vector<17x1xf32> to vector<17x8xf32>
    %200 = arith.mulf %195, %199 : vector<17x8xf32>
    %201 = arith.mulf %200, %4 : vector<17x8xf32>
    %202 = arith.truncf %201 : vector<17x8xf32> to vector<17x8xbf16>
    %cst_130 = arith.constant dense<0.000000e+00> : vector<17x8xf32>
    %203 = tpu.matmul %202, %183, %cst_130 {dimension_numbers = #tpu.dot_dimension_numbers<[1], [0], [0], [1], [0, 0, 1, 1], [], []>} : vector<17x8xbf16>, vector<8x8xbf16>, vector<17x8xf32> -> vector<17x8xf32>
    %cst_131 = arith.constant dense<0.000000e+00> : vector<8x16xf32>
    %204 = tpu.matmul %179, %185, %cst_131 {dimension_numbers = #tpu.dot_dimension_numbers<[1], [1], [0], [0], [0, 0, 1, 0], [], []>} : vector<8x8xbf16>, vector<16x8xbf16>, vector<8x16xf32> -> vector<8x16xf32>
    %cst_132 = arith.constant -1.000000e+09 : f32
    %205 = vector.broadcast %cst_132 : f32 to vector<8x16xf32>
    %206 = arith.select %27, %204, %205 : vector<8x16xi1>, vector<8x16xf32>
    %cst_133 = arith.constant dense<0xFF800000> : vector<8xf32>
    %207 = vector.multi_reduction <maximumf>, %206, %cst_133 [1] : vector<8x16xf32> to vector<8xf32>
    %208 = vector.shape_cast %207 : vector<8xf32> to vector<8x1xf32>
    %209 = vector.broadcast %208 : vector<8x1xf32> to vector<8x16xf32>
    %210 = arith.subf %206, %209 : vector<8x16xf32>
    %211 = math.exp %210 : vector<8x16xf32>
    %cst_134 = arith.constant dense<0.000000e+00> : vector<8xf32>
    %212 = vector.multi_reduction <add>, %211, %cst_134 [1] : vector<8x16xf32> to vector<8xf32>
    %213 = vector.shape_cast %212 : vector<8xf32> to vector<8x1xf32>
    %214 = tpu.reciprocal %213 {approx = true} : vector<8x1xf32> -> vector<8x1xf32>
    %215 = vector.broadcast %214 : vector<8x1xf32> to vector<8x16xf32>
    %216 = arith.mulf %211, %215 : vector<8x16xf32>
    %217 = arith.mulf %216, %9 : vector<8x16xf32>
    %218 = arith.truncf %217 : vector<8x16xf32> to vector<8x16xbf16>
    %cst_135 = arith.constant dense<0.000000e+00> : vector<8x8xf32>
    %219 = tpu.matmul %218, %187, %cst_135 {dimension_numbers = #tpu.dot_dimension_numbers<[1], [0], [0], [1], [0, 0, 1, 1], [], []>} : vector<8x16xbf16>, vector<16x8xbf16>, vector<8x8xf32> -> vector<8x8xf32>
    %220 = tpu.concatenate %59, %107, %155, %203 in 1 : vector<17x8xf32>, vector<17x8xf32>, vector<17x8xf32>, vector<17x8xf32> -> vector<17x32xf32>
    %221 = tpu.concatenate %75, %123, %171, %219 in 1 : vector<8x8xf32>, vector<8x8xf32>, vector<8x8xf32>, vector<8x8xf32> -> vector<8x32xf32>
    %222 = arith.truncf %220 : vector<17x32xf32> to vector<17x32xbf16>
    %c0_136 = arith.constant 0 : index
    %c0_137 = arith.constant 0 : index
    %c0_138 = arith.constant 0 : index
    %223 = vector.load %arg11[%c0_136, %c0_137, %c0_138] : memref<1x25x32xbf16, #tpu.memory_space<vmem>>, vector<1x17x32xbf16>
    %224 = vector.shape_cast %223 : vector<1x17x32xbf16> to vector<17x32xbf16>
    %225 = vector.shape_cast %222 : vector<17x32xbf16> to vector<1x17x32xbf16>
    tpu.vector_store %arg11[%c0_136, %c0_137, %c0_138], %225 {strides = array<i32>} : memref<1x25x32xbf16, #tpu.memory_space<vmem>>, vector<1x17x32xbf16>,
    %226 = arith.truncf %221 : vector<8x32xf32> to vector<8x32xbf16>
    %c0_139 = arith.constant 0 : index
    %c17_140 = arith.constant 17 : index
    %c0_141 = arith.constant 0 : index
    %227 = vector.load %arg11[%c0_139, %c17_140, %c0_141] : memref<1x25x32xbf16, #tpu.memory_space<vmem>>, vector<1x8x32xbf16>
    %228 = vector.shape_cast %227 : vector<1x8x32xbf16> to vector<8x32xbf16>
    %229 = vector.shape_cast %226 : vector<8x32xbf16> to vector<1x8x32xbf16>
    tpu.vector_store %arg11[%c0_139, %c17_140, %c0_141], %229 {strides = array<i32>} : memref<1x25x32xbf16, #tpu.memory_space<vmem>>, vector<1x8x32xbf16>,
    return
  }
  func.func @transform_0(%arg0: i32, %arg1: i32) -> (i32, i32, i32) {
    %c0_i32 = arith.constant 0 : i32
    %c0_i32_0 = arith.constant 0 : i32
    return %arg0, %c0_i32, %arg1 : i32, i32, i32
  }
  func.func @transform_1(%arg0: i32, %arg1: i32) -> (i32, i32, i32) {
    %c0_i32 = arith.constant 0 : i32
    %c0_i32_0 = arith.constant 0 : i32
    return %arg0, %c0_i32, %arg1 : i32, i32, i32
  }
  func.func @transform_2(%arg0: i32, %arg1: i32) -> (i32, i32, i32) {
    %c0_i32 = arith.constant 0 : i32
    %c0_i32_0 = arith.constant 0 : i32
    return %arg0, %c0_i32, %arg1 : i32, i32, i32
  }
  func.func @transform_3(%arg0: i32, %arg1: i32) -> (i32, i32, i32) {
    %c0_i32 = arith.constant 0 : i32
    %c0_i32_0 = arith.constant 0 : i32
    %c0_i32_1 = arith.constant 0 : i32
    return %arg0, %c0_i32, %c0_i32_0 : i32, i32, i32
  }
  func.func @transform_4(%arg0: i32, %arg1: i32) -> (i32, i32, i32) {
    %c0_i32 = arith.constant 0 : i32
    %c0_i32_0 = arith.constant 0 : i32
    %c0_i32_1 = arith.constant 0 : i32
    return %arg0, %c0_i32, %c0_i32_0 : i32, i32, i32
  }
  func.func @transform_5(%arg0: i32, %arg1: i32) -> (i32, i32, i32) {
    %c0_i32 = arith.constant 0 : i32
    %c0_i32_0 = arith.constant 0 : i32
    %c0_i32_1 = arith.constant 0 : i32
    return %arg0, %c0_i32, %c0_i32_0 : i32, i32, i32
  }
  func.func @transform_6(%arg0: i32, %arg1: i32) -> (i32, i32, i32) {
    %c0_i32 = arith.constant 0 : i32
    %c0_i32_0 = arith.constant 0 : i32
    %c0_i32_1 = arith.constant 0 : i32
    return %arg0, %c0_i32, %c0_i32_0 : i32, i32, i32
  }
  func.func @transform_7(%arg0: i32, %arg1: i32) -> (i32, i32, i32) {
    %c0_i32 = arith.constant 0 : i32
    %c0_i32_0 = arith.constant 0 : i32
    %c0_i32_1 = arith.constant 0 : i32
    return %arg0, %c0_i32, %c0_i32_0 : i32, i32, i32
  }
  func.func @transform_8(%arg0: i32, %arg1: i32) -> (i32, i32, i32) {
    %c0_i32 = arith.constant 0 : i32
    %c0_i32_0 = arith.constant 0 : i32
    %c0_i32_1 = arith.constant 0 : i32
    return %arg0, %c0_i32, %c0_i32_0 : i32, i32, i32
  }
  func.func @transform_9(%arg0: i32, %arg1: i32) -> (i32, i32, i32) {
    %c0_i32 = arith.constant 0 : i32
    %c0_i32_0 = arith.constant 0 : i32
    return %arg0, %c0_i32, %arg1 : i32, i32, i32
  }
}

module attributes {stable_mosaic.version = 11 : i64} {
  func.func @kernel(%arg0: i32, %arg1: i32, %arg2: i32, %arg3: memref<8x32xf32, #tpu.memory_space<vmem>>, %arg4: memref<32x5xbf16, #tpu.memory_space<vmem>>, %arg5: memref<1x32xf32, #tpu.memory_space<vmem>>, %arg6: memref<1x32xf32, #tpu.memory_space<vmem>>, %arg7: memref<1x5xf32, #tpu.memory_space<vmem>>, %arg8: memref<8x5xf32, #tpu.memory_space<vmem>>, %arg9: memref<8x5xf32, #tpu.memory_space<vmem>>) attributes {dimension_semantics = [#tpu.dimension_semantics<parallel>, #tpu.dimension_semantics<parallel>, #tpu.dimension_semantics<arbitrary>], iteration_bounds = array<i64: 1, 1, 1>, scalar_prefetch = 0 : i64, scratch_operands = 1 : i64, tpu.core_type = #tpu.core_type<tc>, window_params = [{transform_indices = @transform_0, window_bounds = array<i64: 8, 32>}, {transform_indices = @transform_1, window_bounds = array<i64: 32, 5>}, {transform_indices = @transform_2, window_bounds = array<i64: 1, 32>}, {transform_indices = @transform_3, window_bounds = array<i64: 1, 32>}, {transform_indices = @transform_4, window_bounds = array<i64: 1, 5>}, {transform_indices = @transform_5, window_bounds = array<i64: 8, 5>}]} {
    %c0_i32 = arith.constant 0 : i32
    %0 = arith.cmpi eq, %arg2, %c0_i32 : i32
    %1 = arith.extui %0 : i1 to i32
    %c0_i32_0 = arith.constant 0 : i32
    %2 = arith.cmpi ne, %1, %c0_i32_0 : i32
    scf.if %2 {
      %cst_19 = arith.constant 0.000000e+00 : f32
      %37 = vector.broadcast %cst_19 : f32 to vector<8x5xf32>
      %c0_20 = arith.constant 0 : index
      %c0_21 = arith.constant 0 : index
      %38 = vector.load %arg9[%c0_20, %c0_21] : memref<8x5xf32, #tpu.memory_space<vmem>>, vector<8x5xf32>
      tpu.vector_store %arg9[%c0_20, %c0_21], %37 {strides = array<i32>} : memref<8x5xf32, #tpu.memory_space<vmem>>, vector<8x5xf32>,
    } else {
    }
    %c0 = arith.constant 0 : index
    %c0_1 = arith.constant 0 : index
    %3 = vector.load %arg4[%c0, %c0_1] : memref<32x5xbf16, #tpu.memory_space<vmem>>, vector<32x5xbf16>
    %c0_2 = arith.constant 0 : index
    %c0_3 = arith.constant 0 : index
    %4 = vector.load %arg3[%c0_2, %c0_3] : memref<8x32xf32, #tpu.memory_space<vmem>>, vector<8x32xf32>
    %c0_4 = arith.constant 0 : index
    %c0_5 = arith.constant 0 : index
    %5 = vector.load %arg5[%c0_4, %c0_5] : memref<1x32xf32, #tpu.memory_space<vmem>>, vector<1x32xf32>
    %c0_6 = arith.constant 0 : index
    %c0_7 = arith.constant 0 : index
    %6 = vector.load %arg6[%c0_6, %c0_7] : memref<1x32xf32, #tpu.memory_space<vmem>>, vector<1x32xf32>
    %cst = arith.constant dense<0.000000e+00> : vector<8xf32>
    %7 = vector.multi_reduction <add>, %4, %cst [1] : vector<8x32xf32> to vector<8xf32>
    %8 = vector.shape_cast %7 : vector<8xf32> to vector<8x1xf32>
    %cst_8 = arith.constant 3.200000e+01 : f32
    %9 = vector.broadcast %cst_8 : f32 to vector<8x1xf32>
    %10 = arith.divf %8, %9 : vector<8x1xf32>
    %11 = vector.broadcast %10 : vector<8x1xf32> to vector<8x32xf32>
    %12 = arith.subf %4, %11 : vector<8x32xf32>
    %13 = arith.mulf %12, %12 : vector<8x32xf32>
    %cst_9 = arith.constant dense<0.000000e+00> : vector<8xf32>
    %14 = vector.multi_reduction <add>, %13, %cst_9 [1] : vector<8x32xf32> to vector<8xf32>
    %15 = vector.shape_cast %14 : vector<8xf32> to vector<8x1xf32>
    %cst_10 = arith.constant 3.200000e+01 : f32
    %16 = vector.broadcast %cst_10 : f32 to vector<8x1xf32>
    %17 = arith.divf %15, %16 : vector<8x1xf32>
    %18 = vector.broadcast %10 : vector<8x1xf32> to vector<8x32xf32>
    %19 = arith.subf %4, %18 : vector<8x32xf32>
    %cst_11 = arith.constant 9.99999974E-6 : f32
    %20 = vector.broadcast %cst_11 : f32 to vector<8x1xf32>
    %21 = arith.addf %17, %20 : vector<8x1xf32>
    %22 = math.rsqrt %21 : vector<8x1xf32>
    %23 = vector.broadcast %22 : vector<8x1xf32> to vector<8x32xf32>
    %24 = arith.mulf %19, %23 : vector<8x32xf32>
    %25 = vector.broadcast %5 : vector<1x32xf32> to vector<8x32xf32>
    %26 = arith.mulf %24, %25 : vector<8x32xf32>
    %27 = vector.broadcast %6 : vector<1x32xf32> to vector<8x32xf32>
    %28 = arith.addf %26, %27 : vector<8x32xf32>
    %c0_12 = arith.constant 0 : index
    %c0_13 = arith.constant 0 : index
    %29 = vector.load %arg9[%c0_12, %c0_13] : memref<8x5xf32, #tpu.memory_space<vmem>>, vector<8x5xf32>
    %30 = arith.truncf %28 : vector<8x32xf32> to vector<8x32xbf16>
    %cst_14 = arith.constant dense<0.000000e+00> : vector<8x5xf32>
    %31 = tpu.matmul %30, %3, %cst_14 {dimension_numbers = #tpu.dot_dimension_numbers<[1], [0], [0], [1], [0, 0, 1, 1], [], []>} : vector<8x32xbf16>, vector<32x5xbf16>, vector<8x5xf32> -> vector<8x5xf32>
    %32 = arith.addf %29, %31 : vector<8x5xf32>
    %c0_15 = arith.constant 0 : index
    %c0_16 = arith.constant 0 : index
    %33 = vector.load %arg9[%c0_15, %c0_16] : memref<8x5xf32, #tpu.memory_space<vmem>>, vector<8x5xf32>
    tpu.vector_store %arg9[%c0_15, %c0_16], %32 {strides = array<i32>} : memref<8x5xf32, #tpu.memory_space<vmem>>, vector<8x5xf32>,
    %c0_i32_17 = arith.constant 0 : i32
    %34 = arith.cmpi eq, %arg2, %c0_i32_17 : i32
    %35 = arith.extui %34 : i1 to i32
    %c0_i32_18 = arith.constant 0 : i32
    %36 = arith.cmpi ne, %35, %c0_i32_18 : i32
    scf.if %36 {
      %c0_19 = arith.constant 0 : index
      %c0_20 = arith.constant 0 : index
      %37 = vector.load %arg9[%c0_19, %c0_20] : memref<8x5xf32, #tpu.memory_space<vmem>>, vector<8x5xf32>
      %c0_21 = arith.constant 0 : index
      %c0_22 = arith.constant 0 : index
      %38 = vector.load %arg7[%c0_21, %c0_22] : memref<1x5xf32, #tpu.memory_space<vmem>>, vector<1x5xf32>
      %39 = vector.broadcast %38 : vector<1x5xf32> to vector<8x5xf32>
      %40 = arith.addf %37, %39 : vector<8x5xf32>
      %c0_23 = arith.constant 0 : index
      %c0_24 = arith.constant 0 : index
      %41 = vector.load %arg8[%c0_23, %c0_24] : memref<8x5xf32, #tpu.memory_space<vmem>>, vector<8x5xf32>
      tpu.vector_store %arg8[%c0_23, %c0_24], %40 {strides = array<i32>} : memref<8x5xf32, #tpu.memory_space<vmem>>, vector<8x5xf32>,
    } else {
    }
    return
  }
  func.func @transform_0(%arg0: i32, %arg1: i32, %arg2: i32) -> (i32, i32) {
    %c0_i32 = arith.constant 0 : i32
    return %arg0, %arg2 : i32, i32
  }
  func.func @transform_1(%arg0: i32, %arg1: i32, %arg2: i32) -> (i32, i32) {
    %c0_i32 = arith.constant 0 : i32
    return %arg2, %arg1 : i32, i32
  }
  func.func @transform_2(%arg0: i32, %arg1: i32, %arg2: i32) -> (i32, i32) {
    %c0_i32 = arith.constant 0 : i32
    %c0_i32_0 = arith.constant 0 : i32
    return %c0_i32, %arg2 : i32, i32
  }
  func.func @transform_3(%arg0: i32, %arg1: i32, %arg2: i32) -> (i32, i32) {
    %c0_i32 = arith.constant 0 : i32
    %c0_i32_0 = arith.constant 0 : i32
    return %c0_i32, %arg2 : i32, i32
  }
  func.func @transform_4(%arg0: i32, %arg1: i32, %arg2: i32) -> (i32, i32) {
    %c0_i32 = arith.constant 0 : i32
    %c0_i32_0 = arith.constant 0 : i32
    return %c0_i32, %arg1 : i32, i32
  }
  func.func @transform_5(%arg0: i32, %arg1: i32, %arg2: i32) -> (i32, i32) {
    %c0_i32 = arith.constant 0 : i32
    return %arg0, %arg1 : i32, i32
  }
}

</mosaic_0001>

<bundles_post_ra>
// kernel: kat_forward.12
= control target key start
LH: loop header
LB: loop body
LE: loop exit
PB: predicated region body
PF: predicated region fallthrough
CT: control target
= control target key end

     0   :  { %vm19_vm0 = vcmask 261120   ;;  %v162_v0 = vmov 0.0   ;;  %vm53_vm1 = vcmask 1043456   ;;  %vm46_vm2 = vcmask 195584   ;;  %s228_s1 = inlined_call_operand.vmem [shape: bf16[24,32], index: 1, kind: input, shape index: {}]   ;;  %s229_s0 = inlined_call_operand.vmem [shape: f32[32,24], index: 0, kind: input, shape index: {}]   ;;  %s230_s2 = inlined_call_operand.vmem [shape: f32[1,32], index: 2, kind: input, shape index: {}]   ;;  %s231_s3 = inlined_call_operand.vmem [shape: f32[32,32], index: 3, kind: output, shape index: {}]  }
   0x1   :  { %22 = vst.msk [vmem:[#allocation2 + $0x10] sm:$0xff] %vm19_vm0, %v162_v0  ;;  %20 = vst.msk [vmem:[#allocation2] sm:$0xff] %vm19_vm0, %v162_v0  ;;  %v160_v1 = vld [vmem:[%s228_s1] sm:$0xff]   ;;  %v161_v2 = vld [vmem:[%s228_s1 + $0x8] ss:$0 sps:$4 sm:$0xff]  }
   0x2   :  { %21 = vst.msk [vmem:[#allocation2 + $0x8] sm:$0xff] %vm19_vm0, %v162_v0  ;;  %23 = vst.msk [vmem:[#allocation2 + $0x18] sm:$0xff] %vm19_vm0, %v162_v0  ;;  %v27_v3 = vld [vmem:[%s229_s0] sm:$0xff]  ;;  %v28_v4 = vld [vmem:[%s229_s0 + $0x8] sm:$0xff]  ;;  %150 = vmatprep.subr.bf16.mxu0 %v160_v1  ;;  %v55_v8 = vsel %vm53_vm1, %v161_v2, 0 }
   0x3   :  { %v35_v5 = vpack.c.bf16 %v28_v4, %v27_v3  ;;  %151 = vmatpush3.bf16.msra.mxu0 %v160_v1  ;;  %v29_v6 = vld [vmem:[%s229_s0 + $0x10] sm:$0xff]  ;;  %v30_v7 = vld [vmem:[%s229_s0 + $0x18] sm:$0xff]  ;;  %v145_v22 = vld [vmem:[%s230_s2] ss:$0 sm:$0xff] }
   0x4   :  { %158 = vmatprep.subr.msk.bf16.mxu0 %vm53_vm1, %v161_v2  ;;  %v36_v9 = vpack.c.bf16 %v30_v7, %v29_v6 }
   0x5   :  { %154 = vmatprep.mubr.msk.bf16.mxu0 %vm46_vm2, %v35_v5 }
   0x7   :  { %153 = vmatpush3.bf16.msra.mxu0 %v55_v8 }
   0x8   :  { %v33_v10 = vld [vmem:[#allocation2 + $0x10] sm:$0xff]  ;;  %v31_v11 = vld [vmem:[#allocation2] sm:$0xff] }
   0x9   :  { %v34_v13 = vld [vmem:[#allocation2 + $0x18] sm:$0xff]  ;;  %v32_v16 = vld [vmem:[#allocation2 + $0x8] sm:$0xff] }
   0xa   :  { %155 = vmatmul.mubr.msk.bf16.vlgmr.msra.gmra.mrb[0].mxu0 %vm46_vm2, %v36_v9 }
  0xdd   :  { %v156_v12 = vpop.f32.mrb[0].mxu0 }
  0xde   :  { %v108_v14 = vadd.f32 %v156_v12, %v33_v10  ;;  %v91_v15 = vpop.f32.mrb[1].mxu0 }
  0xdf   :  { %v106_v17 = vadd.f32 %v91_v15, %v31_v11  ;;  %v157_v18 = vpop.f32.mrb[2].mxu0 }
  0xe0   :  { %113 = vst.msk [vmem:[#allocation2 + $0x10] sm:$0xff] %vm19_vm0, %v108_v14  ;;  %v109_v19 = vadd.f32 %v157_v18, %v34_v13  ;;  %v94_v20 = vpop.f32.mrb[3].mxu0 }
  0xe1   :  { %111 = vst.msk [vmem:[#allocation2] sm:$0xff] %vm19_vm0, %v106_v17  ;;  %v107_v21 = vadd.f32 %v94_v20, %v32_v16 }
  0xe2   :  { %114 = vst.msk [vmem:[#allocation2 + $0x18] sm:$0xff] %vm19_vm0, %v109_v19 }
  0xe3   :  { %112 = vst.msk [vmem:[#allocation2 + $0x8] sm:$0xff] %vm19_vm0, %v107_v21 }
  0xe7   :  { %v120_v23 = vld [vmem:[#allocation2 + $0x10] sm:$0xff] }
  0xe8   :  { %v131_v24 = vadd.f32 %v145_v22, %v120_v23  ;;  %v118_v25 = vld [vmem:[#allocation2] sm:$0xff] }
  0xe9   :  { %v129_v26 = vadd.f32 %v145_v22, %v118_v25  ;;  %v121_v27 = vld [vmem:[#allocation2 + $0x18] sm:$0xff] }
  0xea   :  { %135 = vst.msk [vmem:[%s231_s3 + $0x10] sm:$0xff] %vm19_vm0, %v131_v24  ;;  %v132_v28 = vadd.f32 %v145_v22, %v121_v27  ;;  %v119_v29 = vld [vmem:[#allocation2 + $0x8] sm:$0xff] }
  0xeb   :  { %133 = vst.msk [vmem:[%s231_s3] sm:$0xff] %vm19_vm0, %v129_v26  ;;  %v130_v30 = vadd.f32 %v145_v22, %v119_v29 }
  0xec   :  { %136 = vst.msk [vmem:[%s231_s3 + $0x18] sm:$0xff] %vm19_vm0, %v132_v28 }
  0xed   :  { %134 = vst.msk [vmem:[%s231_s3 + $0x8] sm:$0xff] %vm19_vm0, %v130_v30 }

// kernel: kat_forward.13
= control target key start
LH: loop header
LB: loop body
LE: loop exit
PB: predicated region body
PF: predicated region fallthrough
CT: control target
= control target key end

     0   :  { %vm36_vm0 = vcmask 261120   ;;  %vm280_vm1 = vcmask 257024   ;;  %s915_s0 = inlined_call_operand.vmem [shape: f32[50,32], index: 0, kind: input, shape index: {}]   ;;  %s916_s3 = inlined_call_operand.vmem [shape: bf16[32,32], index: 3, kind: input, shape index: {}]   ;;  %s917_s4 = inlined_call_operand.vmem [shape: bf16[32,32], index: 4, kind: input, shape index: {}]   ;;  %s918_s5 = inlined_call_operand.vmem [shape: bf16[32,32], index: 5, kind: input, shape index: {}]   ;;  %s919_s1 = inlined_call_operand.vmem [shape: f32[1,32], index: 1, kind: input, shape index: {}]   ;;  %s920_s2 = inlined_call_operand.vmem [shape: f32[1,32], index: 2, kind: input, shape index: {}]   ;;  %s921_s6 = inlined_call_operand.vmem [shape: bf16[50,32], index: 6, kind: output, shape index: {0}]   ;;  %s922_s7 = inlined_call_operand.vmem [shape: bf16[50,32], index: 7, kind: output, shape index: {1}]   ;;  %s923_s8 = inlined_call_operand.vmem [shape: bf16[50,32], index: 8, kind: output, shape index: {2}]  }
   0x1   :  { %v27_v0 = vld [vmem:[%s915_s0] sm:$0xff]  ;;  %v28_v2 = vld [vmem:[%s915_s0 + $0x8] sm:$0xff]  ;;  %v29_v8 = vld [vmem:[%s915_s0 + $0x10] sm:$0xff] }
   0x2   :  { %v31_v1 = vld [vmem:[%s915_s0 + $0x20] sm:$0xff]  ;;  %v37_v3 = vsel %vm36_vm0, %v27_v0, 0.0  ;;  %v32_v5 = vld [vmem:[%s915_s0 + $0x28] sm:$0xff]  ;;  %v40_v6 = vsel %vm36_vm0, %v28_v2, 0.0  ;;  %v30_v9 = vld [vmem:[%s915_s0 + $0x18] sm:$0xff]  ;;  %v43_v10 = vsel %vm36_vm0, %v29_v8, 0.0 }
   0x3   :  { %v49_v4 = vsel %vm36_vm0, %v31_v1, 0.0  ;;  %38 = vadd.xlane.f32.xlu0 %v37_v3  ;;  %v52_v7 = vsel %vm36_vm0, %v32_v5, 0.0  ;;  %v46_v11 = vsel %vm36_vm0, %v30_v9, 0.0  ;;  %v33_v12 = vld [vmem:[%s915_s0 + $0x30] sm:$0xff]  ;;  %v652_v49 = vld [vmem:[%s916_s3] sm:$0xff]   ;;  %v653_v50 = vld [vmem:[%s916_s3 + $0x8] sm:$0xff]  }
   0x4   :  { %50 = vadd.xlane.f32.xlu1 %v49_v4  ;;  %v55_v13 = vsel %vm36_vm0, %v33_v12, 0.0  ;;  %612 = vmatprep.subr.bf16.mxu0 %v652_v49  ;;  %v789_v51 = vld [vmem:[%s917_s4] sm:$0xff]  }
   0x5   :  { %648 = vmatprep.subr.bf16.mxu1 %v652_v49  ;;  %613 = vmatpush3.bf16.msra.mxu0 %v652_v49  ;;  %v794_v52 = vld [vmem:[%s918_s5] sm:$0xff]  }
   0x6   :  { %650 = vmatpush3.bf16.msra.mxu1 %v652_v49  ;;  %614 = vmatprep.subr.bf16.mxu0 %v653_v50 }
   0x7   :  { %41 = vadd.xlane.f32.xlu0 %v40_v6  ;;  %649 = vmatprep.subr.bf16.mxu1 %v653_v50 }
   0x8   :  { %53 = vadd.xlane.f32.xlu1 %v52_v7 }
   0x9   :  { %615 = vmatpush3.bf16.msra.mxu0 %v653_v50 }
   0xa   :  { %651 = vmatpush3.bf16.msra.mxu1 %v653_v50  ;;  %636 = vmatprep.subr.bf16.mxu0 %v794_v52 }
   0xb   :  { %44 = vadd.xlane.f32.xlu0 %v43_v10  ;;  %624 = vmatprep.subr.bf16.mxu1 %v789_v51 }
   0xc   :  { %47 = vadd.xlane.f32.xlu1 %v46_v11 }
   0xf   :  { %56 = vadd.xlane.f32.xlu0 %v55_v13 }
  0x90   :  { %v39_v14 = vpop.xlane.xlu0 %38 }
  0x91   :  { %v51_v15 = vpop.xlane.xlu1 %50  ;;  %v59_v16 = vmul.f32 0.03125, %v39_v14 }
  0x92   :  { %v63_v17 = vmul.f32 0.03125, %v51_v15 }
  0x93   :  { %v745_v18 = vsub.f32 %v27_v0, %v59_v16  ;;  %v533_v16 = vld [vmem:[%s920_s2] ss:$0 sm:$0xff] }
  0x94   :  { %v747_v19 = vsub.f32 %v31_v1, %v63_v17  ;;  %v42_v20 = vpop.xlane.xlu0 %41 }
  0x95   :  { %v54_v21 = vpop.xlane.xlu1 %53  ;;  %v60_v22 = vmul.f32 0.03125, %v42_v20  ;;  %v73_v24 = vmul.f32 %v745_v18, %v745_v18 }
  0x96   :  { %v64_v23 = vmul.f32 0.03125, %v54_v21  ;;  %v77_v25 = vmul.f32 %v747_v19, %v747_v19 }
  0x97   :  { %v753_v26 = vsub.f32 %v28_v2, %v60_v22  ;;  %v80_v28 = vsel %vm36_vm0, %v73_v24, 0.0 }
  0x98   :  { %v755_v27 = vsub.f32 %v32_v5, %v64_v23  ;;  %81 = vadd.xlane.f32.xlu1 %v80_v28  ;;  %v45_v29 = vpop.xlane.xlu0 %44  ;;  %v92_v31 = vsel %vm36_vm0, %v77_v25, 0.0 }
  0x99   :  { %v48_v30 = vpop.xlane.xlu1 %47  ;;  %v61_v32 = vmul.f32 0.03125, %v45_v29  ;;  %v74_v34 = vmul.f32 %v753_v26, %v753_v26 }
  0x9a   :  { %v62_v33 = vmul.f32 0.03125, %v48_v30  ;;  %v78_v35 = vmul.f32 %v755_v27, %v755_v27 }
  0x9b   :  { %v763_v36 = vsub.f32 %v29_v8, %v61_v32  ;;  %v83_v38 = vsel %vm36_vm0, %v74_v34, 0.0 }
  0x9c   :  { %v765_v37 = vsub.f32 %v30_v9, %v62_v33  ;;  %93 = vadd.xlane.f32.xlu1 %v92_v31  ;;  %84 = vadd.xlane.f32.xlu0 %v83_v38  ;;  %v57_v39 = vpop.xlane.xlu0 %56  ;;  %v95_v41 = vsel %vm36_vm0, %v78_v35, 0.0 }
  0x9d   :  { %v65_v40 = vmul.f32 0.03125, %v57_v39  ;;  %v75_v42 = vmul.f32 %v763_v36, %v763_v36 }
  0x9e   :  { %v76_v43 = vmul.f32 %v765_v37, %v765_v37 }
  0x9f   :  { %v773_v44 = vsub.f32 %v33_v12, %v65_v40  ;;  %v86_v45 = vsel %vm36_vm0, %v75_v42, 0.0  ;;  %v532_v12 = vld [vmem:[%s919_s1] ss:$0 sm:$0xff] }
  0xa0   :  { %96 = vadd.xlane.f32.xlu0 %v95_v41  ;;  %87 = vadd.xlane.f32.xlu1 %v86_v45  ;;  %v89_v46 = vsel %vm36_vm0, %v76_v43, 0.0 }
  0xa1   :  { %v79_v47 = vmul.f32 %v773_v44, %v773_v44 }
  0xa3   :  { %v98_v48 = vsel %vm36_vm0, %v79_v47, 0.0 }
  0xa4   :  { %90 = vadd.xlane.f32.xlu0 %v89_v46  ;;  %99 = vadd.xlane.f32.xlu1 %v98_v48 }
 0x125   :  { %v82_v53 = vpop.xlane.xlu1 %81 }
 0x126   :  { %v101_v54 = vmul.f32 0.03125, %v82_v53 }
 0x128   :  { %v108_v55 = vadd.f32 1e-05, %v101_v54 }
 0x129   :  { %v94_v56 = vpop.xlane.xlu1 %93  ;;  %v85_v57 = vpop.xlane.xlu0 %84 }
 0x12a   :  { %658 = vrsqrt.f32 %v108_v55  ;;  %v105_v58 = vmul.f32 0.03125, %v94_v56  ;;  %v102_v59 = vmul.f32 0.03125, %v85_v57 }
 0x12c   :  { %v112_v60 = vadd.f32 1e-05, %v105_v58  ;;  %v109_v61 = vadd.f32 1e-05, %v102_v59 }
 0x12d   :  { %v88_v62 = vpop.xlane.xlu1 %87  ;;  %v97_v63 = vpop.xlane.xlu0 %96 }
 0x12e   :  { %660 = vrsqrt.f32 %v112_v60  ;;  %v103_v0 = vmul.f32 0.03125, %v88_v62  ;;  %v106_v1 = vmul.f32 0.03125, %v97_v63 }
 0x12f   :  { %662 = vrsqrt.f32 %v109_v61 }
 0x130   :  { %v110_v2 = vadd.f32 1e-05, %v103_v0  ;;  %v113_v3 = vadd.f32 1e-05, %v106_v1 }
 0x131   :  { %v100_v4 = vpop.xlane.xlu1 %99  ;;  %v91_v5 = vpop.xlane.xlu0 %90 }
 0x132   :  { %664 = vrsqrt.f32 %v110_v2  ;;  %v107_v6 = vmul.f32 0.03125, %v100_v4  ;;  %v104_v7 = vmul.f32 0.03125, %v91_v5 }
 0x133   :  { %666 = vrsqrt.f32 %v113_v3 }
 0x134   :  { %v659_v8 = vpop.eup %658  ;;  %v114_v9 = vadd.f32 1e-05, %v107_v6  ;;  %v111_v10 = vadd.f32 1e-05, %v104_v7 }
 0x135   :  { %v122_v11 = vmul.f32 %v659_v8, %v745_v18 }
 0x136   :  { %668 = vrsqrt.f32 %v114_v9 }
 0x137   :  { %670 = vrsqrt.f32 %v111_v10  ;;  %v135_v15 = vmul.f32 %v532_v12, %v122_v11 }
 0x138   :  { %v661_v13 = vpop.eup %660 }
 0x139   :  { %v663_v14 = vpop.eup %662  ;;  %v126_v20 = vmul.f32 %v661_v13, %v747_v19  ;;  %v148_v23 = vadd.f32 %v533_v16, %v135_v15 }
 0x13a   :  { %v123_v17 = vmul.f32 %v663_v14, %v753_v26 }
 0x13b   :  { %v139_v29 = vmul.f32 %v532_v12, %v126_v20 }
 0x13c   :  { %v665_v21 = vpop.eup %664  ;;  %v136_v22 = vmul.f32 %v532_v12, %v123_v17 }
 0x13d   :  { %v667_v18 = vpop.eup %666  ;;  %v124_v24 = vmul.f32 %v665_v21, %v763_v36  ;;  %v152_v19 = vadd.f32 %v533_v16, %v139_v29 }
 0x13e   :  { %v149_v25 = vadd.f32 %v533_v16, %v136_v22  ;;  %v127_v28 = vmul.f32 %v667_v18, %v755_v27 }
 0x13f   :  { %v137_v38 = vmul.f32 %v532_v12, %v124_v24 }
 0x140   :  { %v669_v30 = vpop.eup %668  ;;  %v155_v31 = vpack.c.bf16 %v149_v25, %v148_v23  ;;  %v140_v32 = vmul.f32 %v532_v12, %v127_v28 }
 0x141   :  { %v671_v33 = vpop.eup %670  ;;  %v128_v34 = vmul.f32 %v669_v30, %v773_v44  ;;  %v150_v27 = vadd.f32 %v533_v16, %v137_v38  ;;  %v656_v44 = vld [vmem:[%s917_s4 + $0x8] sm:$0xff]  }
 0x142   :  { %v125_v26 = vmul.f32 %v671_v33, %v765_v37  ;;  %616 = vmatprep.mubr.msk.bf16.mxu0 %vm36_vm0, %v155_v31  ;;  %v153_v35 = vadd.f32 %v533_v16, %v140_v32  ;;  %v657_v37 = vld [vmem:[%s918_s5 + $0x8] sm:$0xff]  }
 0x143   :  { %v141_v39 = vmul.f32 %v532_v12, %v128_v34 }
 0x144   :  { %v157_v40 = vpack.c.bf16 %v153_v35, %v152_v19  ;;  %v138_v36 = vmul.f32 %v532_v12, %v125_v26 }
 0x145   :  { %v154_v41 = vadd.f32 %v533_v16, %v141_v39 }
 0x146   :  { %620 = vmatprep.mubr.msk.bf16.mxu1 %vm36_vm0, %v157_v40  ;;  %v151_v42 = vadd.f32 %v533_v16, %v138_v36 }
 0x147   :  { %v158_v43 = vpack.c.bf16 %v154_v41, %v154_v41 }
 0x148   :  { %v156_v45 = vpack.c.bf16 %v151_v42, %v150_v27 }
 0x149   :  { %621 = vmatmul.mubr.msk.bf16.vlgmr.msra.gmra.mrb[0].mxu1 %vm36_vm0, %v158_v43 }
 0x14a   :  { %617 = vmatmul.mubr.msk.bf16.vlgmr.msra.gmra.mrb[0].mxu0 %vm36_vm0, %v156_v45  ;;  %625 = vmatpush3.bf16.msra.mxu1 %v789_v51 }
 0x14b   :  { %637 = vmatpush3.bf16.msra.mxu0 %v794_v52  ;;  %628 = vmatprep.mubr.msk.bf16.mxu1 %vm36_vm0, %v155_v31 }
 0x14c   :  { %640 = vmatprep.mubr.msk.bf16.mxu0 %vm36_vm0, %v155_v31  ;;  %626 = vmatprep.subr.bf16.mxu1 %v656_v44 }
 0x14d   :  { %638 = vmatprep.subr.bf16.mxu0 %v657_v37 }
 0x14e   :  { %627 = vmatpush3.bf16.msra.mxu1 %v656_v44 }
 0x14f   :  { %639 = vmatpush3.bf16.msra.mxu0 %v657_v37 }
 0x151   :  { %629 = vmatmul.mubr.msk.bf16.vlgmr.msra.gmra.mrb[4].mxu1 %vm36_vm0, %v156_v45 }
 0x152   :  { %641 = vmatmul.mubr.msk.bf16.vlgmr.msra.gmra.mrb[4].mxu0 %vm36_vm0, %v156_v45  ;;  %632 = vmatprep.mubr.msk.bf16.mxu1 %vm36_vm0, %v157_v40 }
 0x153   :  { %644 = vmatprep.mubr.msk.bf16.mxu0 %vm36_vm0, %v157_v40 }
 0x159   :  { %633 = vmatmul.mubr.msk.bf16.gmra.mrb[8].mxu1 %vm36_vm0, %v158_v43 }
 0x15a   :  { %645 = vmatmul.mubr.msk.bf16.gmra.mrb[8].mxu0 %vm36_vm0, %v158_v43 }
 0x21c   :  { %v622_v46 = vpop.f32.mrb[0].mxu1 }
 0x21d   :  { %v618_v47 = vpop.f32.mrb[0].mxu0  ;;  %v579_v48 = vpack.c.bf16 %v622_v46, %v622_v46  ;;  %v237_v49 = vpop.f32.mrb[1].mxu1 }
 0x21e   :  { %v575_v50 = vpack.c.bf16 %v618_v47, %v618_v47  ;;  %v221_v51 = vpop.f32.mrb[1].mxu0  ;;  %v577_v52 = vpack.c.bf16 %v237_v49, %v237_v49  ;;  %v623_v53 = vpop.f32.mrb[2].mxu1 }
 0x21f   :  { %287 = vst.msk [vmem:[%s921_s6 + $0x18] sm:$0xf] %vm280_vm1, %v579_v48  ;;  %v573_v54 = vpack.c.bf16 %v221_v51, %v221_v51  ;;  %v619_v55 = vpop.f32.mrb[2].mxu0  ;;  %v240_v56 = vpop.f32.mrb[3].mxu1 }
 0x220   :  { %283 = vst.msk [vmem:[%s921_s6 + $0x8] sm:$0xf] %vm280_vm1, %v575_v50  ;;  %285 = vst.msk [vmem:[%s921_s6 + $0x10] sm:$0xf] %vm280_vm1, %v577_v52  ;;  %v576_v57 = vpack.c.bf16 %v619_v55, %v619_v55  ;;  %v224_v58 = vpop.f32.mrb[3].mxu0  ;;  %v578_v59 = vpack.c.bf16 %v240_v56, %v240_v56 }
 0x221   :  { %281 = vst.msk [vmem:[%s921_s6] sm:$0xf] %vm280_vm1, %v573_v54  ;;  %v574_v60 = vpack.c.bf16 %v224_v58, %v224_v58 }
 0x222   :  { %284 = vst.msk [vmem:[%s921_s6 + $0xc] sm:$0xf] %vm280_vm1, %v576_v57  ;;  %286 = vst.msk [vmem:[%s921_s6 + $0x14] sm:$0xf] %vm280_vm1, %v578_v59 }
 0x223   :  { %282 = vst.msk [vmem:[%s921_s6 + $0x4] sm:$0xf] %vm280_vm1, %v574_v60 }
 0x224   :  { %v630_v61 = vpop.f32.mrb[4].mxu1 }
 0x225   :  { %v582_v62 = vpack.c.bf16 %v630_v61, %v630_v61  ;;  %v642_v63 = vpop.f32.mrb[4].mxu0  ;;  %v338_v0 = vpop.f32.mrb[5].mxu1 }
 0x226   :  { %v589_v1 = vpack.c.bf16 %v642_v63, %v642_v63  ;;  %v580_v2 = vpack.c.bf16 %v338_v0, %v338_v0  ;;  %v454_v3 = vpop.f32.mrb[5].mxu0  ;;  %v631_v4 = vpop.f32.mrb[6].mxu1 }
 0x227   :  { %399 = vst.msk [vmem:[%s922_s7 + $0x8] sm:$0xf] %vm280_vm1, %v582_v62  ;;  %v587_v5 = vpack.c.bf16 %v454_v3, %v454_v3  ;;  %v583_v6 = vpack.c.bf16 %v631_v4, %v631_v4  ;;  %v643_v7 = vpop.f32.mrb[6].mxu0  ;;  %v341_v8 = vpop.f32.mrb[7].mxu1 }
 0x228   :  { %515 = vst.msk [vmem:[%s923_s8 + $0x8] sm:$0xf] %vm280_vm1, %v589_v1  ;;  %397 = vst.msk [vmem:[%s922_s7] sm:$0xf] %vm280_vm1, %v580_v2  ;;  %v590_v9 = vpack.c.bf16 %v643_v7, %v643_v7  ;;  %v581_v10 = vpack.c.bf16 %v341_v8, %v341_v8  ;;  %v457_v11 = vpop.f32.mrb[7].mxu0 }
 0x229   :  { %513 = vst.msk [vmem:[%s923_s8] sm:$0xf] %vm280_vm1, %v587_v5  ;;  %400 = vst.msk [vmem:[%s922_s7 + $0xc] sm:$0xf] %vm280_vm1, %v583_v6  ;;  %v588_v12 = vpack.c.bf16 %v457_v11, %v457_v11 }
 0x22a   :  { %516 = vst.msk [vmem:[%s923_s8 + $0xc] sm:$0xf] %vm280_vm1, %v590_v9  ;;  %398 = vst.msk [vmem:[%s922_s7 + $0x4] sm:$0xf] %vm280_vm1, %v581_v10 }
 0x22b   :  { %514 = vst.msk [vmem:[%s923_s8 + $0x4] sm:$0xf] %vm280_vm1, %v588_v12 }
 0x22c   :  { %v634_v13 = vpop.f32.mrb[8].mxu1 }
 0x22d   :  { %v586_v14 = vpack.c.bf16 %v634_v13, %v634_v13  ;;  %v646_v15 = vpop.f32.mrb[8].mxu0  ;;  %v354_v16 = vpop.f32.mrb[9].mxu1 }
 0x22e   :  { %v593_v17 = vpack.c.bf16 %v646_v15, %v646_v15  ;;  %v584_v20 = vpack.c.bf16 %v354_v16, %v354_v16  ;;  %v470_v21 = vpop.f32.mrb[9].mxu0  ;;  %v635_v22 = vpop.f32.mrb[10].mxu1 }
 0x22f   :  { %403 = vst.msk [vmem:[%s922_s7 + $0x18] sm:$0xf] %vm280_vm1, %v586_v14  ;;  %v591_v18 = vpack.c.bf16 %v470_v21, %v470_v21  ;;  %v647_v23 = vpop.f32.mrb[10].mxu0  ;;  %v357_v24 = vpop.f32.mrb[11].mxu1 }
 0x230   :  { %519 = vst.msk [vmem:[%s923_s8 + $0x18] sm:$0xf] %vm280_vm1, %v593_v17  ;;  %401 = vst.msk [vmem:[%s922_s7 + $0x10] sm:$0xf] %vm280_vm1, %v584_v20  ;;  %v585_v25 = vpack.c.bf16 %v357_v24, %v357_v24  ;;  %v473_v28 = vpop.f32.mrb[11].mxu0 }
 0x231   :  { %517 = vst.msk [vmem:[%s923_s8 + $0x10] sm:$0xf] %vm280_vm1, %v591_v18  ;;  %v592_v29 = vpack.c.bf16 %v473_v28, %v473_v28 }
 0x232   :  { %402 = vst.msk [vmem:[%s922_s7 + $0x14] sm:$0xf] %vm280_vm1, %v585_v25 }
 0x233   :  { %518 = vst.msk [vmem:[%s923_s8 + $0x14] sm:$0xf] %vm280_vm1, %v592_v29 }

// kernel: kat_forward.15
= control target key start
LH: loop header
LB: loop body
LE: loop exit
PB: predicated region body
PF: predicated region fallthrough
CT: control target
= control target key end

     0   :  { %vm28_vm0 = vcmask 261120   ;;  %v400_v55 = vmov 0.0   ;;  %s579_s3 = inlined_call_operand.vmem [shape: f32[50,32], index: 3, kind: input, shape index: {}]   ;;  %s580_s1 = inlined_call_operand.vmem [shape: bf16[32,32], index: 1, kind: input, shape index: {}]   ;;  %s581_s0 = inlined_call_operand.vmem [shape: bf16[50,32], index: 0, kind: input, shape index: {}]   ;;  %s582_s4 = inlined_call_operand.vmem [shape: f32[1,32], index: 4, kind: input, shape index: {}]   ;;  %s583_s2 = inlined_call_operand.vmem [shape: f32[1,32], index: 2, kind: input, shape index: {}]   ;;  %s584_s5 = inlined_call_operand.vmem [shape: f32[1,32], index: 5, kind: input, shape index: {}]   ;;  %s585_s6 = inlined_call_operand.vmem [shape: f32[50,32], index: 6, kind: output, shape index: {}]  }
   0x1   :  { %v199_v0 = vld [vmem:[%s579_s3] sm:$0xff]  ;;  %v201_v1 = vld [vmem:[%s579_s3 + $0x10] sm:$0xff]  ;;  %v200_v2 = vld [vmem:[%s579_s3 + $0x8] sm:$0xff]  ;;  %31 = vst.msk [vmem:[#allocation2 + $0x10] sm:$0xff] %vm28_vm0, %v400_v55 }
   0x2   :  { %v208_v3 = vsel %vm28_vm0, %v199_v0, 0.0  ;;  %v214_v4 = vsel %vm28_vm0, %v201_v1, 0.0  ;;  %v202_v5 = vld [vmem:[%s579_s3 + $0x18] sm:$0xff]  ;;  %v211_v6 = vsel %vm28_vm0, %v200_v2, 0.0  ;;  %v203_v7 = vld [vmem:[%s579_s3 + $0x20] sm:$0xff]  ;;  %v204_v8 = vld [vmem:[%s579_s3 + $0x28] sm:$0xff] }
   0x3   :  { %209 = vadd.xlane.f32.xlu0 %v208_v3  ;;  %215 = vadd.xlane.f32.xlu1 %v214_v4  ;;  %v217_v9 = vsel %vm28_vm0, %v202_v5, 0.0  ;;  %v380_v10 = vld [vmem:[%s580_s1] sm:$0xff]   ;;  %v381_v11 = vld [vmem:[%s580_s1 + $0x8] sm:$0xff]   ;;  %v220_v13 = vsel %vm28_vm0, %v203_v7, 0.0  ;;  %v223_v14 = vsel %vm28_vm0, %v204_v8, 0.0  ;;  %v384_v15 = vld [vmem:[%s581_s0 + $0x10] sm:$0xff]  }
   0x4   :  { %363 = vmatprep.subr.bf16.mxu0 %v380_v10  ;;  %375 = vmatprep.subr.bf16.mxu1 %v380_v10  ;;  %v382_v12 = vld [vmem:[%s581_s0] sm:$0xff]   ;;  %v205_v16 = vld [vmem:[%s579_s3 + $0x30] sm:$0xff]  ;;  %v383_v17 = vld [vmem:[%s581_s0 + $0x8] sm:$0xff]   ;;  %29 = vst.msk [vmem:[#allocation2] sm:$0xff] %vm28_vm0, %v400_v55 }
   0x5   :  { %364 = vmatpush3.bf16.msra.mxu0 %v380_v10  ;;  %367 = vmatprep.mubr.msk.bf16.mxu0 %vm28_vm0, %v382_v12  ;;  %v226_v18 = vsel %vm28_vm0, %v205_v16, 0.0  ;;  %v385_v19 = vld [vmem:[%s581_s0 + $0x18] ss:$0 sps:$4 sm:$0xff]   ;;  %30 = vst.msk [vmem:[#allocation2 + $0x8] sm:$0xff] %vm28_vm0, %v400_v55  ;;  %32 = vst.msk [vmem:[#allocation2 + $0x18] sm:$0xff] %vm28_vm0, %v400_v55 }
   0x6   :  { %365 = vmatprep.subr.bf16.mxu0 %v381_v11  ;;  %377 = vmatpush3.bf16.msra.mxu1 %v380_v10  ;;  %33 = vst.msk [vmem:[#allocation2 + $0x20] sm:$0xff] %vm28_vm0, %v400_v55  ;;  %34 = vst.msk [vmem:[#allocation2 + $0x28] sm:$0xff] %vm28_vm0, %v400_v55 }
   0x7   :  { %212 = vadd.xlane.f32.xlu0 %v211_v6  ;;  %218 = vadd.xlane.f32.xlu1 %v217_v9  ;;  %35 = vst.msk [vmem:[#allocation2 + $0x30] sm:$0xff] %vm28_vm0, %v400_v55 }
   0x8   :  { %376 = vmatprep.subr.bf16.mxu1 %v381_v11  ;;  %371 = vmatprep.mubr.msk.bf16.mxu1 %vm28_vm0, %v384_v15  ;;  %v49_v56 = vld [vmem:[#allocation2 + $0x10] sm:$0xff] }
   0x9   :  { %366 = vmatpush3.bf16.msra.mxu0 %v381_v11 }
   0xa   :  { %378 = vmatpush3.bf16.msra.mxu1 %v381_v11 }
   0xb   :  { %221 = vadd.xlane.f32.xlu0 %v220_v13  ;;  %224 = vadd.xlane.f32.xlu1 %v223_v14  ;;  %v47_v57 = vld [vmem:[#allocation2] sm:$0xff] }
   0xc   :  { %368 = vmatmul.mubr.msk.bf16.vlgmr.msra.gmra.mrb[0].mxu0 %vm28_vm0, %v383_v17  ;;  %v50_v60 = vld [vmem:[#allocation2 + $0x18] sm:$0xff] }
   0xd   :  { %372 = vmatmul.mubr.msk.bf16.vlgmr.msra.gmra.mrb[0].mxu1 %vm28_vm0, %v385_v19  ;;  %v51_v61 = vld [vmem:[#allocation2 + $0x20] sm:$0xff]  ;;  %v52_v6 = vld [vmem:[#allocation2 + $0x28] sm:$0xff] }
   0xe   :  { %v53_v58 = vld [vmem:[#allocation2 + $0x30] sm:$0xff] }
   0xf   :  { %227 = vadd.xlane.f32.xlu0 %v226_v18 }
  0x90   :  { %v210_v20 = vpop.xlane.xlu0 %209  ;;  %v216_v21 = vpop.xlane.xlu1 %215 }
  0x91   :  { %v230_v22 = vmul.f32 0.03125, %v210_v20  ;;  %v232_v23 = vmul.f32 0.03125, %v216_v21 }
  0x93   :  { %v486_v24 = vsub.f32 %v199_v0, %v230_v22  ;;  %v488_v25 = vsub.f32 %v201_v1, %v232_v23  ;;  %v48_v0 = vld [vmem:[#allocation2 + $0x8] sm:$0xff] }
  0x94   :  { %v213_v26 = vpop.xlane.xlu0 %212  ;;  %v219_v27 = vpop.xlane.xlu1 %218 }
  0x95   :  { %v231_v28 = vmul.f32 0.03125, %v213_v26  ;;  %v233_v29 = vmul.f32 0.03125, %v219_v27  ;;  %v244_v30 = vmul.f32 %v486_v24, %v486_v24  ;;  %v246_v31 = vmul.f32 %v488_v25, %v488_v25 }
  0x97   :  { %v494_v32 = vsub.f32 %v200_v2, %v231_v28  ;;  %v496_v33 = vsub.f32 %v202_v5, %v233_v29  ;;  %v251_v34 = vsel %vm28_vm0, %v244_v30, 0.0  ;;  %v257_v37 = vsel %vm28_vm0, %v246_v31, 0.0 }
  0x98   :  { %252 = vadd.xlane.f32.xlu1 %v251_v34  ;;  %v222_v35 = vpop.xlane.xlu0 %221  ;;  %v225_v36 = vpop.xlane.xlu1 %224 }
  0x99   :  { %v234_v38 = vmul.f32 0.03125, %v222_v35  ;;  %v235_v39 = vmul.f32 0.03125, %v225_v36  ;;  %v245_v40 = vmul.f32 %v494_v32, %v494_v32  ;;  %v247_v41 = vmul.f32 %v496_v33, %v496_v33 }
  0x9b   :  { %v504_v42 = vsub.f32 %v203_v7, %v234_v38  ;;  %v506_v43 = vsub.f32 %v204_v8, %v235_v39  ;;  %v254_v44 = vsel %vm28_vm0, %v245_v40, 0.0  ;;  %v260_v47 = vsel %vm28_vm0, %v247_v41, 0.0  ;;  %v354_v38 = vld [vmem:[%s583_s2] ss:$0 sm:$0xff] }
  0x9c   :  { %258 = vadd.xlane.f32.xlu1 %v257_v37  ;;  %255 = vadd.xlane.f32.xlu0 %v254_v44  ;;  %v228_v45 = vpop.xlane.xlu0 %227  ;;  %v355_v37 = vld [vmem:[%s582_s4] ss:$0 sm:$0xff] }
  0x9d   :  { %v236_v46 = vmul.f32 0.03125, %v228_v45  ;;  %v248_v48 = vmul.f32 %v504_v42, %v504_v42  ;;  %v249_v49 = vmul.f32 %v506_v43, %v506_v43 }
  0x9f   :  { %v514_v50 = vsub.f32 %v205_v16, %v236_v46  ;;  %v263_v51 = vsel %vm28_vm0, %v248_v48, 0.0  ;;  %v266_v52 = vsel %vm28_vm0, %v249_v49, 0.0  ;;  %v356_v46 = vld [vmem:[%s584_s5] ss:$0 sm:$0xff] }
  0xa0   :  { %261 = vadd.xlane.f32.xlu0 %v260_v47  ;;  %264 = vadd.xlane.f32.xlu1 %v263_v51 }
  0xa1   :  { %v250_v53 = vmul.f32 %v514_v50, %v514_v50 }
  0xa3   :  { %v269_v54 = vsel %vm28_vm0, %v250_v53, 0.0 }
  0xa4   :  { %267 = vadd.xlane.f32.xlu0 %v266_v52  ;;  %270 = vadd.xlane.f32.xlu1 %v269_v54 }
  0xdf   :  { %v369_v59 = vpop.f32.mrb[0].mxu0 }
  0xe0   :  { %v163_v62 = vadd.f32 %v369_v59, %v49_v56  ;;  %v131_v63 = vpop.f32.mrb[1].mxu0  ;;  %v373_v1 = vpop.f32.mrb[0].mxu1 }
  0xe1   :  { %v161_v2 = vadd.f32 %v131_v63, %v47_v57  ;;  %v370_v3 = vpop.f32.mrb[2].mxu0  ;;  %v167_v4 = vadd.f32 %v373_v1, %v53_v58  ;;  %v147_v5 = vpop.f32.mrb[1].mxu1 }
  0xe2   :  { %170 = vst.msk [vmem:[#allocation2 + $0x10] sm:$0xff] %vm28_vm0, %v163_v62  ;;  %v164_v7 = vadd.f32 %v370_v3, %v50_v60  ;;  %v134_v8 = vpop.f32.mrb[3].mxu0  ;;  %v165_v9 = vadd.f32 %v147_v5, %v51_v61  ;;  %v374_v10 = vpop.f32.mrb[2].mxu1 }
  0xe3   :  { %168 = vst.msk [vmem:[#allocation2] sm:$0xff] %vm28_vm0, %v161_v2  ;;  %v162_v11 = vadd.f32 %v134_v8, %v48_v0  ;;  %174 = vst.msk [vmem:[#allocation2 + $0x30] sm:$0xff] %vm28_vm0, %v167_v4  ;;  %v150_v12 = vpop.f32.mrb[3].mxu1 }
  0xe4   :  { %171 = vst.msk [vmem:[#allocation2 + $0x18] sm:$0xff] %vm28_vm0, %v164_v7  ;;  %172 = vst.msk [vmem:[#allocation2 + $0x20] sm:$0xff] %vm28_vm0, %v165_v9  ;;  %v166_v13 = vadd.f32 %v150_v12, %v52_v6 }
  0xe5   :  { %169 = vst.msk [vmem:[#allocation2 + $0x8] sm:$0xff] %vm28_vm0, %v162_v11 }
  0xe6   :  { %173 = vst.msk [vmem:[#allocation2 + $0x28] sm:$0xff] %vm28_vm0, %v166_v13 }
  0xe9   :  { %v180_v51 = vld [vmem:[#allocation2 + $0x10] sm:$0xff] }
  0xea   :  { %v178_v40 = vld [vmem:[#allocation2] sm:$0xff]  ;;  %v194_v58 = vadd.f32 %v354_v38, %v180_v51 }
  0xeb   :  { %v192_v48 = vadd.f32 %v354_v38, %v178_v40  ;;  %v182_v62 = vld [vmem:[#allocation2 + $0x20] sm:$0xff] }
  0xec   :  { %v179_v55 = vld [vmem:[#allocation2 + $0x8] sm:$0xff]  ;;  %v196_v5 = vadd.f32 %v354_v38, %v182_v62 }
  0xed   :  { %v193_v61 = vadd.f32 %v354_v38, %v179_v55 }
 0x125   :  { %v253_v14 = vpop.xlane.xlu1 %252 }
 0x126   :  { %v272_v15 = vmul.f32 0.03125, %v253_v14 }
 0x128   :  { %v279_v16 = vadd.f32 1e-05, %v272_v15 }
 0x129   :  { %v259_v17 = vpop.xlane.xlu1 %258  ;;  %v256_v18 = vpop.xlane.xlu0 %255 }
 0x12a   :  { %386 = vrsqrt.f32 %v279_v16  ;;  %v274_v19 = vmul.f32 0.03125, %v259_v17  ;;  %v273_v20 = vmul.f32 0.03125, %v256_v18  ;;  %v183_v16 = vld [vmem:[#allocation2 + $0x28] sm:$0xff] }
 0x12c   :  { %v281_v21 = vadd.f32 1e-05, %v274_v19  ;;  %v280_v22 = vadd.f32 1e-05, %v273_v20 }
 0x12d   :  { %v265_v23 = vpop.xlane.xlu1 %264  ;;  %v262_v26 = vpop.xlane.xlu0 %261 }
 0x12e   :  { %388 = vrsqrt.f32 %v281_v21  ;;  %v276_v27 = vmul.f32 0.03125, %v265_v23  ;;  %v275_v28 = vmul.f32 0.03125, %v262_v26 }
 0x12f   :  { %390 = vrsqrt.f32 %v280_v22 }
 0x130   :  { %v283_v29 = vadd.f32 1e-05, %v276_v27  ;;  %v282_v30 = vadd.f32 1e-05, %v275_v28 }
 0x131   :  { %v271_v31 = vpop.xlane.xlu1 %270  ;;  %v268_v34 = vpop.xlane.xlu0 %267 }
 0x132   :  { %392 = vrsqrt.f32 %v283_v29  ;;  %v278_v35 = vmul.f32 0.03125, %v271_v31  ;;  %v277_v36 = vmul.f32 0.03125, %v268_v34 }
 0x133   :  { %394 = vrsqrt.f32 %v282_v30 }
 0x134   :  { %v387_v39 = vpop.eup %386  ;;  %v285_v41 = vadd.f32 1e-05, %v278_v35  ;;  %v284_v44 = vadd.f32 1e-05, %v277_v36 }
 0x135   :  { %v293_v45 = vmul.f32 %v387_v39, %v486_v24 }
 0x136   :  { %396 = vrsqrt.f32 %v285_v41 }
 0x137   :  { %v306_v47 = vmul.f32 %v355_v37, %v293_v45  ;;  %398 = vrsqrt.f32 %v284_v44 }
 0x138   :  { %v389_v49 = vpop.eup %388 }
 0x139   :  { %v391_v52 = vpop.eup %390  ;;  %v319_v53 = vadd.f32 %v356_v46, %v306_v47  ;;  %v295_v54 = vmul.f32 %v389_v49, %v488_v25  ;;  %v181_v25 = vld [vmem:[#allocation2 + $0x18] sm:$0xff] }
 0x13a   :  { %v294_v56 = vmul.f32 %v391_v52, %v494_v32  ;;  %v195_v8 = vadd.f32 %v354_v38, %v181_v25 }
 0x13b   :  { %v308_v57 = vmul.f32 %v355_v37, %v295_v54  ;;  %v326_v24 = vadd.f32 %v319_v53, %v192_v48 }
 0x13c   :  { %v393_v59 = vpop.eup %392  ;;  %v307_v60 = vmul.f32 %v355_v37, %v294_v56 }
 0x13d   :  { %v395_v63 = vpop.eup %394  ;;  %v321_v0 = vadd.f32 %v356_v46, %v308_v57  ;;  %v297_v1 = vmul.f32 %v393_v59, %v504_v42  ;;  %333 = vst.msk [vmem:[%s585_s6] sm:$0xff] %vm28_vm0, %v326_v24 }
 0x13e   :  { %v320_v2 = vadd.f32 %v356_v46, %v307_v60  ;;  %v296_v32 = vmul.f32 %v395_v63, %v496_v33  ;;  %v184_v33 = vld [vmem:[#allocation2 + $0x30] sm:$0xff] }
 0x13f   :  { %v310_v3 = vmul.f32 %v355_v37, %v297_v1  ;;  %v328_v4 = vadd.f32 %v321_v0, %v194_v58  ;;  %v198_v20 = vadd.f32 %v354_v38, %v184_v33 }
 0x140   :  { %v397_v6 = vpop.eup %396  ;;  %v309_v7 = vmul.f32 %v355_v37, %v296_v32  ;;  %v327_v9 = vadd.f32 %v320_v2, %v193_v61 }
 0x141   :  { %v399_v10 = vpop.eup %398  ;;  %v323_v11 = vadd.f32 %v356_v46, %v310_v3  ;;  %335 = vst.msk [vmem:[%s585_s6 + $0x10] sm:$0xff] %vm28_vm0, %v328_v4  ;;  %v299_v42 = vmul.f32 %v397_v6, %v514_v50 }
 0x142   :  { %v322_v12 = vadd.f32 %v356_v46, %v309_v7  ;;  %v298_v13 = vmul.f32 %v399_v10, %v506_v43  ;;  %334 = vst.msk [vmem:[%s585_s6 + $0x8] sm:$0xff] %vm28_vm0, %v327_v9  ;;  %v197_v43 = vadd.f32 %v354_v38, %v183_v16 }
 0x143   :  { %v312_v14 = vmul.f32 %v355_v37, %v299_v42  ;;  %v330_v15 = vadd.f32 %v323_v11, %v196_v5 }
 0x144   :  { %v311_v17 = vmul.f32 %v355_v37, %v298_v13  ;;  %v329_v18 = vadd.f32 %v322_v12, %v195_v8 }
 0x145   :  { %v325_v19 = vadd.f32 %v356_v46, %v312_v14  ;;  %337 = vst.msk [vmem:[%s585_s6 + $0x20] sm:$0xff] %vm28_vm0, %v330_v15 }
 0x146   :  { %v324_v50 = vadd.f32 %v356_v46, %v311_v17  ;;  %336 = vst.msk [vmem:[%s585_s6 + $0x18] sm:$0xff] %vm28_vm0, %v329_v18 }
 0x147   :  { %v332_v21 = vadd.f32 %v325_v19, %v198_v20 }
 0x148   :  { %v331_v22 = vadd.f32 %v324_v50, %v197_v43 }
 0x149   :  { %339 = vst.msk [vmem:[%s585_s6 + $0x30] sm:$0xff] %vm28_vm0, %v332_v21 }
 0x14a   :  { %338 = vst.msk [vmem:[%s585_s6 + $0x28] sm:$0xff] %vm28_vm0, %v331_v22 }

// kernel: kat_forward.16
= control target key start
LH: loop header
LB: loop body
LE: loop exit
PB: predicated region body
PF: predicated region fallthrough
CT: control target
= control target key end

     0   :  { %vm46_vm0 = vcmask 261120   ;;  %vm25_vm1 = vcmask 523264   ;;  %v483_v51 = vmov 0.0   ;;  %vm395_vm2 = vcmask 519168   ;;  %s659_s0 = inlined_call_operand.vmem [shape: f32[50,32], index: 0, kind: input, shape index: {}]   ;;  %s660_s1 = inlined_call_operand.vmem [shape: bf16[32,64], index: 1, kind: input, shape index: {}]   ;;  %s661_s2 = inlined_call_operand.vmem [shape: f32[1,32], index: 2, kind: input, shape index: {}]   ;;  %s662_s3 = inlined_call_operand.vmem [shape: f32[1,32], index: 3, kind: input, shape index: {}]   ;;  %s663_s4 = inlined_call_operand.vmem [shape: f32[1,64], index: 4, kind: input, shape index: {}]   ;;  %s664_s5 = inlined_call_operand.vmem [shape: bf16[50,64], index: 5, kind: output, shape index: {}]  }
   0x1   :  { %v37_v0 = vld [vmem:[%s659_s0] sm:$0xff]  ;;  %v38_v2 = vld [vmem:[%s659_s0 + $0x8] sm:$0xff]  ;;  %v39_v8 = vld [vmem:[%s659_s0 + $0x10] sm:$0xff]  ;;  %28 = vst.msk [vmem:[#allocation2 + $0x10] sm:$0xff] %vm25_vm1, %v483_v51 }
   0x2   :  { %v41_v1 = vld [vmem:[%s659_s0 + $0x20] sm:$0xff]  ;;  %v47_v3 = vsel %vm46_vm0, %v37_v0, 0.0  ;;  %v42_v5 = vld [vmem:[%s659_s0 + $0x28] sm:$0xff]  ;;  %v50_v6 = vsel %vm46_vm0, %v38_v2, 0.0  ;;  %v40_v9 = vld [vmem:[%s659_s0 + $0x18] sm:$0xff]  ;;  %v53_v10 = vsel %vm46_vm0, %v39_v8, 0.0 }
   0x3   :  { %v59_v4 = vsel %vm46_vm0, %v41_v1, 0.0  ;;  %48 = vadd.xlane.f32.xlu0 %v47_v3  ;;  %v62_v7 = vsel %vm46_vm0, %v42_v5, 0.0  ;;  %v56_v11 = vsel %vm46_vm0, %v40_v9, 0.0  ;;  %v43_v12 = vld [vmem:[%s659_s0 + $0x30] sm:$0xff]  ;;  %v453_v49 = vld [vmem:[%s660_s1] sm:$0xff]   ;;  %v454_v50 = vld [vmem:[%s660_s1 + $0x8] sm:$0xff]  }
   0x4   :  { %60 = vadd.xlane.f32.xlu1 %v59_v4  ;;  %v65_v13 = vsel %vm46_vm0, %v43_v12, 0.0  ;;  %436 = vmatprep.subr.bf16.mxu0 %v453_v49  ;;  %26 = vst.msk [vmem:[#allocation2] sm:$0xff] %vm25_vm1, %v483_v51  ;;  %27 = vst.msk [vmem:[#allocation2 + $0x8] sm:$0xff] %vm25_vm1, %v483_v51 }
   0x5   :  { %448 = vmatprep.subr.bf16.mxu1 %v453_v49  ;;  %437 = vmatpush3.bf16.msra.mxu0 %v453_v49  ;;  %29 = vst.msk [vmem:[#allocation2 + $0x18] sm:$0xff] %vm25_vm1, %v483_v51  ;;  %30 = vst.msk [vmem:[#allocation2 + $0x20] sm:$0xff] %vm25_vm1, %v483_v51 }
   0x6   :  { %450 = vmatpush3.bf16.msra.mxu1 %v453_v49  ;;  %438 = vmatprep.subr.bf16.mxu0 %v454_v50  ;;  %31 = vst.msk [vmem:[#allocation2 + $0x28] sm:$0xff] %vm25_vm1, %v483_v51  ;;  %32 = vst.msk [vmem:[#allocation2 + $0x30] sm:$0xff] %vm25_vm1, %v483_v51 }
   0x7   :  { %51 = vadd.xlane.f32.xlu0 %v50_v6  ;;  %449 = vmatprep.subr.bf16.mxu1 %v454_v50 }
   0x8   :  { %63 = vadd.xlane.f32.xlu1 %v62_v7 }
   0x9   :  { %439 = vmatpush3.bf16.msra.mxu0 %v454_v50 }
   0xa   :  { %451 = vmatpush3.bf16.msra.mxu1 %v454_v50 }
   0xb   :  { %54 = vadd.xlane.f32.xlu0 %v53_v10 }
   0xc   :  { %57 = vadd.xlane.f32.xlu1 %v56_v11  ;;  %v407_v11 = vld [vmem:[%s661_s2] ss:$0 sm:$0xff]  ;;  %v168_v51 = vld [vmem:[#allocation2 + $0x18] sm:$0xff] }
   0xf   :  { %66 = vadd.xlane.f32.xlu0 %v65_v13 }
  0x90   :  { %v49_v14 = vpop.xlane.xlu0 %48 }
  0x91   :  { %v61_v15 = vpop.xlane.xlu1 %60  ;;  %v69_v16 = vmul.f32 0.03125, %v49_v14 }
  0x92   :  { %v73_v17 = vmul.f32 0.03125, %v61_v15  ;;  %v408_v15 = vld [vmem:[%s662_s3] ss:$0 sm:$0xff] }
  0x93   :  { %v542_v18 = vsub.f32 %v37_v0, %v69_v16 }
  0x94   :  { %v544_v19 = vsub.f32 %v41_v1, %v73_v17  ;;  %v52_v20 = vpop.xlane.xlu0 %51 }
  0x95   :  { %v64_v21 = vpop.xlane.xlu1 %63  ;;  %v70_v22 = vmul.f32 0.03125, %v52_v20  ;;  %v83_v24 = vmul.f32 %v542_v18, %v542_v18 }
  0x96   :  { %v74_v23 = vmul.f32 0.03125, %v64_v21  ;;  %v87_v25 = vmul.f32 %v544_v19, %v544_v19 }
  0x97   :  { %v550_v26 = vsub.f32 %v38_v2, %v70_v22  ;;  %v90_v28 = vsel %vm46_vm0, %v83_v24, 0.0 }
  0x98   :  { %v552_v27 = vsub.f32 %v42_v5, %v74_v23  ;;  %91 = vadd.xlane.f32.xlu1 %v90_v28  ;;  %v55_v29 = vpop.xlane.xlu0 %54  ;;  %v102_v31 = vsel %vm46_vm0, %v87_v25, 0.0 }
  0x99   :  { %v58_v30 = vpop.xlane.xlu1 %57  ;;  %v71_v32 = vmul.f32 0.03125, %v55_v29  ;;  %v84_v34 = vmul.f32 %v550_v26, %v550_v26 }
  0x9a   :  { %v72_v33 = vmul.f32 0.03125, %v58_v30  ;;  %v88_v35 = vmul.f32 %v552_v27, %v552_v27 }
  0x9b   :  { %v560_v36 = vsub.f32 %v39_v8, %v71_v32  ;;  %v93_v38 = vsel %vm46_vm0, %v84_v34, 0.0 }
  0x9c   :  { %v562_v37 = vsub.f32 %v40_v9, %v72_v33  ;;  %103 = vadd.xlane.f32.xlu1 %v102_v31  ;;  %94 = vadd.xlane.f32.xlu0 %v93_v38  ;;  %v67_v39 = vpop.xlane.xlu0 %66  ;;  %v105_v41 = vsel %vm46_vm0, %v88_v35, 0.0 }
  0x9d   :  { %v75_v40 = vmul.f32 0.03125, %v67_v39  ;;  %v85_v42 = vmul.f32 %v560_v36, %v560_v36 }
  0x9e   :  { %v86_v43 = vmul.f32 %v562_v37, %v562_v37 }
  0x9f   :  { %v570_v44 = vsub.f32 %v43_v12, %v75_v40  ;;  %v96_v45 = vsel %vm46_vm0, %v85_v42, 0.0 }
  0xa0   :  { %106 = vadd.xlane.f32.xlu0 %v105_v41  ;;  %97 = vadd.xlane.f32.xlu1 %v96_v45  ;;  %v99_v46 = vsel %vm46_vm0, %v86_v43, 0.0  ;;  %v169_v45 = vld [vmem:[#allocation2 + $0x20] sm:$0xff] }
  0xa1   :  { %v89_v47 = vmul.f32 %v570_v44, %v570_v44 }
  0xa3   :  { %v108_v48 = vsel %vm46_vm0, %v89_v47, 0.0  ;;  %v165_v47 = vld [vmem:[#allocation2] sm:$0xff] }
  0xa4   :  { %100 = vadd.xlane.f32.xlu0 %v99_v46  ;;  %109 = vadd.xlane.f32.xlu1 %v108_v48 }
 0x125   :  { %v92_v52 = vpop.xlane.xlu1 %91 }
 0x126   :  { %v111_v53 = vmul.f32 0.03125, %v92_v52  ;;  %v170_v52 = vld [vmem:[#allocation2 + $0x28] sm:$0xff] }
 0x128   :  { %v118_v54 = vadd.f32 1e-05, %v111_v53 }
 0x129   :  { %v104_v55 = vpop.xlane.xlu1 %103  ;;  %v95_v56 = vpop.xlane.xlu0 %94 }
 0x12a   :  { %455 = vrsqrt.f32 %v118_v54  ;;  %v115_v57 = vmul.f32 0.03125, %v104_v55  ;;  %v112_v58 = vmul.f32 0.03125, %v95_v56 }
 0x12c   :  { %v122_v59 = vadd.f32 1e-05, %v115_v57  ;;  %v119_v60 = vadd.f32 1e-05, %v112_v58  ;;  %v166_v57 = vld [vmem:[#allocation2 + $0x8] sm:$0xff] }
 0x12d   :  { %v98_v61 = vpop.xlane.xlu1 %97  ;;  %v107_v62 = vpop.xlane.xlu0 %106 }
 0x12e   :  { %457 = vrsqrt.f32 %v122_v59  ;;  %v113_v63 = vmul.f32 0.03125, %v98_v61  ;;  %v116_v0 = vmul.f32 0.03125, %v107_v62 }
 0x12f   :  { %459 = vrsqrt.f32 %v119_v60 }
 0x130   :  { %v120_v1 = vadd.f32 1e-05, %v113_v63  ;;  %v123_v2 = vadd.f32 1e-05, %v116_v0 }
 0x131   :  { %v110_v3 = vpop.xlane.xlu1 %109  ;;  %v101_v4 = vpop.xlane.xlu0 %100 }
 0x132   :  { %461 = vrsqrt.f32 %v120_v1  ;;  %v117_v5 = vmul.f32 0.03125, %v110_v3  ;;  %v114_v6 = vmul.f32 0.03125, %v101_v4  ;;  %v415_v1 = vld [vmem:[%s663_s4] ss:$0 sm:$0xff] }
 0x133   :  { %463 = vrsqrt.f32 %v123_v2 }
 0x134   :  { %v456_v7 = vpop.eup %455  ;;  %v124_v8 = vadd.f32 1e-05, %v117_v5  ;;  %v121_v9 = vadd.f32 1e-05, %v114_v6 }
 0x135   :  { %v132_v10 = vmul.f32 %v456_v7, %v542_v18 }
 0x136   :  { %465 = vrsqrt.f32 %v124_v8 }
 0x137   :  { %467 = vrsqrt.f32 %v121_v9  ;;  %v145_v14 = vmul.f32 %v407_v11, %v132_v10 }
 0x138   :  { %v458_v12 = vpop.eup %457 }
 0x139   :  { %v460_v13 = vpop.eup %459  ;;  %v136_v17 = vmul.f32 %v458_v12, %v544_v19  ;;  %v158_v22 = vadd.f32 %v408_v15, %v145_v14 }
 0x13a   :  { %v133_v16 = vmul.f32 %v460_v13, %v550_v26 }
 0x13b   :  { %v149_v28 = vmul.f32 %v407_v11, %v136_v17 }
 0x13c   :  { %v462_v20 = vpop.eup %461  ;;  %v146_v21 = vmul.f32 %v407_v11, %v133_v16 }
 0x13d   :  { %v464_v18 = vpop.eup %463  ;;  %v134_v23 = vmul.f32 %v462_v20, %v560_v36  ;;  %v162_v19 = vadd.f32 %v408_v15, %v149_v28 }
 0x13e   :  { %v159_v24 = vadd.f32 %v408_v15, %v146_v21  ;;  %v137_v25 = vmul.f32 %v464_v18, %v552_v27 }
 0x13f   :  { %v147_v35 = vmul.f32 %v407_v11, %v134_v23 }
 0x140   :  { %v466_v29 = vpop.eup %465  ;;  %v172_v30 = vpack.c.bf16 %v159_v24, %v158_v22  ;;  %v150_v31 = vmul.f32 %v407_v11, %v137_v25 }
 0x141   :  { %v468_v32 = vpop.eup %467  ;;  %v138_v33 = vmul.f32 %v466_v29, %v570_v44  ;;  %v160_v27 = vadd.f32 %v408_v15, %v147_v35  ;;  %v167_v44 = vld [vmem:[#allocation2 + $0x10] sm:$0xff] }
 0x142   :  { %v135_v26 = vmul.f32 %v468_v32, %v562_v37  ;;  %440 = vmatprep.mubr.msk.bf16.mxu0 %vm46_vm0, %v172_v30  ;;  %v163_v34 = vadd.f32 %v408_v15, %v150_v31  ;;  %v171_v37 = vld [vmem:[#allocation2 + $0x30] sm:$0xff] }
 0x143   :  { %v151_v38 = vmul.f32 %v407_v11, %v138_v33 }
 0x144   :  { %v174_v39 = vpack.c.bf16 %v163_v34, %v162_v19  ;;  %v148_v36 = vmul.f32 %v407_v11, %v135_v26 }
 0x145   :  { %v164_v40 = vadd.f32 %v408_v15, %v151_v38 }
 0x146   :  { %444 = vmatprep.mubr.msk.bf16.mxu1 %vm46_vm0, %v174_v39  ;;  %v161_v41 = vadd.f32 %v408_v15, %v148_v36 }
 0x147   :  { %v175_v42 = vpack.c.bf16 %v164_v40, %v164_v40 }
 0x148   :  { %v173_v43 = vpack.c.bf16 %v161_v41, %v160_v27 }
 0x149   :  { %445 = vmatmul.mubr.msk.bf16.vlgmr.msra.gmra.mrb[0].mxu1 %vm46_vm0, %v175_v42 }
 0x14a   :  { %441 = vmatmul.mubr.msk.bf16.vlgmr.msra.gmra.mrb[0].mxu0 %vm46_vm0, %v173_v43 }
 0x21c   :  { %v446_v46 = vpop.f32.mrb[0].mxu1 }
 0x21d   :  { %v442_v48 = vpop.f32.mrb[0].mxu0  ;;  %v270_v49 = vadd.f32 %v446_v46, %v171_v37  ;;  %v250_v50 = vpop.f32.mrb[1].mxu1 }
 0x21e   :  { %v266_v53 = vadd.f32 %v442_v48, %v167_v44  ;;  %v234_v54 = vpop.f32.mrb[1].mxu0  ;;  %v268_v55 = vadd.f32 %v250_v50, %v169_v45  ;;  %v447_v56 = vpop.f32.mrb[2].mxu1 }
 0x21f   :  { %278 = vst.msk [vmem:[#allocation2 + $0x30] sm:$0xff] %vm25_vm1, %v270_v49  ;;  %v264_v58 = vadd.f32 %v234_v54, %v165_v47  ;;  %v443_v59 = vpop.f32.mrb[2].mxu0  ;;  %v253_v60 = vpop.f32.mrb[3].mxu1 }
 0x220   :  { %274 = vst.msk [vmem:[#allocation2 + $0x10] sm:$0xff] %vm25_vm1, %v266_v53  ;;  %276 = vst.msk [vmem:[#allocation2 + $0x20] sm:$0xff] %vm25_vm1, %v268_v55  ;;  %v267_v61 = vadd.f32 %v443_v59, %v168_v51  ;;  %v237_v62 = vpop.f32.mrb[3].mxu0  ;;  %v269_v63 = vadd.f32 %v253_v60, %v170_v52 }
 0x221   :  { %272 = vst.msk [vmem:[#allocation2] sm:$0xff] %vm25_vm1, %v264_v58  ;;  %v265_v0 = vadd.f32 %v237_v62, %v166_v57 }
 0x222   :  { %275 = vst.msk [vmem:[#allocation2 + $0x18] sm:$0xff] %vm25_vm1, %v267_v61  ;;  %277 = vst.msk [vmem:[#allocation2 + $0x28] sm:$0xff] %vm25_vm1, %v269_v63 }
 0x223   :  { %273 = vst.msk [vmem:[#allocation2 + $0x8] sm:$0xff] %vm25_vm1, %v265_v0 }
 0x226   :  { %v288_v2 = vld [vmem:[#allocation2 + $0x30] sm:$0xff] }
 0x227   :  { %v284_v3 = vld [vmem:[#allocation2 + $0x10] sm:$0xff]  ;;  %v302_v4 = vadd.f32 %v415_v1, %v288_v2  ;;  %v286_v5 = vld [vmem:[#allocation2 + $0x20] sm:$0xff] }
 0x228   :  { %v298_v6 = vadd.f32 %v415_v1, %v284_v3  ;;  %v282_v7 = vld [vmem:[#allocation2] sm:$0xff]  ;;  %v617_v8 = vadd.f32 %v415_v1, %v286_v5 }
 0x229   :  { %v316_v9 = vmul.f32 0.044715, %v302_v4  ;;  %v296_v10 = vadd.f32 %v415_v1, %v282_v7  ;;  %v285_v11 = vld [vmem:[#allocation2 + $0x18] sm:$0xff]  ;;  %v287_v12 = vld [vmem:[#allocation2 + $0x28] sm:$0xff]  ;;  %v309_v53 = vmul.f32 0.5, %v302_v4 }
 0x22a   :  { %v312_v13 = vmul.f32 0.044715, %v298_v6  ;;  %v314_v14 = vmul.f32 0.044715, %v617_v8  ;;  %v299_v17 = vadd.f32 %v415_v1, %v285_v11  ;;  %v283_v20 = vld [vmem:[#allocation2 + $0x8] sm:$0xff]  ;;  %v621_v23 = vadd.f32 %v415_v1, %v287_v12 }
 0x22b   :  { %v323_v15 = vmul.f32 %v316_v9, %v302_v4  ;;  %v310_v16 = vmul.f32 0.044715, %v296_v10  ;;  %v297_v22 = vadd.f32 %v415_v1, %v283_v20  ;;  %v305_v56 = vmul.f32 0.5, %v298_v6 }
 0x22c   :  { %v319_v21 = vmul.f32 %v312_v13, %v298_v6  ;;  %v321_v18 = vmul.f32 %v314_v14, %v617_v8  ;;  %v313_v28 = vmul.f32 0.044715, %v299_v17  ;;  %v315_v38 = vmul.f32 0.044715, %v621_v23 }
 0x22d   :  { %v330_v24 = vmul.f32 %v323_v15, %v302_v4  ;;  %v317_v25 = vmul.f32 %v310_v16, %v296_v10  ;;  %v311_v31 = vmul.f32 0.044715, %v297_v22  ;;  %v303_v60 = vmul.f32 0.5, %v296_v10 }
 0x22e   :  { %v326_v29 = vmul.f32 %v319_v21, %v298_v6  ;;  %v328_v30 = vmul.f32 %v321_v18, %v617_v8  ;;  %v320_v26 = vmul.f32 %v313_v28, %v299_v17  ;;  %v322_v43 = vmul.f32 %v315_v38, %v621_v23 }
 0x22f   :  { %v337_v32 = vadd.f32 %v330_v24, %v302_v4  ;;  %v324_v33 = vmul.f32 %v317_v25, %v296_v10  ;;  %v318_v35 = vmul.f32 %v311_v31, %v297_v22  ;;  %v307_v0 = vmul.f32 0.5, %v617_v8 }
 0x230   :  { %v333_v19 = vadd.f32 %v326_v29, %v298_v6  ;;  %v335_v34 = vadd.f32 %v328_v30, %v617_v8  ;;  %v327_v40 = vmul.f32 %v320_v26, %v299_v17  ;;  %v329_v46 = vmul.f32 %v322_v43, %v621_v23 }
 0x231   :  { %v344_v39 = vmul.f32 0.7978846, %v337_v32  ;;  %v331_v36 = vadd.f32 %v324_v33, %v296_v10  ;;  %v325_v42 = vmul.f32 %v318_v35, %v297_v22  ;;  %v306_v7 = vmul.f32 0.5, %v299_v17 }
 0x232   :  { %v340_v27 = vmul.f32 0.7978846, %v333_v19  ;;  %v342_v41 = vmul.f32 0.7978846, %v335_v34  ;;  %v334_v44 = vadd.f32 %v327_v40, %v299_v17  ;;  %v336_v49 = vadd.f32 %v329_v46, %v621_v23 }
 0x233   :  { %469 = vtanh.f32 %v344_v39  ;;  %v338_v37 = vmul.f32 0.7978846, %v331_v36  ;;  %v332_v45 = vadd.f32 %v325_v42, %v297_v22  ;;  %v304_v12 = vmul.f32 0.5, %v297_v22 }
 0x234   :  { %471 = vtanh.f32 %v340_v27  ;;  %v341_v47 = vmul.f32 0.7978846, %v334_v44  ;;  %v343_v50 = vmul.f32 0.7978846, %v336_v49  ;;  %v308_v16 = vmul.f32 0.5, %v621_v23 }
 0x235   :  { %473 = vtanh.f32 %v338_v37  ;;  %v339_v48 = vmul.f32 0.7978846, %v332_v45 }
 0x236   :  { %475 = vtanh.f32 %v342_v41 }
 0x237   :  { %477 = vtanh.f32 %v341_v47 }
 0x238   :  { %479 = vtanh.f32 %v339_v48 }
 0x239   :  { %481 = vtanh.f32 %v343_v50 }
 0x23d   :  { %v470_v51 = vpop.eup %469 }
 0x23e   :  { %v472_v52 = vpop.eup %471  ;;  %v358_v54 = vadd.f32 1.0, %v470_v51 }
 0x23f   :  { %v474_v55 = vpop.eup %473  ;;  %v354_v57 = vadd.f32 1.0, %v472_v52 }
 0x240   :  { %v476_v58 = vpop.eup %475  ;;  %v365_v59 = vmul.f32 %v358_v54, %v309_v53  ;;  %v352_v61 = vadd.f32 1.0, %v474_v55 }
 0x241   :  { %v478_v62 = vpop.eup %477  ;;  %v361_v63 = vmul.f32 %v354_v57, %v305_v56  ;;  %v356_v1 = vadd.f32 1.0, %v476_v58 }
 0x242   :  { %v480_v2 = vpop.eup %479  ;;  %v429_v3 = vpack.c.bf16 %v365_v59, %v365_v59  ;;  %v359_v5 = vmul.f32 %v352_v61, %v303_v60  ;;  %v355_v9 = vadd.f32 1.0, %v478_v62 }
 0x243   :  { %v425_v4 = vpack.c.bf16 %v361_v63, %v361_v63  ;;  %v363_v11 = vmul.f32 %v356_v1, %v307_v0  ;;  %v353_v6 = vadd.f32 1.0, %v480_v2  ;;  %v482_v13 = vpop.eup %481 }
 0x244   :  { %402 = vst.msk [vmem:[%s664_s5 + $0x18] sm:$0xf] %vm395_vm2, %v429_v3  ;;  %v423_v10 = vpack.c.bf16 %v359_v5, %v359_v5  ;;  %v362_v14 = vmul.f32 %v355_v9, %v306_v7  ;;  %v357_v17 = vadd.f32 1.0, %v482_v13 }
 0x245   :  { %398 = vst.msk [vmem:[%s664_s5 + $0x8] sm:$0xf] %vm395_vm2, %v425_v4  ;;  %v427_v8 = vpack.c.bf16 %v363_v11, %v363_v11  ;;  %v360_v15 = vmul.f32 %v353_v6, %v304_v12 }
 0x246   :  { %396 = vst.msk [vmem:[%s664_s5] sm:$0xf] %vm395_vm2, %v423_v10  ;;  %v426_v20 = vpack.c.bf16 %v362_v14, %v362_v14  ;;  %v364_v18 = vmul.f32 %v357_v17, %v308_v16 }
 0x247   :  { %400 = vst.msk [vmem:[%s664_s5 + $0x10] sm:$0xf] %vm395_vm2, %v427_v8  ;;  %v424_v21 = vpack.c.bf16 %v360_v15, %v360_v15 }
 0x248   :  { %399 = vst.msk [vmem:[%s664_s5 + $0xc] sm:$0xf] %vm395_vm2, %v426_v20  ;;  %v428_v22 = vpack.c.bf16 %v364_v18, %v364_v18 }
 0x249   :  { %397 = vst.msk [vmem:[%s664_s5 + $0x4] sm:$0xf] %vm395_vm2, %v424_v21 }
 0x24a   :  { %401 = vst.msk [vmem:[%s664_s5 + $0x14] sm:$0xf] %vm395_vm2, %v428_v22 }

// kernel: kat_forward.14
= control target key start
LH: loop header
LB: loop body
LE: loop exit
PB: predicated region body
PF: predicated region fallthrough
CT: control target
= control target key end

     0   :  { %s2460_s30 = smov 0   ;;  %s2462_s10 = smov 0   ;;  %s2947_s0 = inlined_call_operand.vmem [shape: bf16[2,25,32], index: 0, kind: input, shape index: {}]   ;;  %s2948_s1 = inlined_call_operand.vmem [shape: bf16[2,25,32], index: 1, kind: input, shape index: {}]   ;;  %s2949_s2 = inlined_call_operand.vmem [shape: bf16[2,25,32], index: 2, kind: input, shape index: {}]   ;;  %s2950_s3 = inlined_call_operand.vmem [shape: f32[2,17,8], index: 3, kind: input, shape index: {}]   ;;  %s2951_s4 = inlined_call_operand.vmem [shape: f32[2,8,16], index: 4, kind: input, shape index: {}]   ;;  %s2952_s5 = inlined_call_operand.vmem [shape: f32[2,17,1], index: 5, kind: input, shape index: {}]   ;;  %s2953_s6 = inlined_call_operand.vmem [shape: f32[2,1,8], index: 6, kind: input, shape index: {}]   ;;  %s2954_s7 = inlined_call_operand.vmem [shape: f32[2,8,1], index: 7, kind: input, shape index: {}]   ;;  %s2955_s8 = inlined_call_operand.vmem [shape: f32[2,1,16], index: 8, kind: input, shape index: {}]   ;;  %s2956_s9 = inlined_call_operand.vmem [shape: bf16[2,25,32], index: 9, kind: output, shape index: {}]  }
   0x1   :  { %s2464_s11 = smov 0  }
   0x2 LB: > { %s31_s12 = sadd.s32 1, %s2395_s10  ;;  %p2041_p0 = scmp.ge.s32.totalorder %s2399_s11, 1  ;;  %s2399_s11 = sphi %s2464_s11, %s19_s11   ;;  %s2395_s10 = sphi %s2462_s10, %s2960_s10   ;;  %s2391_s30 = sphi %s2460_s30, %s2959_s30  }
   0x3   : > { %p33_p1 = scmp.ge.s32.totalorder %s31_s12, 2  ;;  %p390_p2 = scmp.lt.s32.totalorder %s2399_s11, 3 }
   0x5   : > { %s2962_s12 = smov (%p33_p1, %s31_s12), 0  ;;  %p391_p3 = pnand %p2041_p0, %p390_p2 }
   0x6   : > { %p472_p4 = scmp.lt.s32.totalorder (!%p391_p3), %s2391_s30, 1  ;;  %v2401_v0 = vmov (!%p391_p3), 0   ;;  %vm630_vm0 = vcmask (!%p391_p3), 64512   ;;  %vm697_vm4 = vcmask (!%p391_p3), 57344   ;;  %s2402_s15 = smov (!%p391_p3), 120   ;;  %vm748_vm5 = vcmask (!%p391_p3), 1043456  }
   0x7   : > { %394 = sbr.rel (%p391_p3) target bundleno = 1549 (0x60d), region = 56  ;;  %2279 = vset.pattern.permute.xlu0 (!%p391_p3), %v2401_v0  ;;  %2280 = vset.pattern.permute.xlu1 (!%p391_p3), %v2401_v0  ;;  %s2403_s16 = smov (!%p391_p3), 112   ;;  %vm2405_vm6 = vmmov (!%p391_p3), 0   ;;  %vm864_vm7 = vcmask (!%p391_p3), 130048   ;;  %vm1788_vm9 = vcmask (!%p391_p3), 195584   ;;  %vm1823_vm10 = vcmask (!%p391_p3), 253952  }
   0x8   : > { %s2406_s18 = smov (!%p391_p3), 104   ;;  %vm1824_vm11 = vsmask.f32 (!%p391_p3), 256  ;;  %vm1820_vm13 = vcmask (!%p391_p3), 257024   ;;  %vm1844_vm14 = vsmask.f32 (!%p391_p3), 7938 }
   0x9   : > { %vm2906_vm12 = vmand (!%p391_p3), %vm1823_vm10, %vm1824_vm11 }
   0xa   : > { %vm1845_vm15 = vmand (!%p391_p3), %vm1820_vm13, %vm1844_vm14 }
   0xe   : > { %s2964_s30 = smov (!%p472_p4, %s2391_s30), 1 }
   0xf   : > { %s2481_s13 = sshll.u32 %s2964_s30, 4  ;;  %s2245_s14 = smul.u32 24, %s2964_s30 }
  0x10   : > { %s2488_s17 = scalar_lea.vmem %s2948_s1, %s2481_s13  ;;  %s2494_s20 = scalar_lea.vmem %s2947_s0, %s2481_s13 }
  0x11   : > { %v2301_v1 = vld [vmem:[%s2488_s17 + $0x8] sm:$0x1f]   ;;  %s509_s23 = scalar_lea.vmem %s2952_s5, %s2245_s14  ;;  %v592_v2 = vld [vmem:[%s2494_s20] sm:$0xf]  ;;  %v593_v3 = vld [vmem:[%s2494_s20 + $0x4] sm:$0xf]  ;;  %s512_s26 = scalar_lea.vmem %s2953_s6, %s2964_s30 }
  0x12   : > { %v624_v4 = vshrl.u32 %v2301_v1, 16  ;;  %v626_v5 = vshll.u32 %v2301_v1, 16  ;;  %v595_v6 = vmul.bf16 1052065461, %v592_v2  ;;  %v596_v7 = vmul.bf16 1052065461, %v593_v3  ;;  %s2559_s29 = scalar_lea.vmem %s2949_s2, %s2481_s13  ;;  %s500_s24 = scalar_lea.vmem %s2950_s3, %s2245_s14 }
  0x13   : > { %v546_v8 = vld [vmem:[%s509_s23] sm:$0xff]  ;;  %v594_v11 = vld [vmem:[%s2494_s20 + $0x8] sm:$0x1]  ;;  %v548_v13 = vld [vmem:[%s509_s23 + $0x10] sm:$0x1]  ;;  %v2404_v2 = vmov 0.0   ;;  %s2901_s19 = scalar_lea.vmem %s2956_s9, %s2481_s13 }
  0x14   : > { %v628_v9 = vrot.slane %v626_v5, 1  ;;  %v2504_v10 = vcombine.low %v595_v6, %v596_v7  ;;  %552 = vperm.xlu0 %2279, %v546_v8   ;;  %v547_v12 = vld [vmem:[%s509_s23 + $0x8] sm:$0xff]  ;;  %562 = vperm.xlu1 %2280, %v548_v13   ;;  %v597_v16 = vmul.bf16 1052065461, %v594_v11  ;;  %v2054_v19 = vld [vmem:[%s512_s26] ss:$0 sm:$0xff]  ;;  %s519_s26 = scalar_lea.vmem %s2955_s8, %s2964_s30 }
  0x15   : > { %v598_v50 = vld [vmem:[%s2494_s20 + $0x8] sm:$0xf]  ;;  %v599_v51 = vld [vmem:[%s2494_s20 + $0xc] sm:$0x1]  ;;  %v2567_v58 = vld [vmem:[%s2488_s17] sm:$0xff]   ;;  %s2049_s17 = sshll.u32 %s2964_s30, 3 }
  0x16   : > { %v2507_v14 = vor.u32 %v628_v9, %v624_v4  ;;  %2143 = vmatprep.mubr.msk.bf16.mxu0 %vm630_vm0, %v2504_v10  ;;  %v2515_v17 = vcombine.low %v597_v16, %v597_v16  ;;  %v600_v52 = vmul.bf16 1052065461, %v598_v50  ;;  %v601_v53 = vmul.bf16 1052065461, %v599_v51  ;;  %v2303_v55 = vld [vmem:[%s2559_s29 + $0x8] sm:$0x1f]   ;;  %s516_s21 = scalar_lea.vmem %s2954_s7, %s2049_s17 }
  0x17   : > { %v738_v57 = vshll.u32 %v2303_v55, 16  ;;  %v736_v59 = vshrl.u32 %v2303_v55, 16  ;;  %v577_v3 = vld [vmem:[%s516_s21] sm:$0xff]  ;;  %v531_v5 = vld [vmem:[%s500_s24 + $0x8] sm:$0xff]  ;;  %v532_v8 = vld [vmem:[%s500_s24 + $0x10] sm:$0x1] }
  0x18   : > { %2237 = vmatprep.subr.msk.bf16.mxu0 %vm630_vm0, %v2507_v14  ;;  %v638_v15 = vsel %vm630_vm0, %v2507_v14, 0  ;;  %557 = vperm.xlu0 %2279, %v547_v12   ;;  %v2064_v54 = vcombine.low %v600_v52, %v601_v53  ;;  %v530_v4 = vld [vmem:[%s500_s24] sm:$0xff]  ;;  %v534_v7 = vmul.f32 -0.055555556, %v531_v5  ;;  %s2407_s30 = smov 8  }
  0x19   : > { %2142 = vmatpush3.bf16.xpose.msra.mxu0 %v638_v15  ;;  %v740_v60 = vrot.slane %v738_v57, 1  ;;  %v533_v6 = vmul.f32 -0.055555556, %v530_v4 }
  0x1a   : > { %v808_v56 = vshll.u32 %v2064_v54, 16  ;;  %v806_v61 = vshrl.u32 %v2064_v54, 16  ;;  %2159 = vmatprep.subr.bf16.mxu0 %v2404_v2  ;;  %v538_v11 = vmul.f32 1.442695, %v534_v7 }
  0x1b   : > { %v2569_v63 = vor.u32 %v740_v60, %v736_v59  ;;  %v536_v9 = vmul.f32 1.442695, %v533_v6 }
  0x1c   : > { %v810_v62 = vrot.slane %v808_v56, 1  ;;  %v2055_v56 = vld [vmem:[%s519_s26] ss:$0 sm:$0xff] }
  0x1d   : > { %2238 = vmatprep.subr.msk.bf16.mxu1 %vm748_vm5, %v2569_v63  ;;  %v750_v0 = vsel %vm748_vm5, %v2569_v63, 0 }
  0x1e   : > { %v2579_v1 = vor.u32 %v810_v62, %v806_v61  ;;  %2148 = vmatpush3.bf16.msra.mxu1 %v750_v0 }
  0x1f   : > { %2153 = vmatprep.subr.bf16.mxu1 %v2404_v2 }
  0x20   : > { %2144 = vmatmul.mubr.msk.bf16.vlgmr.msra.gmra.mrb[0].mxu0 %vm630_vm0, %v2515_v17 }
  0x21   : > { %2161 = vmatprep.mubr.msk.bf16.mxu0 %vm2405_vm6, %v2404_v2 }
  0x93   : > { %v553_v18 = vpop.permute.xlu0 %552  ;;  %v563_v21 = vpop.permute.xlu1 %562 }
  0x94   : > { %v2523_v22 = vmul.f32 %v2054_v19, %v553_v18  ;;  %v2527_v24 = vmul.f32 %v2054_v19, %v563_v21 }
  0x96   : > { %vm574_vm1 = vcmp.ge.f32.partialorder %v2523_v22, 0.5  ;;  %vm576_vm3 = vcmp.ge.f32.partialorder %v2527_v24, 0.5 }
  0x97   : > { %v558_v20 = vpop.permute.xlu0 %557 }
  0x98   : > { %v2525_v23 = vmul.f32 %v2054_v19, %v558_v20 }
  0x9a   : > { %vm575_vm2 = vcmp.ge.f32.partialorder %v2525_v23, 0.5 }
  0xf3   : > { %v2145_v25 = vpop.f32.mrb[0].mxu0 }
  0xf4   : > { %v674_v26 = vpop.f32.mrb[1].mxu0  ;;  %v690_v33 = vsel %vm576_vm3, %v2145_v25, -1e+09 }
  0xf5   : > { %v688_v27 = vsel %vm574_vm1, %v674_v26, -1e+09  ;;  %v2146_v28 = vpop.f32.mrb[2].mxu0  ;;  %v698_v34 = vsel %vm697_vm4, %v690_v33, -inf }
  0xf6   : > { %v677_v29 = vpop.f32.mrb[3].mxu0  ;;  %v691_v30 = vsel %vm630_vm0, %v688_v27, -inf }
  0xf7   : > { %v689_v31 = vsel %vm575_vm2, %v677_v29, -1e+09  ;;  %692 = vmax.xlane.f32.xlu1 %v691_v30 }
  0xf8   : > { %v694_v32 = vsel %vm630_vm0, %v689_v31, -inf }
  0xf9   : > { %695 = vmax.xlane.f32.xlu0 %v694_v32 }
  0xfd   : > { %699 = vmax.xlane.f32.xlu0 %v698_v34 }
 0x184   : > { %v693_v35 = vpop.xlane.xlu1 %692 }
 0x185   : > { %v701_v36 = vsub.f32 %v688_v27, %v693_v35 }
 0x186   : > { %v696_v37 = vpop.xlane.xlu0 %695 }
 0x187   : > { %v704_v38 = vmul.f32 1.442695, %v701_v36  ;;  %v702_v39 = vsub.f32 %v689_v31, %v696_v37 }
 0x189   : > { %2305 = vpow2.f32 %v704_v38  ;;  %v706_v40 = vmul.f32 1.442695, %v702_v39 }
 0x18a   : > { %v700_v41 = vpop.xlane.xlu0 %699 }
 0x18b   : > { %2307 = vpow2.f32 %v706_v40  ;;  %v703_v42 = vsub.f32 %v690_v33, %v700_v41  ;;  %v821_v33 = vsel %vm630_vm0, %v2567_v58, 0 }
 0x18d   : > { %v708_v43 = vmul.f32 1.442695, %v703_v42 }
 0x18f   : > { %2309 = vpow2.f32 %v708_v43 }
 0x190   : > { %2311 = vpow2.f32 %v536_v9 }
 0x193   : > { %v2541_v44 = vpop.eup %2305 }
 0x194   : > { %v710_v45 = vsel %vm630_vm0, %v2541_v44, 0.0 }
 0x195   : > { %v2545_v46 = vpop.eup %2307  ;;  %711 = vadd.xlane.f32.xlu1 %v710_v45 }
 0x196   : > { %v713_v47 = vsel %vm630_vm0, %v2545_v46, 0.0 }
 0x197   : > { %714 = vadd.xlane.f32.xlu0 %v713_v47 }
 0x199   : > { %v2549_v48 = vpop.eup %2309 }
 0x19a   : > { %v716_v49 = vsel %vm697_vm4, %v2549_v48, 0.0  ;;  %v2618_v16 = vpop.eup %2311 }
 0x19b   : > { %717 = vadd.xlane.f32.xlu1 %v716_v49 }
 0x1ac   : > { %927 = vrot.lane.b32.xlu1 %v2504_v10, %s2402_s15 }
 0x1ad   : > { %931 = vrot.lane.b32.xlu0 %v2507_v14, %s2402_s15 }
 0x1b0   : > { %929 = vrot.lane.b32.xlu1 %v2515_v17, %s2402_s15 }
 0x1b1   : > { %1092 = vrot.lane.b32.xlu0 %v2567_v58, %s2402_s15 }
 0x1b4   : > { %1090 = vrot.lane.b32.xlu1 %v2579_v1, %s2402_s15 }
 0x1b5   : > { %1204 = vrot.lane.b32.xlu0 %v2507_v14, %s2403_s16 }
 0x1b8   : > { %1200 = vrot.lane.b32.xlu1 %v2504_v10, %s2403_s16 }
 0x1b9   : > { %1202 = vrot.lane.b32.xlu0 %v2515_v17, %s2403_s16 }
 0x1bc   : > { %1365 = vrot.lane.b32.xlu1 %v2567_v58, %s2403_s16 }
 0x1bd   : > { %1363 = vrot.lane.b32.xlu0 %v2579_v1, %s2403_s16 }
 0x1c0   : > { %1477 = vrot.lane.b32.xlu1 %v2507_v14, %s2406_s18 }
 0x1c1   : > { %1473 = vrot.lane.b32.xlu0 %v2504_v10, %s2406_s18  ;;  %v535_v10 = vmul.f32 -0.055555556, %v532_v8 }
 0x1c3   : > { %v540_v13 = vmul.f32 1.442695, %v535_v10 }
 0x1c4   : > { %1475 = vrot.lane.b32.xlu1 %v2515_v17, %s2406_s18 }
 0x1c5   : > { %1638 = vrot.lane.b32.xlu0 %v2567_v58, %s2406_s18 }
 0x1c8   : > { %1636 = vrot.lane.b32.xlu1 %v2579_v1, %s2406_s18 }
 0x1c9   : > { %581 = vperm.xlu0 %2279, %v577_v3  }
 0x222   : > { %v712_v12 = vpop.xlane.xlu1 %711 }
 0x223   : > { %2313 = vrcp.f32 %v712_v12 }
 0x224   : > { %2315 = vpow2.f32 %v538_v11  ;;  %v715_v14 = vpop.xlane.xlu0 %714 }
 0x225   : > { %2317 = vrcp.f32 %v715_v14 }
 0x226   : > { %2319 = vpow2.f32 %v540_v13 }
 0x228   : > { %v718_v15 = vpop.xlane.xlu1 %717  ;;  %v932_v34 = vpop.permute.xlu0 %931 }
 0x229   : > { %2321 = vrcp.f32 %v718_v15  ;;  %v940_v36 = vsel %vm630_vm0, %v932_v34, 0 }
 0x22c   : > { %v928_v35 = vpop.permute.xlu1 %927  ;;  %v1093_v37 = vpop.permute.xlu0 %1092 }
 0x22d   : > { %v2314_v17 = vpop.eup %2313  ;;  %v1098_v39 = vsel %vm630_vm0, %v1093_v37, 0 }
 0x22e   : > { %v2620_v18 = vpop.eup %2315  ;;  %v722_v19 = vmul.f32 %v2314_v17, %v2541_v44 }
 0x22f   : > { %v2318_v20 = vpop.eup %2317 }
 0x230   : > { %v723_v21 = vmul.f32 %v2318_v20, %v2545_v46  ;;  %v2624_v25 = vpop.eup %2319  ;;  %v725_v26 = vmul.f32 %v2618_v16, %v722_v19  ;;  %v930_v38 = vpop.permute.xlu1 %929 }
 0x231   : > { %v1205_v41 = vpop.permute.xlu0 %1204 }
 0x232   : > { %v726_v27 = vmul.f32 %v2620_v18, %v723_v21  ;;  %v1213_v43 = vsel %vm630_vm0, %v1205_v41, 0 }
 0x233   : > { %v2322_v28 = vpop.eup %2321 }
 0x234   : > { %v728_v29 = vpack.c.bf16 %v726_v27, %v725_v26  ;;  %v724_v30 = vmul.f32 %v2322_v28, %v2549_v48  ;;  %v1091_v40 = vpop.permute.xlu1 %1090 }
 0x235   : > { %v1203_v44 = vpop.permute.xlu0 %1202 }
 0x236   : > { %2149 = vmatprep.mubr.msk.bf16.mxu1 %vm630_vm0, %v728_v29  ;;  %v727_v31 = vmul.f32 %v2624_v25, %v724_v30 }
 0x238   : > { %v729_v32 = vpack.c.bf16 %v727_v31, %v727_v31  ;;  %v1201_v42 = vpop.permute.xlu1 %1200 }
 0x239   : > { %v1364_v48 = vpop.permute.xlu0 %1363 }
 0x23a   : > { %2150 = vmatmul.mubr.msk.bf16.vlgmr.msra.gmra.mrb[0].mxu1 %vm630_vm0, %v729_v32 }
 0x23b   : > { %2154 = vmatpush3.bf16.xpose.msra.mxu1 %v821_v33  ;;  %2155 = vmatprep.mubr.msk.bf16.mxu1 %vm2405_vm6, %v2404_v2 }
 0x23c   : > { %2239 = vmatprep.subr.msk.bf16.mxu1 %vm630_vm0, %v932_v34  ;;  %v1366_v45 = vpop.permute.xlu1 %1365 }
 0x23d   : > { %v1371_v46 = vsel %vm630_vm0, %v1366_v45, 0  ;;  %v1474_v50 = vpop.permute.xlu0 %1473 }
 0x240   : > { %v1478_v47 = vpop.permute.xlu1 %1477 }
 0x241   : > { %v1486_v49 = vsel %vm630_vm0, %v1478_v47, 0  ;;  %v1639_v51 = vpop.permute.xlu0 %1638 }
 0x242   : > { %2156 = vmatmul.mubr.msk.bf16.vlgmr.msra.gmra.mrb[4].mxu1 %vm630_vm0, %v2579_v1  ;;  %v1644_v53 = vsel %vm630_vm0, %v1639_v51, 0 }
 0x243   : > { %2166 = vmatpush3.bf16.xpose.msra.mxu1 %v940_v36  ;;  %2167 = vmatprep.mubr.msk.bf16.mxu1 %vm630_vm0, %v928_v35 }
 0x244   : > { %2177 = vmatprep.subr.bf16.mxu1 %v2404_v2  ;;  %v1476_v52 = vpop.permute.xlu1 %1475 }
 0x248   : > { %v1637_v54 = vpop.permute.xlu1 %1636  ;;  %v582_v57 = vpop.permute.xlu0 %581 }
 0x249   : > { %v2675_v61 = vmul.f32 %v2055_v56, %v582_v57 }
 0x24a   : > { %2168 = vmatmul.mubr.msk.bf16.vlgmr.msra.gmra.mrb[8].mxu1 %vm630_vm0, %v930_v38 }
 0x24b   : > { %2178 = vmatpush3.bf16.xpose.msra.mxu1 %v1098_v39  ;;  %2179 = vmatprep.mubr.msk.bf16.mxu1 %vm2405_vm6, %v2404_v2  ;;  %vm591_vm8 = vcmp.ge.f32.partialorder %v2675_v61, 0.5 }
 0x24c   : > { %2241 = vmatprep.subr.msk.bf16.mxu1 %vm630_vm0, %v1205_v41 }
 0x252   : > { %2180 = vmatmul.mubr.msk.bf16.vlgmr.msra.gmra.mrb[12].mxu1 %vm630_vm0, %v1091_v40 }
 0x253   : > { %2190 = vmatpush3.bf16.xpose.msra.mxu1 %v1213_v43  ;;  %2191 = vmatprep.mubr.msk.bf16.mxu1 %vm630_vm0, %v1201_v42 }
 0x254   : > { %2201 = vmatprep.subr.bf16.mxu1 %v2404_v2 }
 0x25a   : > { %2192 = vmatmul.mubr.msk.bf16.vlgmr.msra.gmra.mrb[16].mxu1 %vm630_vm0, %v1203_v44 }
 0x25b   : > { %2202 = vmatpush3.bf16.xpose.msra.mxu1 %v1371_v46  ;;  %2203 = vmatprep.mubr.msk.bf16.mxu1 %vm2405_vm6, %v2404_v2 }
 0x25c   : > { %2243 = vmatprep.subr.msk.bf16.mxu1 %vm630_vm0, %v1478_v47 }
 0x262   : > { %2204 = vmatmul.mubr.msk.bf16.vlgmr.msra.gmra.mrb[20].mxu1 %vm630_vm0, %v1364_v48 }
 0x263   : > { %2214 = vmatpush3.bf16.xpose.msra.mxu1 %v1486_v49  ;;  %2215 = vmatprep.mubr.msk.bf16.mxu1 %vm630_vm0, %v1474_v50 }
 0x264   : > { %2225 = vmatprep.subr.bf16.mxu1 %v2404_v2 }
 0x26a   : > { %2216 = vmatmul.mubr.msk.bf16.vlgmr.msra.gmra.mrb[24].mxu1 %vm630_vm0, %v1476_v52 }
 0x26b   : > { %2226 = vmatpush3.bf16.xpose.msra.mxu1 %v1644_v53  ;;  %2227 = vmatprep.mubr.msk.bf16.mxu1 %vm2405_vm6, %v2404_v2 }
 0x272   : > { %2228 = vmatmul.mubr.msk.bf16.vlgmr.msra.gmra.mrb[28].mxu1 %vm630_vm0, %v1637_v54 }
 0x30d   : > { %v2669_v55 = vpop.f32.mrb[0].mxu1 }
 0x30e   : > { %v2671_v58 = vpop.f32.mrb[1].mxu1 }
 0x30f   : > { %v2152_v59 = vpop.f32.mrb[2].mxu1 }
 0x310   : > { %v2673_v60 = vpop.f32.mrb[3].mxu1  ;;  %v2757_v59 = vld [vmem:[%s2559_s29] sm:$0xff]   ;;  %s504_s29 = scalar_lea.vmem %s2951_s4, %s2049_s17 }
 0x311   : > { %2160 = vmatpush3.bf16.msra.mxu0 %v2757_v59 }
 0x315   : > { %v857_v62 = vpop.f32.mrb[4].mxu1 }
 0x316   : > { %v2680_v0 = vsel %vm591_vm8, %v857_v62, -1e+09  ;;  %v2157_v1 = vpop.f32.mrb[5].mxu1 }
 0x317   : > { %v860_v3 = vpop.f32.mrb[6].mxu1  ;;  %v865_v4 = vsel %vm864_vm7, %v2680_v0, -inf }
 0x318   : > { %v2158_v5 = vpop.f32.mrb[7].mxu1  ;;  %866 = vmax.xlane.f32.xlu1 %v865_v4 }
 0x31d   : > { %v2169_v6 = vpop.f32.mrb[8].mxu1 }
 0x31e   : > { %v2686_v7 = vsel %vm576_vm3, %v2169_v6, -1e+09  ;;  %v976_v8 = vpop.f32.mrb[9].mxu1 }
 0x31f   : > { %v2690_v9 = vsel %vm574_vm1, %v976_v8, -1e+09  ;;  %v2170_v10 = vpop.f32.mrb[10].mxu1  ;;  %v999_v11 = vsel %vm697_vm4, %v2686_v7, -inf }
 0x320   : > { %v979_v12 = vpop.f32.mrb[11].mxu1  ;;  %1000 = vmax.xlane.f32.xlu1 %v999_v11  ;;  %v993_v13 = vsel %vm630_vm0, %v2690_v9, -inf }
 0x321   : > { %v2698_v14 = vsel %vm575_vm2, %v979_v12, -1e+09  ;;  %994 = vmax.xlane.f32.xlu0 %v993_v13 }
 0x322   : > { %v996_v15 = vsel %vm630_vm0, %v2698_v14, -inf }
 0x325   : > { %997 = vmax.xlane.f32.xlu0 %v996_v15  ;;  %v1134_v17 = vpop.f32.mrb[12].mxu1 }
 0x326   : > { %v2704_v19 = vsel %vm591_vm8, %v1134_v17, -1e+09  ;;  %v2181_v20 = vpop.f32.mrb[13].mxu1 }
 0x327   : > { %v1137_v21 = vpop.f32.mrb[14].mxu1  ;;  %v1141_v26 = vsel %vm864_vm7, %v2704_v19, -inf }
 0x328   : > { %v2182_v27 = vpop.f32.mrb[15].mxu1 }
 0x329   : > { %1142 = vmax.xlane.f32.xlu0 %v1141_v26 }
 0x32d   : > { %v2193_v28 = vpop.f32.mrb[16].mxu1 }
 0x32e   : > { %v1249_v29 = vpop.f32.mrb[17].mxu1  ;;  %v2716_v34 = vsel %vm576_vm3, %v2193_v28, -1e+09 }
 0x32f   : > { %v2710_v30 = vsel %vm574_vm1, %v1249_v29, -1e+09  ;;  %v2194_v31 = vpop.f32.mrb[18].mxu1  ;;  %v1272_v37 = vsel %vm697_vm4, %v2716_v34, -inf }
 0x330   : > { %v1252_v32 = vpop.f32.mrb[19].mxu1  ;;  %v1266_v33 = vsel %vm630_vm0, %v2710_v30, -inf }
 0x331   : > { %v2720_v35 = vsel %vm575_vm2, %v1252_v32, -1e+09  ;;  %1267 = vmax.xlane.f32.xlu1 %v1266_v33 }
 0x332   : > { %v1269_v36 = vsel %vm630_vm0, %v2720_v35, -inf }
 0x333   : > { %1270 = vmax.xlane.f32.xlu0 %v1269_v36 }
 0x335   : > { %v1407_v38 = vpop.f32.mrb[20].mxu1  ;;  %1273 = vmax.xlane.f32.xlu1 %v1272_v37 }
 0x336   : > { %v2728_v39 = vsel %vm591_vm8, %v1407_v38, -1e+09  ;;  %v2205_v40 = vpop.f32.mrb[21].mxu1 }
 0x337   : > { %v1414_v41 = vsel %vm864_vm7, %v2728_v39, -inf  ;;  %v1410_v42 = vpop.f32.mrb[22].mxu1 }
 0x338   : > { %1415 = vmax.xlane.f32.xlu0 %v1414_v41  ;;  %v2206_v43 = vpop.f32.mrb[23].mxu1 }
 0x33d   : > { %v2217_v44 = vpop.f32.mrb[24].mxu1 }
 0x33e   : > { %v1522_v45 = vpop.f32.mrb[25].mxu1  ;;  %v2740_v50 = vsel %vm576_vm3, %v2217_v44, -1e+09 }
 0x33f   : > { %v2734_v46 = vsel %vm574_vm1, %v1522_v45, -1e+09  ;;  %v2218_v47 = vpop.f32.mrb[26].mxu1  ;;  %v1545_v52 = vsel %vm697_vm4, %v2740_v50, -inf }
 0x340   : > { %v1525_v48 = vpop.f32.mrb[27].mxu1  ;;  %v1539_v49 = vsel %vm630_vm0, %v2734_v46, -inf }
 0x341   : > { %v2744_v51 = vsel %vm575_vm2, %v1525_v48, -1e+09  ;;  %1540 = vmax.xlane.f32.xlu1 %v1539_v49 }
 0x342   : > { %v1542_v22 = vsel %vm630_vm0, %v2744_v51, -inf }
 0x343   : > { %1543 = vmax.xlane.f32.xlu0 %v1542_v22 }
 0x345   : > { %v1680_v53 = vpop.f32.mrb[28].mxu1  ;;  %1546 = vmax.xlane.f32.xlu1 %v1545_v52 }
 0x346   : > { %v2752_v54 = vsel %vm591_vm8, %v1680_v53, -1e+09  ;;  %v2229_v24 = vpop.f32.mrb[29].mxu1 }
 0x347   : > { %v1687_v23 = vsel %vm864_vm7, %v2752_v54, -inf  ;;  %v1683_v56 = vpop.f32.mrb[30].mxu1 }
 0x348   : > { %1688 = vmax.xlane.f32.xlu0 %v1687_v23  ;;  %v2230_v57 = vpop.f32.mrb[31].mxu1 }
 0x3a5   : > { %v867_v62 = vpop.xlane.xlu1 %866 }
 0x3a6   : > { %v868_v1 = vsub.f32 %v2680_v0, %v867_v62 }
 0x3a8   : > { %v869_v3 = vmul.f32 1.442695, %v868_v1 }
 0x3aa   : > { %2323 = vpow2.f32 %v869_v3 }
 0x3ad   : > { %v1001_v4 = vpop.xlane.xlu1 %1000 }
 0x3ae   : > { %v1004_v61 = vsub.f32 %v2686_v7, %v1001_v4  ;;  %v995_v5 = vpop.xlane.xlu0 %994 }
 0x3af   : > { %v1002_v6 = vsub.f32 %v2690_v9, %v995_v5 }
 0x3b0   : > { %v1009_v8 = vmul.f32 1.442695, %v1004_v61 }
 0x3b1   : > { %v1005_v10 = vmul.f32 1.442695, %v1002_v6 }
 0x3b2   : > { %2325 = vpow2.f32 %v1009_v8  ;;  %v998_v11 = vpop.xlane.xlu0 %997 }
 0x3b3   : > { %v1003_v12 = vsub.f32 %v2698_v14, %v998_v11  ;;  %2327 = vpow2.f32 %v1005_v10 }
 0x3b4   : > { %v2764_v13 = vpop.eup %2323 }
 0x3b5   : > { %v1007_v15 = vmul.f32 1.442695, %v1003_v12  ;;  %v871_v0 = vsel %vm864_vm7, %v2764_v13, 0.0  ;;  %v542_v12 = vld [vmem:[%s504_s29] sm:$0xff] }
 0x3b6   : > { %872 = vadd.xlane.f32.xlu1 %v871_v0  ;;  %v1143_v17 = vpop.xlane.xlu0 %1142 }
 0x3b7   : > { %2329 = vpow2.f32 %v1007_v15  ;;  %v1144_v7 = vsub.f32 %v2704_v19, %v1143_v17  ;;  %v543_v15 = vmul.f32 -0.055555556, %v542_v12 }
 0x3b9   : > { %v1145_v20 = vmul.f32 1.442695, %v1144_v7  ;;  %v544_v0 = vmul.f32 1.442695, %v543_v15 }
 0x3bb   : > { %2331 = vpow2.f32 %v1145_v20 }
 0x3bc   : > { %v2769_v9 = vpop.eup %2325 }
 0x3bd   : > { %v1017_v21 = vsel %vm697_vm4, %v2769_v9, 0.0  ;;  %v2773_v14 = vpop.eup %2327 }
 0x3be   : > { %1018 = vadd.xlane.f32.xlu0 %v1017_v21  ;;  %v1268_v26 = vpop.xlane.xlu1 %1267  ;;  %v1011_v29 = vsel %vm630_vm0, %v2773_v14, 0.0 }
 0x3bf   : > { %v1275_v28 = vsub.f32 %v2710_v30, %v1268_v26 }
 0x3c0   : > { %v1271_v42 = vpop.xlane.xlu0 %1270 }
 0x3c1   : > { %v2775_v27 = vpop.eup %2329  ;;  %v1278_v36 = vmul.f32 1.442695, %v1275_v28  ;;  %v1276_v44 = vsub.f32 %v2720_v35, %v1271_v42 }
 0x3c2   : > { %v1274_v31 = vpop.xlane.xlu1 %1273  ;;  %1012 = vadd.xlane.f32.xlu0 %v1011_v29  ;;  %v1014_v19 = vsel %vm630_vm0, %v2775_v27, 0.0 }
 0x3c3   : > { %v1277_v32 = vsub.f32 %v2716_v34, %v1274_v31  ;;  %1015 = vadd.xlane.f32.xlu1 %v1014_v19  ;;  %v1280_v47 = vmul.f32 1.442695, %v1276_v44 }
 0x3c5   : > { %v2783_v33 = vpop.eup %2331  ;;  %v1282_v37 = vmul.f32 1.442695, %v1277_v32  ;;  %v1416_v45 = vpop.xlane.xlu0 %1415 }
 0x3c6   : > { %v1147_v38 = vsel %vm864_vm7, %v2783_v33, 0.0  ;;  %v1417_v48 = vsub.f32 %v2728_v39, %v1416_v45 }
 0x3c7   : > { %2333 = vpow2.f32 %v1282_v37  ;;  %1148 = vadd.xlane.f32.xlu1 %v1147_v38 }
 0x3c8   : > { %2335 = vpow2.f32 %v1278_v36  ;;  %v1418_v52 = vmul.f32 1.442695, %v1417_v48 }
 0x3c9   : > { %2337 = vpow2.f32 %v1280_v47 }
 0x3ca   : > { %2339 = vpow2.f32 %v1418_v52 }
 0x3ce   : > { %v1541_v43 = vpop.xlane.xlu1 %1540 }
 0x3cf   : > { %v1548_v24 = vsub.f32 %v2734_v46, %v1541_v43 }
 0x3d0   : > { %v1544_v22 = vpop.xlane.xlu0 %1543 }
 0x3d1   : > { %v2787_v30 = vpop.eup %2333  ;;  %v1549_v35 = vsub.f32 %v2744_v51, %v1544_v22  ;;  %v1551_v57 = vmul.f32 1.442695, %v1548_v24 }
 0x3d2   : > { %v1290_v40 = vsel %vm697_vm4, %v2787_v30, 0.0  ;;  %v2791_v41 = vpop.eup %2335  ;;  %v1547_v49 = vpop.xlane.xlu1 %1546 }
 0x3d3   : > { %1291 = vadd.xlane.f32.xlu0 %v1290_v40  ;;  %v1284_v34 = vsel %vm630_vm0, %v2791_v41, 0.0  ;;  %v1550_v53 = vsub.f32 %v2740_v50, %v1547_v49  ;;  %v2805_v62 = vpop.eup %2337  ;;  %v1553_v1 = vmul.f32 1.442695, %v1549_v35 }
 0x3d4   : > { %v1287_v4 = vsel %vm630_vm0, %v2805_v62, 0.0  ;;  %v2809_v50 = vpop.eup %2339 }
 0x3d5   : > { %v1555_v23 = vmul.f32 1.442695, %v1550_v53  ;;  %v1689_v56 = vpop.xlane.xlu0 %1688  ;;  %v1420_v46 = vsel %vm864_vm7, %v2809_v50, 0.0 }
 0x3d6   : > { %v1690_v39 = vsub.f32 %v2752_v54, %v1689_v56 }
 0x3d7   : > { %1285 = vadd.xlane.f32.xlu0 %v1284_v34  ;;  %2341 = vpow2.f32 %v1555_v23 }
 0x3d8   : > { %1154 = vrot.lane.b32.xlu1 %v2757_v59, %s2402_s15  ;;  %2343 = vpow2.f32 %v1551_v57  ;;  %v1691_v3 = vmul.f32 1.442695, %v1690_v39 }
 0x3d9   : > { %2345 = vpow2.f32 %v1553_v1 }
 0x3da   : > { %2347 = vpow2.f32 %v1691_v3 }
 0x3db   : > { %2349 = vpow2.f32 %v544_v0 }
 0x3e1   : > { %v2813_v51 = vpop.eup %2341 }
 0x3e2   : > { %v1563_v54 = vsel %vm697_vm4, %v2813_v51, 0.0  ;;  %v2817_v61 = vpop.eup %2343 }
 0x3e3   : > { %v2819_v5 = vpop.eup %2345  ;;  %v1557_v6 = vsel %vm630_vm0, %v2817_v61, 0.0 }
 0x3e4   : > { %v2823_v8 = vpop.eup %2347  ;;  %v1560_v10 = vsel %vm630_vm0, %v2819_v5, 0.0 }
 0x3e5   : > { %v1693_v11 = vsel %vm864_vm7, %v2823_v8, 0.0  ;;  %v2842_v20 = vpop.eup %2349 }
 0x3ed   : > { %1031 = vrot.lane.b32.xlu0 %v2569_v63, %s2402_s15  ;;  %s2408_s15 = smov 16  }
 0x3fc   : > { %1288 = vadd.xlane.f32.xlu1 %v1287_v4 }
 0x400   : > { %1421 = vadd.xlane.f32.xlu1 %v1420_v46 }
 0x404   : > { %1564 = vadd.xlane.f32.xlu1 %v1563_v54 }
 0x408   : > { %1558 = vadd.xlane.f32.xlu1 %v1557_v6 }
 0x40c   : > { %1561 = vadd.xlane.f32.xlu1 %v1560_v10  ;;  %1694 = vadd.xlane.f32.xlu0 %v1693_v11 }
 0x41d   : > { %1304 = vrot.lane.b32.xlu1 %v2569_v63, %s2403_s16 }
 0x421   : > { %1427 = vrot.lane.b32.xlu1 %v2757_v59, %s2403_s16  ;;  %s2409_s16 = smov 24  }
 0x425   : > { %1577 = vrot.lane.b32.xlu1 %v2569_v63, %s2406_s18 }
 0x429   : > { %1700 = vrot.lane.b32.xlu1 %v2757_v59, %s2406_s18 }
 0x443   : > { %v873_v17 = vpop.xlane.xlu1 %872 }
 0x444   : > { %2351 = vrcp.f32 %v873_v17 }
 0x44b   : > { %v1019_v7 = vpop.xlane.xlu0 %1018 }
 0x44e   : > { %v2352_v21 = vpop.eup %2351 }
 0x44f   : > { %v875_v63 = vmul.f32 %v2352_v21, %v2764_v13  ;;  %v1013_v26 = vpop.xlane.xlu0 %1012 }
 0x450   : > { %2353 = vrcp.f32 %v1013_v26  ;;  %v1016_v59 = vpop.xlane.xlu1 %1015 }
 0x451   : > { %2355 = vrcp.f32 %v1016_v59  ;;  %v876_v28 = vmul.f32 %v2842_v20, %v875_v63 }
 0x452   : > { %2357 = vrcp.f32 %v1019_v7 }
 0x453   : > { %v877_v29 = vpack.c.bf16 %v876_v28, %v876_v28 }
 0x454   : > { %v1149_v32 = vpop.xlane.xlu1 %1148 }
 0x455   : > { %2162 = vmatmul.mubr.msk.bf16.vlgmr.msra.gmra.mrb[4].mxu0 %vm864_vm7, %v877_v29  ;;  %2359 = vrcp.f32 %v1149_v32 }
 0x458   : > { %v1155_v22 = vpop.permute.xlu1 %1154 }
 0x45a   : > { %v2354_v31 = vpop.eup %2353 }
 0x45b   : > { %v2356_v19 = vpop.eup %2355  ;;  %v1023_v36 = vmul.f32 %v2354_v31, %v2773_v14 }
 0x45c   : > { %v1024_v37 = vmul.f32 %v2356_v19, %v2775_v27  ;;  %v2358_v40 = vpop.eup %2357 }
 0x45d   : > { %v1026_v38 = vmul.f32 %v2618_v16, %v1023_v36  ;;  %v1025_v43 = vmul.f32 %v2358_v40, %v2769_v9 }
 0x45e   : > { %v1027_v13 = vmul.f32 %v2620_v18, %v1024_v37 }
 0x45f   : > { %v1028_v45 = vmul.f32 %v2624_v25, %v1025_v43  ;;  %v2360_v47 = vpop.eup %2359 }
 0x460   : > { %v1292_v34 = vpop.xlane.xlu0 %1291  ;;  %v1029_v42 = vpack.c.bf16 %v1027_v13, %v1026_v38  ;;  %v1151_v27 = vmul.f32 %v2360_v47, %v2783_v33 }
 0x461   : > { %v1030_v49 = vpack.c.bf16 %v1028_v45, %v1028_v45 }
 0x462   : > { %2173 = vmatprep.mubr.msk.bf16.mxu0 %vm630_vm0, %v1029_v42  ;;  %v1152_v9 = vmul.f32 %v2842_v20, %v1151_v27 }
 0x464   : > { %v1286_v44 = vpop.xlane.xlu0 %1285  ;;  %v1153_v52 = vpack.c.bf16 %v1152_v9, %v1152_v9 }
 0x465   : > { %2361 = vrcp.f32 %v1286_v44 }
 0x468   : > { %v1032_v48 = vpop.permute.xlu0 %1031 }
 0x469   : > { %v1040_v14 = vsel %vm748_vm5, %v1032_v48, 0  ;;  %2240 = vmatprep.subr.msk.bf16.mxu0 %vm748_vm5, %v1032_v48 }
 0x46a   : > { %2172 = vmatpush3.bf16.msra.mxu0 %v1040_v14 }
 0x46b   : > { %2183 = vmatprep.subr.bf16.mxu0 %v2404_v2 }
 0x46d   : > { %2174 = vmatmul.mubr.msk.bf16.vlgmr.msra.gmra.mrb[8].mxu0 %vm630_vm0, %v1030_v49 }
 0x46e   : > { %2184 = vmatpush3.bf16.msra.mxu0 %v1155_v22  ;;  %2185 = vmatprep.mubr.msk.bf16.mxu0 %vm2405_vm6, %v2404_v2 }
 0x46f   : > { %v2362_v24 = vpop.eup %2361 }
 0x470   : > { %v1296_v56 = vmul.f32 %v2362_v24, %v2791_v41 }
 0x472   : > { %v1299_v3 = vmul.f32 %v2618_v16, %v1296_v56 }
 0x475   : > { %2186 = vmatmul.mubr.msk.bf16.vlgmr.msra.gmra.mrb[12].mxu0 %vm864_vm7, %v1153_v52 }
 0x489   : > { %v1289_v53 = vpop.xlane.xlu1 %1288 }
 0x48a   : > { %2363 = vrcp.f32 %v1289_v53 }
 0x48b   : > { %2365 = vrcp.f32 %v1292_v34 }
 0x48d   : > { %v1422_v33 = vpop.xlane.xlu1 %1421 }
 0x48e   : > { %2367 = vrcp.f32 %v1422_v33 }
 0x491   : > { %v1565_v23 = vpop.xlane.xlu1 %1564 }
 0x494   : > { %v2364_v35 = vpop.eup %2363 }
 0x495   : > { %v2366_v57 = vpop.eup %2365  ;;  %v1559_v39 = vpop.xlane.xlu1 %1558  ;;  %v1297_v1 = vmul.f32 %v2364_v35, %v2805_v62 }
 0x496   : > { %2369 = vrcp.f32 %v1559_v39  ;;  %v1298_v46 = vmul.f32 %v2366_v57, %v2787_v30 }
 0x497   : > { %v1300_v4 = vmul.f32 %v2620_v18, %v1297_v1 }
 0x498   : > { %v1301_v41 = vmul.f32 %v2624_v25, %v1298_v46  ;;  %v2368_v10 = vpop.eup %2367 }
 0x499   : > { %v1562_v54 = vpop.xlane.xlu1 %1561  ;;  %v1302_v6 = vpack.c.bf16 %v1300_v4, %v1299_v3  ;;  %v1424_v15 = vmul.f32 %v2368_v10, %v2809_v50  ;;  %v1695_v0 = vpop.xlane.xlu0 %1694 }
 0x49a   : > { %2371 = vrcp.f32 %v1562_v54  ;;  %v1303_v30 = vpack.c.bf16 %v1301_v41, %v1301_v41 }
 0x49b   : > { %2373 = vrcp.f32 %v1565_v23  ;;  %2197 = vmatprep.mubr.msk.bf16.mxu0 %vm630_vm0, %v1302_v6  ;;  %v1425_v63 = vmul.f32 %v2842_v20, %v1424_v15 }
 0x49c   : > { %2375 = vrcp.f32 %v1695_v0 }
 0x49d   : > { %v1305_v11 = vpop.permute.xlu1 %1304  ;;  %v1426_v19 = vpack.c.bf16 %v1425_v63, %v1425_v63 }
 0x49e   : > { %v1313_v12 = vsel %vm748_vm5, %v1305_v11, 0  ;;  %2242 = vmatprep.subr.msk.bf16.mxu0 %vm748_vm5, %v1305_v11 }
 0x49f   : > { %2196 = vmatpush3.bf16.msra.mxu0 %v1313_v12 }
 0x4a0   : > { %v2370_v62 = vpop.eup %2369  ;;  %2207 = vmatprep.subr.bf16.mxu0 %v2404_v2 }
 0x4a1   : > { %v1428_v17 = vpop.permute.xlu1 %1427  ;;  %v1569_v7 = vmul.f32 %v2370_v62, %v2817_v61 }
 0x4a2   : > { %2198 = vmatmul.mubr.msk.bf16.vlgmr.msra.gmra.mrb[16].mxu0 %vm630_vm0, %v1303_v30 }
 0x4a3   : > { %2208 = vmatpush3.bf16.msra.mxu0 %v1428_v17  ;;  %2209 = vmatprep.mubr.msk.bf16.mxu0 %vm2405_vm6, %v2404_v2  ;;  %v1572_v28 = vmul.f32 %v2618_v16, %v1569_v7  ;;  %v1826_v7 = vld [vmem:[%s2901_s19 + $0x8] sm:$0x1] }
 0x4a4   : > { %v2372_v21 = vpop.eup %2371 }
 0x4a5   : > { %v2374_v26 = vpop.eup %2373  ;;  %v1570_v50 = vmul.f32 %v2372_v21, %v2819_v5  ;;  %v1578_v59 = vpop.permute.xlu1 %1577 }
 0x4a6   : > { %2244 = vmatprep.subr.msk.bf16.mxu0 %vm748_vm5, %v1578_v59  ;;  %v1571_v31 = vmul.f32 %v2374_v26, %v2813_v51  ;;  %v1586_v32 = vsel %vm748_vm5, %v1578_v59, 0  ;;  %v2376_v5 = vpop.eup %2375 }
 0x4a7   : > { %v1573_v29 = vmul.f32 %v2620_v18, %v1570_v50  ;;  %v1697_v16 = vmul.f32 %v2376_v5, %v2823_v8 }
 0x4a8   : > { %v1574_v61 = vmul.f32 %v2624_v25, %v1571_v31 }
 0x4a9   : > { %v1575_v36 = vpack.c.bf16 %v1573_v29, %v1572_v28  ;;  %v1701_v18 = vpop.permute.xlu1 %1700  ;;  %v1698_v51 = vmul.f32 %v2842_v20, %v1697_v16 }
 0x4aa   : > { %2210 = vmatmul.mubr.msk.bf16.vlgmr.msra.gmra.mrb[20].mxu0 %vm864_vm7, %v1426_v19  ;;  %v1576_v37 = vpack.c.bf16 %v1574_v61, %v1574_v61 }
 0x4ab   : > { %2221 = vmatprep.mubr.msk.bf16.mxu0 %vm630_vm0, %v1575_v36  ;;  %2220 = vmatpush3.bf16.msra.mxu0 %v1586_v32  ;;  %v1699_v38 = vpack.c.bf16 %v1698_v51, %v1698_v51 }
 0x4ac   : > { %2231 = vmatprep.subr.bf16.mxu0 %v2404_v2 }
 0x4b2   : > { %2222 = vmatmul.mubr.msk.bf16.vlgmr.msra.gmra.mrb[24].mxu0 %vm630_vm0, %v1576_v37 }
 0x4b3   : > { %2232 = vmatpush3.bf16.msra.mxu0 %v1701_v18  ;;  %2233 = vmatprep.mubr.msk.bf16.mxu0 %vm2405_vm6, %v2404_v2 }
 0x4ba   : > { %2234 = vmatmul.mubr.msk.bf16.vlgmr.msra.gmra.mrb[28].mxu0 %vm864_vm7, %v1699_v38 }
 0x528   : > { %v2895_v13 = vpop.f32.mrb[4].mxu0 }
 0x529   : > { %v2163_v25 = vpop.f32.mrb[5].mxu0 }
 0x52a   : > { %v924_v40 = vpop.f32.mrb[6].mxu0 }
 0x52b   : > { %v2164_v34 = vpop.f32.mrb[7].mxu0 }
 0x540   : > { %v2175_v42 = vpop.f32.mrb[8].mxu0 }
 0x541   : > { %v1076_v8 = vpop.f32.mrb[9].mxu0 }
 0x542   : > { %v2176_v43 = vpop.f32.mrb[10].mxu0 }
 0x543   : > { %v1079_v44 = vpop.f32.mrb[11].mxu0  ;;  %v1849_v43 = vld [vmem:[%s2901_s19 + $0xc] sm:$0x1] }
 0x544   : > { %v2281_v45 = vpack.i.bf16 %v1079_v44, %v1076_v8 }
 0x546   : > { %2282 = vrot.lane.b32.xlu1 %v2281_v45, %s2407_s30 }
 0x548   : > { %v1194_v47 = vpop.f32.mrb[12].mxu0 }
 0x549   : > { %v2286_v48 = vpack.i.bf16 %v1194_v47, %v2175_v42  ;;  %v2187_v2 = vpop.f32.mrb[13].mxu0 }
 0x54a   : > { %v1197_v14 = vpop.f32.mrb[14].mxu0 }
 0x54b   : > { %2287 = vrot.lane.b32.xlu1 %v2286_v48, %s2407_s30  ;;  %v2188_v20 = vpop.f32.mrb[15].mxu0 }
 0x575   : > { %v2199_v27 = vpop.f32.mrb[16].mxu0 }
 0x576   : > { %1765 = vrot.lane.b32.xlu1 %v2199_v27, %s2408_s15  ;;  %v1349_v49 = vpop.f32.mrb[17].mxu0 }
 0x577   : > { %v2200_v22 = vpop.f32.mrb[18].mxu0 }
 0x578   : > { %v1352_v9 = vpop.f32.mrb[19].mxu0 }
 0x579   : > { %v2291_v52 = vpack.i.bf16 %v1352_v9, %v1349_v49 }
 0x57b   : > { %2292 = vrot.lane.b32.xlu0 %v2291_v52, %s2408_s15 }
 0x57d   : > { %v1467_v53 = vpop.f32.mrb[20].mxu0 }
 0x57e   : > { %1797 = vrot.lane.b32.xlu1 %v1467_v53, %s2408_s15  ;;  %v2211_v33 = vpop.f32.mrb[21].mxu0 }
 0x57f   : > { %v1470_v24 = vpop.f32.mrb[22].mxu0 }
 0x580   : > { %v2212_v23 = vpop.f32.mrb[23].mxu0 }
 0x585   : > { %v2223_v56 = vpop.f32.mrb[24].mxu0 }
 0x586   : > { %1777 = vrot.lane.b32.xlu1 %v2223_v56, %s2409_s16  ;;  %v1622_v35 = vpop.f32.mrb[25].mxu0 }
 0x587   : > { %v2224_v57 = vpop.f32.mrb[26].mxu0 }
 0x588   : > { %v1625_v39 = vpop.f32.mrb[27].mxu0 }
 0x589   : > { %v2296_v1 = vpack.i.bf16 %v1625_v39, %v1622_v35 }
 0x58b   : > { %2297 = vrot.lane.b32.xlu1 %v2296_v1, %s2409_s16 }
 0x58d   : > { %v1740_v3 = vpop.f32.mrb[28].mxu0 }
 0x58e   : > { %v2235_v4 = vpop.f32.mrb[29].mxu0 }
 0x58f   : > { %1801 = vrot.lane.b32.xlu1 %v1740_v3, %s2409_s16  ;;  %v1743_v46 = vpop.f32.mrb[30].mxu0 }
 0x590   : > { %v2236_v54 = vpop.f32.mrb[31].mxu0 }
 0x5b8   : > { %v2283_v6 = vpop.permute.xlu1 %2282 }
 0x5b9   : > { %v2285_v63 = vunpack.i.h.bf16 %v2283_v6  ;;  %v2284_v26 = vunpack.i.l.bf16 %v2283_v6 }
 0x5bb   : > { %v1783_v19 = vsel %vm630_vm0, %v2673_v60, %v2285_v63  ;;  %v1782_v32 = vsel %vm630_vm0, %v2671_v58, %v2284_v26 }
 0x5bd   : > { %v2288_v41 = vpop.permute.xlu1 %2287 }
 0x5be   : > { %v2289_v11 = vunpack.i.l.bf16 %v2288_v41  ;;  %v2290_v29 = vunpack.i.h.bf16 %v2288_v41 }
 0x5c0   : > { %v1784_v62 = vsel %vm630_vm0, %v2669_v55, %v2289_v11  ;;  %v1804_v37 = vsel %vm630_vm0, %v2895_v13, %v2290_v29 }
 0x5e8   : > { %v1766_v10 = vpop.permute.xlu1 %1765 }
 0x5e9   : > { %v1787_v15 = vsel %vm864_vm7, %v1784_v62, %v1766_v10 }
 0x5ed   : > { %v2293_v0 = vpop.permute.xlu0 %2292 }
 0x5ee   : > { %v2295_v59 = vunpack.i.h.bf16 %v2293_v0  ;;  %v2294_v28 = vunpack.i.l.bf16 %v2293_v0 }
 0x5f0   : > { %v1798_v12 = vpop.permute.xlu1 %1797  ;;  %v1786_v5 = vsel %vm864_vm7, %v1783_v19, %v2295_v59  ;;  %v1785_v16 = vsel %vm864_vm7, %v1782_v32, %v2294_v28 }
 0x5f1   : > { %v1805_v60 = vsel %vm864_vm7, %v1804_v37, %v1798_v12 }
 0x5f8   : > { %v1778_v30 = vpop.permute.xlu1 %1777 }
 0x5f9   : > { %v1791_v21 = vsel %vm1788_vm9, %v1787_v15, %v1778_v30 }
 0x5fa   : > { %v2099_v50 = vpack.c.bf16 %v1791_v21, %v1791_v21 }
 0x5fc   : > { %v1827_v55 = vsel %vm2906_vm12, %v2099_v50, %v1826_v7 }
 0x5fd   : > { %1828 = vst [vmem:[%s2901_s19 + $0x8] sm:$0x1] %v1827_v55  ;;  %v2298_v31 = vpop.permute.xlu1 %2297 }
 0x5fe   : > { %v2300_v36 = vunpack.i.h.bf16 %v2298_v31  ;;  %v2299_v61 = vunpack.i.l.bf16 %v2298_v31 }
 0x600   : > { %v1789_v18 = vsel %vm1788_vm9, %v1785_v16, %v2299_v61  ;;  %v1790_v51 = vsel %vm1788_vm9, %v1786_v5, %v2300_v36 }
 0x601   : > { %v2097_v38 = vpack.c.bf16 %v1789_v18, %v1789_v18  ;;  %v2098_v58 = vpack.c.bf16 %v1790_v51, %v1790_v51  ;;  %v1802_v25 = vpop.permute.xlu1 %1801 }
 0x602   : > { %v1806_v40 = vsel %vm1788_vm9, %v1805_v60, %v1802_v25 }
 0x603   : > { %1821 = vst.msk [vmem:[%s2901_s19] sm:$0xf] %vm1820_vm13, %v2097_v38  ;;  %1822 = vst.msk [vmem:[%s2901_s19 + $0x4] sm:$0xf] %vm1820_vm13, %v2098_v58  ;;  %v2100_v13 = vpack.c.bf16 %v1806_v40, %v1806_v40 }
 0x604   : > { %v1846_v47 = vld [vmem:[%s2901_s19 + $0x8] sm:$0xf] }
 0x605   : > { %v1834_v34 = vshrl.u32 %v2100_v13, 16  ;;  %v1837_v8 = vshll.u32 %v2100_v13, 16 }
 0x607   : > { %v1836_v42 = vrot.slane %v1834_v34, 7 }
 0x609   : > { %v1839_v44 = vor.u32 %v1837_v8, %v1836_v42  ;;  %v1840_v45 = vrot.slane %v1836_v42, 4 }
 0x60b   : > { %v1847_v48 = vsel %vm1845_vm15, %v1839_v44, %v1846_v47  ;;  %v1850_v2 = vsel %vm2906_vm12, %v1840_v45, %v1849_v43 }
 0x60c   : > { %1848 = vst [vmem:[%s2901_s19 + $0x8] sm:$0xf] %v1847_v48  ;;  %1851 = vst [vmem:[%s2901_s19 + $0xc] sm:$0x1] %v1850_v2 }
 0x60d PF: > { %s19_s11 = sadd.s32 1, %s2399_s11   ;;  %s2959_s30 = smov %s2395_s10 }
 0x60e   : > { %p16_p5 = scmp.ge.s32.totalorder %s19_s11, 4   ;;  %s2960_s10 = smov %s2962_s12 }
 0x610   :  { %18 = sbr.rel (!%p16_p5) target bundleno = 2 (0x2), region = 110 }

// kernel: kat_forward.17
= control target key start
LH: loop header
LB: loop body
LE: loop exit
PB: predicated region body
PF: predicated region fallthrough
CT: control target
= control target key end

     0   :  { %vm22_vm0 = vcmask 261120   ;;  %v289_v1 = vmov 0.0   ;;  %vm94_vm1 = vcmask 523264   ;;  %s409_s1 = inlined_call_operand.vmem [shape: bf16[64,32], index: 1, kind: input, shape index: {}]   ;;  %s410_s0 = inlined_call_operand.vmem [shape: bf16[50,64], index: 0, kind: input, shape index: {}]   ;;  %s411_s2 = inlined_call_operand.vmem [shape: f32[1,32], index: 2, kind: input, shape index: {}]   ;;  %s412_s3 = inlined_call_operand.vmem [shape: f32[50,32], index: 3, kind: input, shape index: {}]   ;;  %s413_s4 = inlined_call_operand.vmem [shape: f32[50,32], index: 4, kind: output, shape index: {}]  }
   0x1   :  { %v281_v0 = vld [vmem:[%s409_s1] sm:$0xff]   ;;  %25 = vst.msk [vmem:[#allocation2 + $0x10] sm:$0xff] %vm22_vm0, %v289_v1  ;;  %23 = vst.msk [vmem:[#allocation2] sm:$0xff] %vm22_vm0, %v289_v1  ;;  %v282_v2 = vld [vmem:[%s409_s1 + $0x8] sm:$0xff]  }
   0x2   :  { %24 = vst.msk [vmem:[#allocation2 + $0x8] sm:$0xff] %vm22_vm0, %v289_v1  ;;  %26 = vst.msk [vmem:[#allocation2 + $0x18] sm:$0xff] %vm22_vm0, %v289_v1  ;;  %256 = vmatprep.subr.bf16.mxu0 %v281_v0  ;;  %272 = vmatprep.subr.bf16.mxu1 %v281_v0  ;;  %v283_v3 = vld [vmem:[%s409_s1 + $0x10] sm:$0xff]   ;;  %v285_v4 = vld [vmem:[%s410_s0] sm:$0xff]  }
   0x3   :  { %27 = vst.msk [vmem:[#allocation2 + $0x20] sm:$0xff] %vm22_vm0, %v289_v1  ;;  %28 = vst.msk [vmem:[#allocation2 + $0x28] sm:$0xff] %vm22_vm0, %v289_v1  ;;  %257 = vmatpush3.bf16.msra.mxu0 %v281_v0  ;;  %276 = vmatpush3.bf16.msra.mxu1 %v281_v0  ;;  %v286_v5 = vld [vmem:[%s410_s0 + $0x10] sm:$0xff]   ;;  %v284_v6 = vld [vmem:[%s409_s1 + $0x18] sm:$0xff]  }
   0x4   :  { %29 = vst.msk [vmem:[#allocation2 + $0x30] sm:$0xff] %vm22_vm0, %v289_v1  ;;  %258 = vmatprep.subr.bf16.mxu0 %v282_v2  ;;  %273 = vmatprep.subr.bf16.mxu1 %v282_v2  ;;  %v287_v7 = vld [vmem:[%s410_s0 + $0x8] sm:$0xff]   ;;  %v288_v8 = vld [vmem:[%s410_s0 + $0x18] ss:$0 sps:$4 sm:$0xff]   ;;  %v247_v31 = vld [vmem:[%s411_s2] ss:$0 sm:$0xff] }
   0x5   :  { %264 = vmatprep.mubr.msk.bf16.mxu0 %vm94_vm1, %v285_v4  ;;  %268 = vmatprep.mubr.msk.bf16.mxu1 %vm94_vm1, %v286_v5  ;;  %v212_v32 = vld [vmem:[%s412_s3 + $0x10] sm:$0xff]  ;;  %v210_v36 = vld [vmem:[%s412_s3] sm:$0xff]  ;;  %v213_v45 = vld [vmem:[%s412_s3 + $0x18] sm:$0xff] }
   0x6   :  { %v216_v33 = vld [vmem:[%s412_s3 + $0x30] sm:$0xff]  ;;  %v214_v41 = vld [vmem:[%s412_s3 + $0x20] sm:$0xff]  ;;  %v211_v46 = vld [vmem:[%s412_s3 + $0x8] sm:$0xff] }
   0x7   :  { %259 = vmatpush3.bf16.msra.mxu0 %v282_v2  ;;  %277 = vmatpush3.bf16.msra.mxu1 %v282_v2  ;;  %v215_v52 = vld [vmem:[%s412_s3 + $0x28] sm:$0xff] }
   0x8   :  { %260 = vmatprep.subr.bf16.mxu0 %v283_v3  ;;  %274 = vmatprep.subr.bf16.mxu1 %v283_v3  ;;  %v47_v9 = vld [vmem:[#allocation2 + $0x10] sm:$0xff]  ;;  %v45_v11 = vld [vmem:[#allocation2] sm:$0xff] }
   0x9   :  { %v48_v15 = vld [vmem:[#allocation2 + $0x18] sm:$0xff]  ;;  %v46_v20 = vld [vmem:[#allocation2 + $0x8] sm:$0xff] }
   0xa   :  { %v49_v12 = vld [vmem:[#allocation2 + $0x20] sm:$0xff]  ;;  %v50_v21 = vld [vmem:[#allocation2 + $0x28] sm:$0xff] }
   0xb   :  { %261 = vmatpush3.bf16.msra.mxu0 %v283_v3  ;;  %278 = vmatpush3.bf16.msra.mxu1 %v283_v3  ;;  %v51_v10 = vld [vmem:[#allocation2 + $0x30] sm:$0xff] }
   0xc   :  { %262 = vmatprep.subr.bf16.mxu0 %v284_v6  ;;  %275 = vmatprep.subr.bf16.mxu1 %v284_v6 }
   0xf   :  { %263 = vmatpush3.bf16.msra.mxu0 %v284_v6  ;;  %279 = vmatpush3.bf16.msra.mxu1 %v284_v6 }
  0x12   :  { %265 = vmatmul.mubr.msk.bf16.vlgmr.msra.gmra.mrb[0].mxu0 %vm94_vm1, %v287_v7  ;;  %269 = vmatmul.mubr.msk.bf16.vlgmr.msra.gmra.mrb[0].mxu1 %vm94_vm1, %v288_v8 }
  0xe5   :  { %v266_v13 = vpop.f32.mrb[0].mxu0  ;;  %v270_v14 = vpop.f32.mrb[0].mxu1 }
  0xe6   :  { %v173_v16 = vadd.f32 %v266_v13, %v47_v9  ;;  %v177_v17 = vadd.f32 %v270_v14, %v51_v10  ;;  %v141_v18 = vpop.f32.mrb[1].mxu0  ;;  %v157_v19 = vpop.f32.mrb[1].mxu1 }
  0xe7   :  { %v171_v22 = vadd.f32 %v141_v18, %v45_v11  ;;  %v175_v23 = vadd.f32 %v157_v19, %v49_v12  ;;  %v267_v24 = vpop.f32.mrb[2].mxu0  ;;  %v271_v25 = vpop.f32.mrb[2].mxu1 }
  0xe8   :  { %181 = vst.msk [vmem:[#allocation2 + $0x10] sm:$0xff] %vm22_vm0, %v173_v16  ;;  %185 = vst.msk [vmem:[#allocation2 + $0x30] sm:$0xff] %vm22_vm0, %v177_v17  ;;  %v174_v26 = vadd.f32 %v267_v24, %v48_v15  ;;  %v144_v27 = vpop.f32.mrb[3].mxu0  ;;  %v160_v28 = vpop.f32.mrb[3].mxu1 }
  0xe9   :  { %179 = vst.msk [vmem:[#allocation2] sm:$0xff] %vm22_vm0, %v171_v22  ;;  %183 = vst.msk [vmem:[#allocation2 + $0x20] sm:$0xff] %vm22_vm0, %v175_v23  ;;  %v172_v29 = vadd.f32 %v144_v27, %v46_v20  ;;  %v176_v30 = vadd.f32 %v160_v28, %v50_v21 }
  0xea   :  { %182 = vst.msk [vmem:[#allocation2 + $0x18] sm:$0xff] %vm22_vm0, %v174_v26 }
  0xeb   :  { %180 = vst.msk [vmem:[#allocation2 + $0x8] sm:$0xff] %vm22_vm0, %v172_v29  ;;  %184 = vst.msk [vmem:[#allocation2 + $0x28] sm:$0xff] %vm22_vm0, %v176_v30 }
  0xef   :  { %v191_v34 = vld [vmem:[#allocation2 + $0x10] sm:$0xff] }
  0xf0   :  { %v195_v35 = vld [vmem:[#allocation2 + $0x30] sm:$0xff]  ;;  %v205_v37 = vadd.f32 %v247_v31, %v191_v34  ;;  %v189_v39 = vld [vmem:[#allocation2] sm:$0xff] }
  0xf1   :  { %v209_v38 = vadd.f32 %v247_v31, %v195_v35  ;;  %v193_v40 = vld [vmem:[#allocation2 + $0x20] sm:$0xff]  ;;  %v203_v42 = vadd.f32 %v247_v31, %v189_v39  ;;  %v192_v44 = vld [vmem:[#allocation2 + $0x18] sm:$0xff] }
  0xf2   :  { %v207_v43 = vadd.f32 %v247_v31, %v193_v40  ;;  %v219_v47 = vadd.f32 %v212_v32, %v205_v37  ;;  %v206_v49 = vadd.f32 %v247_v31, %v192_v44  ;;  %v190_v50 = vld [vmem:[#allocation2 + $0x8] sm:$0xff] }
  0xf3   :  { %v223_v48 = vadd.f32 %v216_v33, %v209_v38  ;;  %v194_v51 = vld [vmem:[#allocation2 + $0x28] sm:$0xff]  ;;  %v217_v53 = vadd.f32 %v210_v36, %v203_v42  ;;  %v204_v55 = vadd.f32 %v247_v31, %v190_v50 }
  0xf4   :  { %v221_v54 = vadd.f32 %v214_v41, %v207_v43  ;;  %v208_v56 = vadd.f32 %v247_v31, %v194_v51  ;;  %226 = vst.msk [vmem:[%s413_s4 + $0x10] sm:$0xff] %vm22_vm0, %v219_v47  ;;  %v220_v57 = vadd.f32 %v213_v45, %v206_v49 }
  0xf5   :  { %230 = vst.msk [vmem:[%s413_s4 + $0x30] sm:$0xff] %vm22_vm0, %v223_v48  ;;  %224 = vst.msk [vmem:[%s413_s4] sm:$0xff] %vm22_vm0, %v217_v53  ;;  %v218_v58 = vadd.f32 %v211_v46, %v204_v55 }
  0xf6   :  { %228 = vst.msk [vmem:[%s413_s4 + $0x20] sm:$0xff] %vm22_vm0, %v221_v54  ;;  %v222_v59 = vadd.f32 %v215_v52, %v208_v56  ;;  %227 = vst.msk [vmem:[%s413_s4 + $0x18] sm:$0xff] %vm22_vm0, %v220_v57 }
  0xf7   :  { %225 = vst.msk [vmem:[%s413_s4 + $0x8] sm:$0xff] %vm22_vm0, %v218_v58 }
  0xf8   :  { %229 = vst.msk [vmem:[%s413_s4 + $0x28] sm:$0xff] %vm22_vm0, %v222_v59 }

// kernel: kat_forward.19
= control target key start
LH: loop header
LB: loop body
LE: loop exit
PB: predicated region body
PF: predicated region fallthrough
CT: control target
= control target key end

     0   :  { %s2460_s30 = smov 0   ;;  %s2462_s10 = smov 0   ;;  %s2947_s0 = inlined_call_operand.vmem [shape: bf16[2,25,32], index: 0, kind: input, shape index: {}]   ;;  %s2948_s1 = inlined_call_operand.vmem [shape: bf16[2,25,32], index: 1, kind: input, shape index: {}]   ;;  %s2949_s2 = inlined_call_operand.vmem [shape: bf16[2,25,32], index: 2, kind: input, shape index: {}]   ;;  %s2950_s3 = inlined_call_operand.vmem [shape: f32[2,17,8], index: 3, kind: input, shape index: {}]   ;;  %s2951_s4 = inlined_call_operand.vmem [shape: f32[2,8,16], index: 4, kind: input, shape index: {}]   ;;  %s2952_s5 = inlined_call_operand.vmem [shape: f32[2,17,1], index: 5, kind: input, shape index: {}]   ;;  %s2953_s6 = inlined_call_operand.vmem [shape: f32[2,1,8], index: 6, kind: input, shape index: {}]   ;;  %s2954_s7 = inlined_call_operand.vmem [shape: f32[2,8,1], index: 7, kind: input, shape index: {}]   ;;  %s2955_s8 = inlined_call_operand.vmem [shape: f32[2,1,16], index: 8, kind: input, shape index: {}]   ;;  %s2956_s9 = inlined_call_operand.vmem [shape: bf16[2,25,32], index: 9, kind: output, shape index: {}]  }
   0x1   :  { %s2464_s11 = smov 0  }
   0x2 LB: > { %s31_s12 = sadd.s32 1, %s2395_s10  ;;  %p2041_p0 = scmp.ge.s32.totalorder %s2399_s11, 1  ;;  %s2399_s11 = sphi %s2464_s11, %s19_s11   ;;  %s2395_s10 = sphi %s2462_s10, %s2960_s10   ;;  %s2391_s30 = sphi %s2460_s30, %s2959_s30  }
   0x3   : > { %p33_p1 = scmp.ge.s32.totalorder %s31_s12, 2  ;;  %p390_p2 = scmp.lt.s32.totalorder %s2399_s11, 3 }
   0x5   : > { %s2962_s12 = smov (%p33_p1, %s31_s12), 0  ;;  %p391_p3 = pnand %p2041_p0, %p390_p2 }
   0x6   : > { %p472_p4 = scmp.lt.s32.totalorder (!%p391_p3), %s2391_s30, 1  ;;  %v2401_v0 = vmov (!%p391_p3), 0   ;;  %vm630_vm0 = vcmask (!%p391_p3), 64512   ;;  %vm697_vm4 = vcmask (!%p391_p3), 57344   ;;  %s2402_s15 = smov (!%p391_p3), 120   ;;  %vm748_vm5 = vcmask (!%p391_p3), 1043456  }
   0x7   : > { %394 = sbr.rel (%p391_p3) target bundleno = 1549 (0x60d), region = 56  ;;  %2279 = vset.pattern.permute.xlu0 (!%p391_p3), %v2401_v0  ;;  %2280 = vset.pattern.permute.xlu1 (!%p391_p3), %v2401_v0  ;;  %s2403_s16 = smov (!%p391_p3), 112   ;;  %vm2405_vm6 = vmmov (!%p391_p3), 0   ;;  %vm864_vm7 = vcmask (!%p391_p3), 130048   ;;  %vm1788_vm9 = vcmask (!%p391_p3), 195584   ;;  %vm1823_vm10 = vcmask (!%p391_p3), 253952  }
   0x8   : > { %s2406_s18 = smov (!%p391_p3), 104   ;;  %vm1824_vm11 = vsmask.f32 (!%p391_p3), 256  ;;  %vm1820_vm13 = vcmask (!%p391_p3), 257024   ;;  %vm1844_vm14 = vsmask.f32 (!%p391_p3), 7938 }
   0x9   : > { %vm2906_vm12 = vmand (!%p391_p3), %vm1823_vm10, %vm1824_vm11 }
   0xa   : > { %vm1845_vm15 = vmand (!%p391_p3), %vm1820_vm13, %vm1844_vm14 }
   0xe   : > { %s2964_s30 = smov (!%p472_p4, %s2391_s30), 1 }
   0xf   : > { %s2481_s13 = sshll.u32 %s2964_s30, 4  ;;  %s2245_s14 = smul.u32 24, %s2964_s30 }
  0x10   : > { %s2488_s17 = scalar_lea.vmem %s2948_s1, %s2481_s13  ;;  %s2494_s20 = scalar_lea.vmem %s2947_s0, %s2481_s13 }
  0x11   : > { %v2301_v1 = vld [vmem:[%s2488_s17 + $0x8] sm:$0x1f]   ;;  %s509_s23 = scalar_lea.vmem %s2952_s5, %s2245_s14  ;;  %v592_v2 = vld [vmem:[%s2494_s20] sm:$0xf]  ;;  %v593_v3 = vld [vmem:[%s2494_s20 + $0x4] sm:$0xf]  ;;  %s512_s26 = scalar_lea.vmem %s2953_s6, %s2964_s30 }
  0x12   : > { %v624_v4 = vshrl.u32 %v2301_v1, 16  ;;  %v626_v5 = vshll.u32 %v2301_v1, 16  ;;  %v595_v6 = vmul.bf16 1052065461, %v592_v2  ;;  %v596_v7 = vmul.bf16 1052065461, %v593_v3  ;;  %s2559_s29 = scalar_lea.vmem %s2949_s2, %s2481_s13  ;;  %s500_s24 = scalar_lea.vmem %s2950_s3, %s2245_s14 }
  0x13   : > { %v546_v8 = vld [vmem:[%s509_s23] sm:$0xff]  ;;  %v594_v11 = vld [vmem:[%s2494_s20 + $0x8] sm:$0x1]  ;;  %v548_v13 = vld [vmem:[%s509_s23 + $0x10] sm:$0x1]  ;;  %v2404_v2 = vmov 0.0   ;;  %s2901_s19 = scalar_lea.vmem %s2956_s9, %s2481_s13 }
  0x14   : > { %v628_v9 = vrot.slane %v626_v5, 1  ;;  %v2504_v10 = vcombine.low %v595_v6, %v596_v7  ;;  %552 = vperm.xlu0 %2279, %v546_v8   ;;  %v547_v12 = vld [vmem:[%s509_s23 + $0x8] sm:$0xff]  ;;  %562 = vperm.xlu1 %2280, %v548_v13   ;;  %v597_v16 = vmul.bf16 1052065461, %v594_v11  ;;  %v2054_v19 = vld [vmem:[%s512_s26] ss:$0 sm:$0xff]  ;;  %s519_s26 = scalar_lea.vmem %s2955_s8, %s2964_s30 }
  0x15   : > { %v598_v50 = vld [vmem:[%s2494_s20 + $0x8] sm:$0xf]  ;;  %v599_v51 = vld [vmem:[%s2494_s20 + $0xc] sm:$0x1]  ;;  %v2567_v58 = vld [vmem:[%s2488_s17] sm:$0xff]   ;;  %s2049_s17 = sshll.u32 %s2964_s30, 3 }
  0x16   : > { %v2507_v14 = vor.u32 %v628_v9, %v624_v4  ;;  %2143 = vmatprep.mubr.msk.bf16.mxu0 %vm630_vm0, %v2504_v10  ;;  %v2515_v17 = vcombine.low %v597_v16, %v597_v16  ;;  %v600_v52 = vmul.bf16 1052065461, %v598_v50  ;;  %v601_v53 = vmul.bf16 1052065461, %v599_v51  ;;  %v2303_v55 = vld [vmem:[%s2559_s29 + $0x8] sm:$0x1f]   ;;  %s516_s21 = scalar_lea.vmem %s2954_s7, %s2049_s17 }
  0x17   : > { %v738_v57 = vshll.u32 %v2303_v55, 16  ;;  %v736_v59 = vshrl.u32 %v2303_v55, 16  ;;  %v577_v3 = vld [vmem:[%s516_s21] sm:$0xff]  ;;  %v531_v5 = vld [vmem:[%s500_s24 + $0x8] sm:$0xff]  ;;  %v532_v8 = vld [vmem:[%s500_s24 + $0x10] sm:$0x1] }
  0x18   : > { %2237 = vmatprep.subr.msk.bf16.mxu0 %vm630_vm0, %v2507_v14  ;;  %v638_v15 = vsel %vm630_vm0, %v2507_v14, 0  ;;  %557 = vperm.xlu0 %2279, %v547_v12   ;;  %v2064_v54 = vcombine.low %v600_v52, %v601_v53  ;;  %v530_v4 = vld [vmem:[%s500_s24] sm:$0xff]  ;;  %v534_v7 = vmul.f32 -0.027777778, %v531_v5  ;;  %s2407_s30 = smov 8  }
  0x19   : > { %2142 = vmatpush3.bf16.xpose.msra.mxu0 %v638_v15  ;;  %v740_v60 = vrot.slane %v738_v57, 1  ;;  %v533_v6 = vmul.f32 -0.027777778, %v530_v4 }
  0x1a   : > { %v808_v56 = vshll.u32 %v2064_v54, 16  ;;  %v806_v61 = vshrl.u32 %v2064_v54, 16  ;;  %2159 = vmatprep.subr.bf16.mxu0 %v2404_v2  ;;  %v538_v11 = vmul.f32 1.442695, %v534_v7 }
  0x1b   : > { %v2569_v63 = vor.u32 %v740_v60, %v736_v59  ;;  %v536_v9 = vmul.f32 1.442695, %v533_v6 }
  0x1c   : > { %v810_v62 = vrot.slane %v808_v56, 1  ;;  %v2055_v56 = vld [vmem:[%s519_s26] ss:$0 sm:$0xff] }
  0x1d   : > { %2238 = vmatprep.subr.msk.bf16.mxu1 %vm748_vm5, %v2569_v63  ;;  %v750_v0 = vsel %vm748_vm5, %v2569_v63, 0 }
  0x1e   : > { %v2579_v1 = vor.u32 %v810_v62, %v806_v61  ;;  %2148 = vmatpush3.bf16.msra.mxu1 %v750_v0 }
  0x1f   : > { %2153 = vmatprep.subr.bf16.mxu1 %v2404_v2 }
  0x20   : > { %2144 = vmatmul.mubr.msk.bf16.vlgmr.msra.gmra.mrb[0].mxu0 %vm630_vm0, %v2515_v17 }
  0x21   : > { %2161 = vmatprep.mubr.msk.bf16.mxu0 %vm2405_vm6, %v2404_v2 }
  0x93   : > { %v553_v18 = vpop.permute.xlu0 %552  ;;  %v563_v21 = vpop.permute.xlu1 %562 }
  0x94   : > { %v2523_v22 = vmul.f32 %v2054_v19, %v553_v18  ;;  %v2527_v24 = vmul.f32 %v2054_v19, %v563_v21 }
  0x96   : > { %vm574_vm1 = vcmp.ge.f32.partialorder %v2523_v22, 0.5  ;;  %vm576_vm3 = vcmp.ge.f32.partialorder %v2527_v24, 0.5 }
  0x97   : > { %v558_v20 = vpop.permute.xlu0 %557 }
  0x98   : > { %v2525_v23 = vmul.f32 %v2054_v19, %v558_v20 }
  0x9a   : > { %vm575_vm2 = vcmp.ge.f32.partialorder %v2525_v23, 0.5 }
  0xf3   : > { %v2145_v25 = vpop.f32.mrb[0].mxu0 }
  0xf4   : > { %v674_v26 = vpop.f32.mrb[1].mxu0  ;;  %v690_v33 = vsel %vm576_vm3, %v2145_v25, -1e+09 }
  0xf5   : > { %v688_v27 = vsel %vm574_vm1, %v674_v26, -1e+09  ;;  %v2146_v28 = vpop.f32.mrb[2].mxu0  ;;  %v698_v34 = vsel %vm697_vm4, %v690_v33, -inf }
  0xf6   : > { %v677_v29 = vpop.f32.mrb[3].mxu0  ;;  %v691_v30 = vsel %vm630_vm0, %v688_v27, -inf }
  0xf7   : > { %v689_v31 = vsel %vm575_vm2, %v677_v29, -1e+09  ;;  %692 = vmax.xlane.f32.xlu1 %v691_v30 }
  0xf8   : > { %v694_v32 = vsel %vm630_vm0, %v689_v31, -inf }
  0xf9   : > { %695 = vmax.xlane.f32.xlu0 %v694_v32 }
  0xfd   : > { %699 = vmax.xlane.f32.xlu0 %v698_v34 }
 0x184   : > { %v693_v35 = vpop.xlane.xlu1 %692 }
 0x185   : > { %v701_v36 = vsub.f32 %v688_v27, %v693_v35 }
 0x186   : > { %v696_v37 = vpop.xlane.xlu0 %695 }
 0x187   : > { %v704_v38 = vmul.f32 1.442695, %v701_v36  ;;  %v702_v39 = vsub.f32 %v689_v31, %v696_v37 }
 0x189   : > { %2305 = vpow2.f32 %v704_v38  ;;  %v706_v40 = vmul.f32 1.442695, %v702_v39 }
 0x18a   : > { %v700_v41 = vpop.xlane.xlu0 %699 }
 0x18b   : > { %2307 = vpow2.f32 %v706_v40  ;;  %v703_v42 = vsub.f32 %v690_v33, %v700_v41  ;;  %v821_v33 = vsel %vm630_vm0, %v2567_v58, 0 }
 0x18d   : > { %v708_v43 = vmul.f32 1.442695, %v703_v42 }
 0x18f   : > { %2309 = vpow2.f32 %v708_v43 }
 0x190   : > { %2311 = vpow2.f32 %v536_v9 }
 0x193   : > { %v2541_v44 = vpop.eup %2305 }
 0x194   : > { %v710_v45 = vsel %vm630_vm0, %v2541_v44, 0.0 }
 0x195   : > { %v2545_v46 = vpop.eup %2307  ;;  %711 = vadd.xlane.f32.xlu1 %v710_v45 }
 0x196   : > { %v713_v47 = vsel %vm630_vm0, %v2545_v46, 0.0 }
 0x197   : > { %714 = vadd.xlane.f32.xlu0 %v713_v47 }
 0x199   : > { %v2549_v48 = vpop.eup %2309 }
 0x19a   : > { %v716_v49 = vsel %vm697_vm4, %v2549_v48, 0.0  ;;  %v2618_v16 = vpop.eup %2311 }
 0x19b   : > { %717 = vadd.xlane.f32.xlu1 %v716_v49 }
 0x1ac   : > { %927 = vrot.lane.b32.xlu1 %v2504_v10, %s2402_s15 }
 0x1ad   : > { %931 = vrot.lane.b32.xlu0 %v2507_v14, %s2402_s15 }
 0x1b0   : > { %929 = vrot.lane.b32.xlu1 %v2515_v17, %s2402_s15 }
 0x1b1   : > { %1092 = vrot.lane.b32.xlu0 %v2567_v58, %s2402_s15 }
 0x1b4   : > { %1090 = vrot.lane.b32.xlu1 %v2579_v1, %s2402_s15 }
 0x1b5   : > { %1204 = vrot.lane.b32.xlu0 %v2507_v14, %s2403_s16 }
 0x1b8   : > { %1200 = vrot.lane.b32.xlu1 %v2504_v10, %s2403_s16 }
 0x1b9   : > { %1202 = vrot.lane.b32.xlu0 %v2515_v17, %s2403_s16 }
 0x1bc   : > { %1365 = vrot.lane.b32.xlu1 %v2567_v58, %s2403_s16 }
 0x1bd   : > { %1363 = vrot.lane.b32.xlu0 %v2579_v1, %s2403_s16 }
 0x1c0   : > { %1477 = vrot.lane.b32.xlu1 %v2507_v14, %s2406_s18 }
 0x1c1   : > { %1473 = vrot.lane.b32.xlu0 %v2504_v10, %s2406_s18  ;;  %v535_v10 = vmul.f32 -0.027777778, %v532_v8 }
 0x1c3   : > { %v540_v13 = vmul.f32 1.442695, %v535_v10 }
 0x1c4   : > { %1475 = vrot.lane.b32.xlu1 %v2515_v17, %s2406_s18 }
 0x1c5   : > { %1638 = vrot.lane.b32.xlu0 %v2567_v58, %s2406_s18 }
 0x1c8   : > { %1636 = vrot.lane.b32.xlu1 %v2579_v1, %s2406_s18 }
 0x1c9   : > { %581 = vperm.xlu0 %2279, %v577_v3  }
 0x222   : > { %v712_v12 = vpop.xlane.xlu1 %711 }
 0x223   : > { %2313 = vrcp.f32 %v712_v12 }
 0x224   : > { %2315 = vpow2.f32 %v538_v11  ;;  %v715_v14 = vpop.xlane.xlu0 %714 }
 0x225   : > { %2317 = vrcp.f32 %v715_v14 }
 0x226   : > { %2319 = vpow2.f32 %v540_v13 }
 0x228   : > { %v718_v15 = vpop.xlane.xlu1 %717  ;;  %v932_v34 = vpop.permute.xlu0 %931 }
 0x229   : > { %2321 = vrcp.f32 %v718_v15  ;;  %v940_v36 = vsel %vm630_vm0, %v932_v34, 0 }
 0x22c   : > { %v928_v35 = vpop.permute.xlu1 %927  ;;  %v1093_v37 = vpop.permute.xlu0 %1092 }
 0x22d   : > { %v2314_v17 = vpop.eup %2313  ;;  %v1098_v39 = vsel %vm630_vm0, %v1093_v37, 0 }
 0x22e   : > { %v2620_v18 = vpop.eup %2315  ;;  %v722_v19 = vmul.f32 %v2314_v17, %v2541_v44 }
 0x22f   : > { %v2318_v20 = vpop.eup %2317 }
 0x230   : > { %v723_v21 = vmul.f32 %v2318_v20, %v2545_v46  ;;  %v2624_v25 = vpop.eup %2319  ;;  %v725_v26 = vmul.f32 %v2618_v16, %v722_v19  ;;  %v930_v38 = vpop.permute.xlu1 %929 }
 0x231   : > { %v1205_v41 = vpop.permute.xlu0 %1204 }
 0x232   : > { %v726_v27 = vmul.f32 %v2620_v18, %v723_v21  ;;  %v1213_v43 = vsel %vm630_vm0, %v1205_v41, 0 }
 0x233   : > { %v2322_v28 = vpop.eup %2321 }
 0x234   : > { %v728_v29 = vpack.c.bf16 %v726_v27, %v725_v26  ;;  %v724_v30 = vmul.f32 %v2322_v28, %v2549_v48  ;;  %v1091_v40 = vpop.permute.xlu1 %1090 }
 0x235   : > { %v1203_v44 = vpop.permute.xlu0 %1202 }
 0x236   : > { %2149 = vmatprep.mubr.msk.bf16.mxu1 %vm630_vm0, %v728_v29  ;;  %v727_v31 = vmul.f32 %v2624_v25, %v724_v30 }
 0x238   : > { %v729_v32 = vpack.c.bf16 %v727_v31, %v727_v31  ;;  %v1201_v42 = vpop.permute.xlu1 %1200 }
 0x239   : > { %v1364_v48 = vpop.permute.xlu0 %1363 }
 0x23a   : > { %2150 = vmatmul.mubr.msk.bf16.vlgmr.msra.gmra.mrb[0].mxu1 %vm630_vm0, %v729_v32 }
 0x23b   : > { %2154 = vmatpush3.bf16.xpose.msra.mxu1 %v821_v33  ;;  %2155 = vmatprep.mubr.msk.bf16.mxu1 %vm2405_vm6, %v2404_v2 }
 0x23c   : > { %2239 = vmatprep.subr.msk.bf16.mxu1 %vm630_vm0, %v932_v34  ;;  %v1366_v45 = vpop.permute.xlu1 %1365 }
 0x23d   : > { %v1371_v46 = vsel %vm630_vm0, %v1366_v45, 0  ;;  %v1474_v50 = vpop.permute.xlu0 %1473 }
 0x240   : > { %v1478_v47 = vpop.permute.xlu1 %1477 }
 0x241   : > { %v1486_v49 = vsel %vm630_vm0, %v1478_v47, 0  ;;  %v1639_v51 = vpop.permute.xlu0 %1638 }
 0x242   : > { %2156 = vmatmul.mubr.msk.bf16.vlgmr.msra.gmra.mrb[4].mxu1 %vm630_vm0, %v2579_v1  ;;  %v1644_v53 = vsel %vm630_vm0, %v1639_v51, 0 }
 0x243   : > { %2166 = vmatpush3.bf16.xpose.msra.mxu1 %v940_v36  ;;  %2167 = vmatprep.mubr.msk.bf16.mxu1 %vm630_vm0, %v928_v35 }
 0x244   : > { %2177 = vmatprep.subr.bf16.mxu1 %v2404_v2  ;;  %v1476_v52 = vpop.permute.xlu1 %1475 }
 0x248   : > { %v1637_v54 = vpop.permute.xlu1 %1636  ;;  %v582_v57 = vpop.permute.xlu0 %581 }
 0x249   : > { %v2675_v61 = vmul.f32 %v2055_v56, %v582_v57 }
 0x24a   : > { %2168 = vmatmul.mubr.msk.bf16.vlgmr.msra.gmra.mrb[8].mxu1 %vm630_vm0, %v930_v38 }
 0x24b   : > { %2178 = vmatpush3.bf16.xpose.msra.mxu1 %v1098_v39  ;;  %2179 = vmatprep.mubr.msk.bf16.mxu1 %vm2405_vm6, %v2404_v2  ;;  %vm591_vm8 = vcmp.ge.f32.partialorder %v2675_v61, 0.5 }
 0x24c   : > { %2241 = vmatprep.subr.msk.bf16.mxu1 %vm630_vm0, %v1205_v41 }
 0x252   : > { %2180 = vmatmul.mubr.msk.bf16.vlgmr.msra.gmra.mrb[12].mxu1 %vm630_vm0, %v1091_v40 }
 0x253   : > { %2190 = vmatpush3.bf16.xpose.msra.mxu1 %v1213_v43  ;;  %2191 = vmatprep.mubr.msk.bf16.mxu1 %vm630_vm0, %v1201_v42 }
 0x254   : > { %2201 = vmatprep.subr.bf16.mxu1 %v2404_v2 }
 0x25a   : > { %2192 = vmatmul.mubr.msk.bf16.vlgmr.msra.gmra.mrb[16].mxu1 %vm630_vm0, %v1203_v44 }
 0x25b   : > { %2202 = vmatpush3.bf16.xpose.msra.mxu1 %v1371_v46  ;;  %2203 = vmatprep.mubr.msk.bf16.mxu1 %vm2405_vm6, %v2404_v2 }
 0x25c   : > { %2243 = vmatprep.subr.msk.bf16.mxu1 %vm630_vm0, %v1478_v47 }
 0x262   : > { %2204 = vmatmul.mubr.msk.bf16.vlgmr.msra.gmra.mrb[20].mxu1 %vm630_vm0, %v1364_v48 }
 0x263   : > { %2214 = vmatpush3.bf16.xpose.msra.mxu1 %v1486_v49  ;;  %2215 = vmatprep.mubr.msk.bf16.mxu1 %vm630_vm0, %v1474_v50 }
 0x264   : > { %2225 = vmatprep.subr.bf16.mxu1 %v2404_v2 }
 0x26a   : > { %2216 = vmatmul.mubr.msk.bf16.vlgmr.msra.gmra.mrb[24].mxu1 %vm630_vm0, %v1476_v52 }
 0x26b   : > { %2226 = vmatpush3.bf16.xpose.msra.mxu1 %v1644_v53  ;;  %2227 = vmatprep.mubr.msk.bf16.mxu1 %vm2405_vm6, %v2404_v2 }
 0x272   : > { %2228 = vmatmul.mubr.msk.bf16.vlgmr.msra.gmra.mrb[28].mxu1 %vm630_vm0, %v1637_v54 }
 0x30d   : > { %v2669_v55 = vpop.f32.mrb[0].mxu1 }
 0x30e   : > { %v2671_v58 = vpop.f32.mrb[1].mxu1 }
 0x30f   : > { %v2152_v59 = vpop.f32.mrb[2].mxu1 }
 0x310   : > { %v2673_v60 = vpop.f32.mrb[3].mxu1  ;;  %v2757_v59 = vld [vmem:[%s2559_s29] sm:$0xff]   ;;  %s504_s29 = scalar_lea.vmem %s2951_s4, %s2049_s17 }
 0x311   : > { %2160 = vmatpush3.bf16.msra.mxu0 %v2757_v59 }
 0x315   : > { %v857_v62 = vpop.f32.mrb[4].mxu1 }
 0x316   : > { %v2680_v0 = vsel %vm591_vm8, %v857_v62, -1e+09  ;;  %v2157_v1 = vpop.f32.mrb[5].mxu1 }
 0x317   : > { %v860_v3 = vpop.f32.mrb[6].mxu1  ;;  %v865_v4 = vsel %vm864_vm7, %v2680_v0, -inf }
 0x318   : > { %v2158_v5 = vpop.f32.mrb[7].mxu1  ;;  %866 = vmax.xlane.f32.xlu1 %v865_v4 }
 0x31d   : > { %v2169_v6 = vpop.f32.mrb[8].mxu1 }
 0x31e   : > { %v2686_v7 = vsel %vm576_vm3, %v2169_v6, -1e+09  ;;  %v976_v8 = vpop.f32.mrb[9].mxu1 }
 0x31f   : > { %v2690_v9 = vsel %vm574_vm1, %v976_v8, -1e+09  ;;  %v2170_v10 = vpop.f32.mrb[10].mxu1  ;;  %v999_v11 = vsel %vm697_vm4, %v2686_v7, -inf }
 0x320   : > { %v979_v12 = vpop.f32.mrb[11].mxu1  ;;  %1000 = vmax.xlane.f32.xlu1 %v999_v11  ;;  %v993_v13 = vsel %vm630_vm0, %v2690_v9, -inf }
 0x321   : > { %v2698_v14 = vsel %vm575_vm2, %v979_v12, -1e+09  ;;  %994 = vmax.xlane.f32.xlu0 %v993_v13 }
 0x322   : > { %v996_v15 = vsel %vm630_vm0, %v2698_v14, -inf }
 0x325   : > { %997 = vmax.xlane.f32.xlu0 %v996_v15  ;;  %v1134_v17 = vpop.f32.mrb[12].mxu1 }
 0x326   : > { %v2704_v19 = vsel %vm591_vm8, %v1134_v17, -1e+09  ;;  %v2181_v20 = vpop.f32.mrb[13].mxu1 }
 0x327   : > { %v1137_v21 = vpop.f32.mrb[14].mxu1  ;;  %v1141_v26 = vsel %vm864_vm7, %v2704_v19, -inf }
 0x328   : > { %v2182_v27 = vpop.f32.mrb[15].mxu1 }
 0x329   : > { %1142 = vmax.xlane.f32.xlu0 %v1141_v26 }
 0x32d   : > { %v2193_v28 = vpop.f32.mrb[16].mxu1 }
 0x32e   : > { %v1249_v29 = vpop.f32.mrb[17].mxu1  ;;  %v2716_v34 = vsel %vm576_vm3, %v2193_v28, -1e+09 }
 0x32f   : > { %v2710_v30 = vsel %vm574_vm1, %v1249_v29, -1e+09  ;;  %v2194_v31 = vpop.f32.mrb[18].mxu1  ;;  %v1272_v37 = vsel %vm697_vm4, %v2716_v34, -inf }
 0x330   : > { %v1252_v32 = vpop.f32.mrb[19].mxu1  ;;  %v1266_v33 = vsel %vm630_vm0, %v2710_v30, -inf }
 0x331   : > { %v2720_v35 = vsel %vm575_vm2, %v1252_v32, -1e+09  ;;  %1267 = vmax.xlane.f32.xlu1 %v1266_v33 }
 0x332   : > { %v1269_v36 = vsel %vm630_vm0, %v2720_v35, -inf }
 0x333   : > { %1270 = vmax.xlane.f32.xlu0 %v1269_v36 }
 0x335   : > { %v1407_v38 = vpop.f32.mrb[20].mxu1  ;;  %1273 = vmax.xlane.f32.xlu1 %v1272_v37 }
 0x336   : > { %v2728_v39 = vsel %vm591_vm8, %v1407_v38, -1e+09  ;;  %v2205_v40 = vpop.f32.mrb[21].mxu1 }
 0x337   : > { %v1414_v41 = vsel %vm864_vm7, %v2728_v39, -inf  ;;  %v1410_v42 = vpop.f32.mrb[22].mxu1 }
 0x338   : > { %1415 = vmax.xlane.f32.xlu0 %v1414_v41  ;;  %v2206_v43 = vpop.f32.mrb[23].mxu1 }
 0x33d   : > { %v2217_v44 = vpop.f32.mrb[24].mxu1 }
 0x33e   : > { %v1522_v45 = vpop.f32.mrb[25].mxu1  ;;  %v2740_v50 = vsel %vm576_vm3, %v2217_v44, -1e+09 }
 0x33f   : > { %v2734_v46 = vsel %vm574_vm1, %v1522_v45, -1e+09  ;;  %v2218_v47 = vpop.f32.mrb[26].mxu1  ;;  %v1545_v52 = vsel %vm697_vm4, %v2740_v50, -inf }
 0x340   : > { %v1525_v48 = vpop.f32.mrb[27].mxu1  ;;  %v1539_v49 = vsel %vm630_vm0, %v2734_v46, -inf }
 0x341   : > { %v2744_v51 = vsel %vm575_vm2, %v1525_v48, -1e+09  ;;  %1540 = vmax.xlane.f32.xlu1 %v1539_v49 }
 0x342   : > { %v1542_v22 = vsel %vm630_vm0, %v2744_v51, -inf }
 0x343   : > { %1543 = vmax.xlane.f32.xlu0 %v1542_v22 }
 0x345   : > { %v1680_v53 = vpop.f32.mrb[28].mxu1  ;;  %1546 = vmax.xlane.f32.xlu1 %v1545_v52 }
 0x346   : > { %v2752_v54 = vsel %vm591_vm8, %v1680_v53, -1e+09  ;;  %v2229_v24 = vpop.f32.mrb[29].mxu1 }
 0x347   : > { %v1687_v23 = vsel %vm864_vm7, %v2752_v54, -inf  ;;  %v1683_v56 = vpop.f32.mrb[30].mxu1 }
 0x348   : > { %1688 = vmax.xlane.f32.xlu0 %v1687_v23  ;;  %v2230_v57 = vpop.f32.mrb[31].mxu1 }
 0x3a5   : > { %v867_v62 = vpop.xlane.xlu1 %866 }
 0x3a6   : > { %v868_v1 = vsub.f32 %v2680_v0, %v867_v62 }
 0x3a8   : > { %v869_v3 = vmul.f32 1.442695, %v868_v1 }
 0x3aa   : > { %2323 = vpow2.f32 %v869_v3 }
 0x3ad   : > { %v1001_v4 = vpop.xlane.xlu1 %1000 }
 0x3ae   : > { %v1004_v61 = vsub.f32 %v2686_v7, %v1001_v4  ;;  %v995_v5 = vpop.xlane.xlu0 %994 }
 0x3af   : > { %v1002_v6 = vsub.f32 %v2690_v9, %v995_v5 }
 0x3b0   : > { %v1009_v8 = vmul.f32 1.442695, %v1004_v61 }
 0x3b1   : > { %v1005_v10 = vmul.f32 1.442695, %v1002_v6 }
 0x3b2   : > { %2325 = vpow2.f32 %v1009_v8  ;;  %v998_v11 = vpop.xlane.xlu0 %997 }
 0x3b3   : > { %v1003_v12 = vsub.f32 %v2698_v14, %v998_v11  ;;  %2327 = vpow2.f32 %v1005_v10 }
 0x3b4   : > { %v2764_v13 = vpop.eup %2323 }
 0x3b5   : > { %v1007_v15 = vmul.f32 1.442695, %v1003_v12  ;;  %v871_v0 = vsel %vm864_vm7, %v2764_v13, 0.0  ;;  %v542_v12 = vld [vmem:[%s504_s29] sm:$0xff] }
 0x3b6   : > { %872 = vadd.xlane.f32.xlu1 %v871_v0  ;;  %v1143_v17 = vpop.xlane.xlu0 %1142 }
 0x3b7   : > { %2329 = vpow2.f32 %v1007_v15  ;;  %v1144_v7 = vsub.f32 %v2704_v19, %v1143_v17  ;;  %v543_v15 = vmul.f32 -0.027777778, %v542_v12 }
 0x3b9   : > { %v1145_v20 = vmul.f32 1.442695, %v1144_v7  ;;  %v544_v0 = vmul.f32 1.442695, %v543_v15 }
 0x3bb   : > { %2331 = vpow2.f32 %v1145_v20 }
 0x3bc   : > { %v2769_v9 = vpop.eup %2325 }
 0x3bd   : > { %v1017_v21 = vsel %vm697_vm4, %v2769_v9, 0.0  ;;  %v2773_v14 = vpop.eup %2327 }
 0x3be   : > { %1018 = vadd.xlane.f32.xlu0 %v1017_v21  ;;  %v1268_v26 = vpop.xlane.xlu1 %1267  ;;  %v1011_v29 = vsel %vm630_vm0, %v2773_v14, 0.0 }
 0x3bf   : > { %v1275_v28 = vsub.f32 %v2710_v30, %v1268_v26 }
 0x3c0   : > { %v1271_v42 = vpop.xlane.xlu0 %1270 }
 0x3c1   : > { %v2775_v27 = vpop.eup %2329  ;;  %v1278_v36 = vmul.f32 1.442695, %v1275_v28  ;;  %v1276_v44 = vsub.f32 %v2720_v35, %v1271_v42 }
 0x3c2   : > { %v1274_v31 = vpop.xlane.xlu1 %1273  ;;  %1012 = vadd.xlane.f32.xlu0 %v1011_v29  ;;  %v1014_v19 = vsel %vm630_vm0, %v2775_v27, 0.0 }
 0x3c3   : > { %v1277_v32 = vsub.f32 %v2716_v34, %v1274_v31  ;;  %1015 = vadd.xlane.f32.xlu1 %v1014_v19  ;;  %v1280_v47 = vmul.f32 1.442695, %v1276_v44 }
 0x3c5   : > { %v2783_v33 = vpop.eup %2331  ;;  %v1282_v37 = vmul.f32 1.442695, %v1277_v32  ;;  %v1416_v45 = vpop.xlane.xlu0 %1415 }
 0x3c6   : > { %v1147_v38 = vsel %vm864_vm7, %v2783_v33, 0.0  ;;  %v1417_v48 = vsub.f32 %v2728_v39, %v1416_v45 }
 0x3c7   : > { %2333 = vpow2.f32 %v1282_v37  ;;  %1148 = vadd.xlane.f32.xlu1 %v1147_v38 }
 0x3c8   : > { %2335 = vpow2.f32 %v1278_v36  ;;  %v1418_v52 = vmul.f32 1.442695, %v1417_v48 }
 0x3c9   : > { %2337 = vpow2.f32 %v1280_v47 }
 0x3ca   : > { %2339 = vpow2.f32 %v1418_v52 }
 0x3ce   : > { %v1541_v43 = vpop.xlane.xlu1 %1540 }
 0x3cf   : > { %v1548_v24 = vsub.f32 %v2734_v46, %v1541_v43 }
 0x3d0   : > { %v1544_v22 = vpop.xlane.xlu0 %1543 }
 0x3d1   : > { %v2787_v30 = vpop.eup %2333  ;;  %v1549_v35 = vsub.f32 %v2744_v51, %v1544_v22  ;;  %v1551_v57 = vmul.f32 1.442695, %v1548_v24 }
 0x3d2   : > { %v1290_v40 = vsel %vm697_vm4, %v2787_v30, 0.0  ;;  %v2791_v41 = vpop.eup %2335  ;;  %v1547_v49 = vpop.xlane.xlu1 %1546 }
 0x3d3   : > { %1291 = vadd.xlane.f32.xlu0 %v1290_v40  ;;  %v1284_v34 = vsel %vm630_vm0, %v2791_v41, 0.0  ;;  %v1550_v53 = vsub.f32 %v2740_v50, %v1547_v49  ;;  %v2805_v62 = vpop.eup %2337  ;;  %v1553_v1 = vmul.f32 1.442695, %v1549_v35 }
 0x3d4   : > { %v1287_v4 = vsel %vm630_vm0, %v2805_v62, 0.0  ;;  %v2809_v50 = vpop.eup %2339 }
 0x3d5   : > { %v1555_v23 = vmul.f32 1.442695, %v1550_v53  ;;  %v1689_v56 = vpop.xlane.xlu0 %1688  ;;  %v1420_v46 = vsel %vm864_vm7, %v2809_v50, 0.0 }
 0x3d6   : > { %v1690_v39 = vsub.f32 %v2752_v54, %v1689_v56 }
 0x3d7   : > { %1285 = vadd.xlane.f32.xlu0 %v1284_v34  ;;  %2341 = vpow2.f32 %v1555_v23 }
 0x3d8   : > { %1154 = vrot.lane.b32.xlu1 %v2757_v59, %s2402_s15  ;;  %2343 = vpow2.f32 %v1551_v57  ;;  %v1691_v3 = vmul.f32 1.442695, %v1690_v39 }
 0x3d9   : > { %2345 = vpow2.f32 %v1553_v1 }
 0x3da   : > { %2347 = vpow2.f32 %v1691_v3 }
 0x3db   : > { %2349 = vpow2.f32 %v544_v0 }
 0x3e1   : > { %v2813_v51 = vpop.eup %2341 }
 0x3e2   : > { %v1563_v54 = vsel %vm697_vm4, %v2813_v51, 0.0  ;;  %v2817_v61 = vpop.eup %2343 }
 0x3e3   : > { %v2819_v5 = vpop.eup %2345  ;;  %v1557_v6 = vsel %vm630_vm0, %v2817_v61, 0.0 }
 0x3e4   : > { %v2823_v8 = vpop.eup %2347  ;;  %v1560_v10 = vsel %vm630_vm0, %v2819_v5, 0.0 }
 0x3e5   : > { %v1693_v11 = vsel %vm864_vm7, %v2823_v8, 0.0  ;;  %v2842_v20 = vpop.eup %2349 }
 0x3ed   : > { %1031 = vrot.lane.b32.xlu0 %v2569_v63, %s2402_s15  ;;  %s2408_s15 = smov 16  }
 0x3fc   : > { %1288 = vadd.xlane.f32.xlu1 %v1287_v4 }
 0x400   : > { %1421 = vadd.xlane.f32.xlu1 %v1420_v46 }
 0x404   : > { %1564 = vadd.xlane.f32.xlu1 %v1563_v54 }
 0x408   : > { %1558 = vadd.xlane.f32.xlu1 %v1557_v6 }
 0x40c   : > { %1561 = vadd.xlane.f32.xlu1 %v1560_v10  ;;  %1694 = vadd.xlane.f32.xlu0 %v1693_v11 }
 0x41d   : > { %1304 = vrot.lane.b32.xlu1 %v2569_v63, %s2403_s16 }
 0x421   : > { %1427 = vrot.lane.b32.xlu1 %v2757_v59, %s2403_s16  ;;  %s2409_s16 = smov 24  }
 0x425   : > { %1577 = vrot.lane.b32.xlu1 %v2569_v63, %s2406_s18 }
 0x429   : > { %1700 = vrot.lane.b32.xlu1 %v2757_v59, %s2406_s18 }
 0x443   : > { %v873_v17 = vpop.xlane.xlu1 %872 }
 0x444   : > { %2351 = vrcp.f32 %v873_v17 }
 0x44b   : > { %v1019_v7 = vpop.xlane.xlu0 %1018 }
 0x44e   : > { %v2352_v21 = vpop.eup %2351 }
 0x44f   : > { %v875_v63 = vmul.f32 %v2352_v21, %v2764_v13  ;;  %v1013_v26 = vpop.xlane.xlu0 %1012 }
 0x450   : > { %2353 = vrcp.f32 %v1013_v26  ;;  %v1016_v59 = vpop.xlane.xlu1 %1015 }
 0x451   : > { %2355 = vrcp.f32 %v1016_v59  ;;  %v876_v28 = vmul.f32 %v2842_v20, %v875_v63 }
 0x452   : > { %2357 = vrcp.f32 %v1019_v7 }
 0x453   : > { %v877_v29 = vpack.c.bf16 %v876_v28, %v876_v28 }
 0x454   : > { %v1149_v32 = vpop.xlane.xlu1 %1148 }
 0x455   : > { %2162 = vmatmul.mubr.msk.bf16.vlgmr.msra.gmra.mrb[4].mxu0 %vm864_vm7, %v877_v29  ;;  %2359 = vrcp.f32 %v1149_v32 }
 0x458   : > { %v1155_v22 = vpop.permute.xlu1 %1154 }
 0x45a   : > { %v2354_v31 = vpop.eup %2353 }
 0x45b   : > { %v2356_v19 = vpop.eup %2355  ;;  %v1023_v36 = vmul.f32 %v2354_v31, %v2773_v14 }
 0x45c   : > { %v1024_v37 = vmul.f32 %v2356_v19, %v2775_v27  ;;  %v2358_v40 = vpop.eup %2357 }
 0x45d   : > { %v1026_v38 = vmul.f32 %v2618_v16, %v1023_v36  ;;  %v1025_v43 = vmul.f32 %v2358_v40, %v2769_v9 }
 0x45e   : > { %v1027_v13 = vmul.f32 %v2620_v18, %v1024_v37 }
 0x45f   : > { %v1028_v45 = vmul.f32 %v2624_v25, %v1025_v43  ;;  %v2360_v47 = vpop.eup %2359 }
 0x460   : > { %v1292_v34 = vpop.xlane.xlu0 %1291  ;;  %v1029_v42 = vpack.c.bf16 %v1027_v13, %v1026_v38  ;;  %v1151_v27 = vmul.f32 %v2360_v47, %v2783_v33 }
 0x461   : > { %v1030_v49 = vpack.c.bf16 %v1028_v45, %v1028_v45 }
 0x462   : > { %2173 = vmatprep.mubr.msk.bf16.mxu0 %vm630_vm0, %v1029_v42  ;;  %v1152_v9 = vmul.f32 %v2842_v20, %v1151_v27 }
 0x464   : > { %v1286_v44 = vpop.xlane.xlu0 %1285  ;;  %v1153_v52 = vpack.c.bf16 %v1152_v9, %v1152_v9 }
 0x465   : > { %2361 = vrcp.f32 %v1286_v44 }
 0x468   : > { %v1032_v48 = vpop.permute.xlu0 %1031 }
 0x469   : > { %v1040_v14 = vsel %vm748_vm5, %v1032_v48, 0  ;;  %2240 = vmatprep.subr.msk.bf16.mxu0 %vm748_vm5, %v1032_v48 }
 0x46a   : > { %2172 = vmatpush3.bf16.msra.mxu0 %v1040_v14 }
 0x46b   : > { %2183 = vmatprep.subr.bf16.mxu0 %v2404_v2 }
 0x46d   : > { %2174 = vmatmul.mubr.msk.bf16.vlgmr.msra.gmra.mrb[8].mxu0 %vm630_vm0, %v1030_v49 }
 0x46e   : > { %2184 = vmatpush3.bf16.msra.mxu0 %v1155_v22  ;;  %2185 = vmatprep.mubr.msk.bf16.mxu0 %vm2405_vm6, %v2404_v2 }
 0x46f   : > { %v2362_v24 = vpop.eup %2361 }
 0x470   : > { %v1296_v56 = vmul.f32 %v2362_v24, %v2791_v41 }
 0x472   : > { %v1299_v3 = vmul.f32 %v2618_v16, %v1296_v56 }
 0x475   : > { %2186 = vmatmul.mubr.msk.bf16.vlgmr.msra.gmra.mrb[12].mxu0 %vm864_vm7, %v1153_v52 }
 0x489   : > { %v1289_v53 = vpop.xlane.xlu1 %1288 }
 0x48a   : > { %2363 = vrcp.f32 %v1289_v53 }
 0x48b   : > { %2365 = vrcp.f32 %v1292_v34 }
 0x48d   : > { %v1422_v33 = vpop.xlane.xlu1 %1421 }
 0x48e   : > { %2367 = vrcp.f32 %v1422_v33 }
 0x491   : > { %v1565_v23 = vpop.xlane.xlu1 %1564 }
 0x494   : > { %v2364_v35 = vpop.eup %2363 }
 0x495   : > { %v2366_v57 = vpop.eup %2365  ;;  %v1559_v39 = vpop.xlane.xlu1 %1558  ;;  %v1297_v1 = vmul.f32 %v2364_v35, %v2805_v62 }
 0x496   : > { %2369 = vrcp.f32 %v1559_v39  ;;  %v1298_v46 = vmul.f32 %v2366_v57, %v2787_v30 }
 0x497   : > { %v1300_v4 = vmul.f32 %v2620_v18, %v1297_v1 }
 0x498   : > { %v1301_v41 = vmul.f32 %v2624_v25, %v1298_v46  ;;  %v2368_v10 = vpop.eup %2367 }
 0x499   : > { %v1562_v54 = vpop.xlane.xlu1 %1561  ;;  %v1302_v6 = vpack.c.bf16 %v1300_v4, %v1299_v3  ;;  %v1424_v15 = vmul.f32 %v2368_v10, %v2809_v50  ;;  %v1695_v0 = vpop.xlane.xlu0 %1694 }
 0x49a   : > { %2371 = vrcp.f32 %v1562_v54  ;;  %v1303_v30 = vpack.c.bf16 %v1301_v41, %v1301_v41 }
 0x49b   : > { %2373 = vrcp.f32 %v1565_v23  ;;  %2197 = vmatprep.mubr.msk.bf16.mxu0 %vm630_vm0, %v1302_v6  ;;  %v1425_v63 = vmul.f32 %v2842_v20, %v1424_v15 }
 0x49c   : > { %2375 = vrcp.f32 %v1695_v0 }
 0x49d   : > { %v1305_v11 = vpop.permute.xlu1 %1304  ;;  %v1426_v19 = vpack.c.bf16 %v1425_v63, %v1425_v63 }
 0x49e   : > { %v1313_v12 = vsel %vm748_vm5, %v1305_v11, 0  ;;  %2242 = vmatprep.subr.msk.bf16.mxu0 %vm748_vm5, %v1305_v11 }
 0x49f   : > { %2196 = vmatpush3.bf16.msra.mxu0 %v1313_v12 }
 0x4a0   : > { %v2370_v62 = vpop.eup %2369  ;;  %2207 = vmatprep.subr.bf16.mxu0 %v2404_v2 }
 0x4a1   : > { %v1428_v17 = vpop.permute.xlu1 %1427  ;;  %v1569_v7 = vmul.f32 %v2370_v62, %v2817_v61 }
 0x4a2   : > { %2198 = vmatmul.mubr.msk.bf16.vlgmr.msra.gmra.mrb[16].mxu0 %vm630_vm0, %v1303_v30 }
 0x4a3   : > { %2208 = vmatpush3.bf16.msra.mxu0 %v1428_v17  ;;  %2209 = vmatprep.mubr.msk.bf16.mxu0 %vm2405_vm6, %v2404_v2  ;;  %v1572_v28 = vmul.f32 %v2618_v16, %v1569_v7  ;;  %v1826_v7 = vld [vmem:[%s2901_s19 + $0x8] sm:$0x1] }
 0x4a4   : > { %v2372_v21 = vpop.eup %2371 }
 0x4a5   : > { %v2374_v26 = vpop.eup %2373  ;;  %v1570_v50 = vmul.f32 %v2372_v21, %v2819_v5  ;;  %v1578_v59 = vpop.permute.xlu1 %1577 }
 0x4a6   : > { %2244 = vmatprep.subr.msk.bf16.mxu0 %vm748_vm5, %v1578_v59  ;;  %v1571_v31 = vmul.f32 %v2374_v26, %v2813_v51  ;;  %v1586_v32 = vsel %vm748_vm5, %v1578_v59, 0  ;;  %v2376_v5 = vpop.eup %2375 }
 0x4a7   : > { %v1573_v29 = vmul.f32 %v2620_v18, %v1570_v50  ;;  %v1697_v16 = vmul.f32 %v2376_v5, %v2823_v8 }
 0x4a8   : > { %v1574_v61 = vmul.f32 %v2624_v25, %v1571_v31 }
 0x4a9   : > { %v1575_v36 = vpack.c.bf16 %v1573_v29, %v1572_v28  ;;  %v1701_v18 = vpop.permute.xlu1 %1700  ;;  %v1698_v51 = vmul.f32 %v2842_v20, %v1697_v16 }
 0x4aa   : > { %2210 = vmatmul.mubr.msk.bf16.vlgmr.msra.gmra.mrb[20].mxu0 %vm864_vm7, %v1426_v19  ;;  %v1576_v37 = vpack.c.bf16 %v1574_v61, %v1574_v61 }
 0x4ab   : > { %2221 = vmatprep.mubr.msk.bf16.mxu0 %vm630_vm0, %v1575_v36  ;;  %2220 = vmatpush3.bf16.msra.mxu0 %v1586_v32  ;;  %v1699_v38 = vpack.c.bf16 %v1698_v51, %v1698_v51 }
 0x4ac   : > { %2231 = vmatprep.subr.bf16.mxu0 %v2404_v2 }
 0x4b2   : > { %2222 = vmatmul.mubr.msk.bf16.vlgmr.msra.gmra.mrb[24].mxu0 %vm630_vm0, %v1576_v37 }
 0x4b3   : > { %2232 = vmatpush3.bf16.msra.mxu0 %v1701_v18  ;;  %2233 = vmatprep.mubr.msk.bf16.mxu0 %vm2405_vm6, %v2404_v2 }
 0x4ba   : > { %2234 = vmatmul.mubr.msk.bf16.vlgmr.msra.gmra.mrb[28].mxu0 %vm864_vm7, %v1699_v38 }
 0x528   : > { %v2895_v13 = vpop.f32.mrb[4].mxu0 }
 0x529   : > { %v2163_v25 = vpop.f32.mrb[5].mxu0 }
 0x52a   : > { %v924_v40 = vpop.f32.mrb[6].mxu0 }
 0x52b   : > { %v2164_v34 = vpop.f32.mrb[7].mxu0 }
 0x540   : > { %v2175_v42 = vpop.f32.mrb[8].mxu0 }
 0x541   : > { %v1076_v8 = vpop.f32.mrb[9].mxu0 }
 0x542   : > { %v2176_v43 = vpop.f32.mrb[10].mxu0 }
 0x543   : > { %v1079_v44 = vpop.f32.mrb[11].mxu0  ;;  %v1849_v43 = vld [vmem:[%s2901_s19 + $0xc] sm:$0x1] }
 0x544   : > { %v2281_v45 = vpack.i.bf16 %v1079_v44, %v1076_v8 }
 0x546   : > { %2282 = vrot.lane.b32.xlu1 %v2281_v45, %s2407_s30 }
 0x548   : > { %v1194_v47 = vpop.f32.mrb[12].mxu0 }
 0x549   : > { %v2286_v48 = vpack.i.bf16 %v1194_v47, %v2175_v42  ;;  %v2187_v2 = vpop.f32.mrb[13].mxu0 }
 0x54a   : > { %v1197_v14 = vpop.f32.mrb[14].mxu0 }
 0x54b   : > { %2287 = vrot.lane.b32.xlu1 %v2286_v48, %s2407_s30  ;;  %v2188_v20 = vpop.f32.mrb[15].mxu0 }
 0x575   : > { %v2199_v27 = vpop.f32.mrb[16].mxu0 }
 0x576   : > { %1765 = vrot.lane.b32.xlu1 %v2199_v27, %s2408_s15  ;;  %v1349_v49 = vpop.f32.mrb[17].mxu0 }
 0x577   : > { %v2200_v22 = vpop.f32.mrb[18].mxu0 }
 0x578   : > { %v1352_v9 = vpop.f32.mrb[19].mxu0 }
 0x579   : > { %v2291_v52 = vpack.i.bf16 %v1352_v9, %v1349_v49 }
 0x57b   : > { %2292 = vrot.lane.b32.xlu0 %v2291_v52, %s2408_s15 }
 0x57d   : > { %v1467_v53 = vpop.f32.mrb[20].mxu0 }
 0x57e   : > { %1797 = vrot.lane.b32.xlu1 %v1467_v53, %s2408_s15  ;;  %v2211_v33 = vpop.f32.mrb[21].mxu0 }
 0x57f   : > { %v1470_v24 = vpop.f32.mrb[22].mxu0 }
 0x580   : > { %v2212_v23 = vpop.f32.mrb[23].mxu0 }
 0x585   : > { %v2223_v56 = vpop.f32.mrb[24].mxu0 }
 0x586   : > { %1777 = vrot.lane.b32.xlu1 %v2223_v56, %s2409_s16  ;;  %v1622_v35 = vpop.f32.mrb[25].mxu0 }
 0x587   : > { %v2224_v57 = vpop.f32.mrb[26].mxu0 }
 0x588   : > { %v1625_v39 = vpop.f32.mrb[27].mxu0 }
 0x589   : > { %v2296_v1 = vpack.i.bf16 %v1625_v39, %v1622_v35 }
 0x58b   : > { %2297 = vrot.lane.b32.xlu1 %v2296_v1, %s2409_s16 }
 0x58d   : > { %v1740_v3 = vpop.f32.mrb[28].mxu0 }
 0x58e   : > { %v2235_v4 = vpop.f32.mrb[29].mxu0 }
 0x58f   : > { %1801 = vrot.lane.b32.xlu1 %v1740_v3, %s2409_s16  ;;  %v1743_v46 = vpop.f32.mrb[30].mxu0 }
 0x590   : > { %v2236_v54 = vpop.f32.mrb[31].mxu0 }
 0x5b8   : > { %v2283_v6 = vpop.permute.xlu1 %2282 }
 0x5b9   : > { %v2285_v63 = vunpack.i.h.bf16 %v2283_v6  ;;  %v2284_v26 = vunpack.i.l.bf16 %v2283_v6 }
 0x5bb   : > { %v1783_v19 = vsel %vm630_vm0, %v2673_v60, %v2285_v63  ;;  %v1782_v32 = vsel %vm630_vm0, %v2671_v58, %v2284_v26 }
 0x5bd   : > { %v2288_v41 = vpop.permute.xlu1 %2287 }
 0x5be   : > { %v2289_v11 = vunpack.i.l.bf16 %v2288_v41  ;;  %v2290_v29 = vunpack.i.h.bf16 %v2288_v41 }
 0x5c0   : > { %v1784_v62 = vsel %vm630_vm0, %v2669_v55, %v2289_v11  ;;  %v1804_v37 = vsel %vm630_vm0, %v2895_v13, %v2290_v29 }
 0x5e8   : > { %v1766_v10 = vpop.permute.xlu1 %1765 }
 0x5e9   : > { %v1787_v15 = vsel %vm864_vm7, %v1784_v62, %v1766_v10 }
 0x5ed   : > { %v2293_v0 = vpop.permute.xlu0 %2292 }
 0x5ee   : > { %v2295_v59 = vunpack.i.h.bf16 %v2293_v0  ;;  %v2294_v28 = vunpack.i.l.bf16 %v2293_v0 }
 0x5f0   : > { %v1798_v12 = vpop.permute.xlu1 %1797  ;;  %v1786_v5 = vsel %vm864_vm7, %v1783_v19, %v2295_v59  ;;  %v1785_v16 = vsel %vm864_vm7, %v1782_v32, %v2294_v28 }
 0x5f1   : > { %v1805_v60 = vsel %vm864_vm7, %v1804_v37, %v1798_v12 }
 0x5f8   : > { %v1778_v30 = vpop.permute.xlu1 %1777 }
 0x5f9   : > { %v1791_v21 = vsel %vm1788_vm9, %v1787_v15, %v1778_v30 }
 0x5fa   : > { %v2099_v50 = vpack.c.bf16 %v1791_v21, %v1791_v21 }
 0x5fc   : > { %v1827_v55 = vsel %vm2906_vm12, %v2099_v50, %v1826_v7 }
 0x5fd   : > { %1828 = vst [vmem:[%s2901_s19 + $0x8] sm:$0x1] %v1827_v55  ;;  %v2298_v31 = vpop.permute.xlu1 %2297 }
 0x5fe   : > { %v2300_v36 = vunpack.i.h.bf16 %v2298_v31  ;;  %v2299_v61 = vunpack.i.l.bf16 %v2298_v31 }
 0x600   : > { %v1789_v18 = vsel %vm1788_vm9, %v1785_v16, %v2299_v61  ;;  %v1790_v51 = vsel %vm1788_vm9, %v1786_v5, %v2300_v36 }
 0x601   : > { %v2097_v38 = vpack.c.bf16 %v1789_v18, %v1789_v18  ;;  %v2098_v58 = vpack.c.bf16 %v1790_v51, %v1790_v51  ;;  %v1802_v25 = vpop.permute.xlu1 %1801 }
 0x602   : > { %v1806_v40 = vsel %vm1788_vm9, %v1805_v60, %v1802_v25 }
 0x603   : > { %1821 = vst.msk [vmem:[%s2901_s19] sm:$0xf] %vm1820_vm13, %v2097_v38  ;;  %1822 = vst.msk [vmem:[%s2901_s19 + $0x4] sm:$0xf] %vm1820_vm13, %v2098_v58  ;;  %v2100_v13 = vpack.c.bf16 %v1806_v40, %v1806_v40 }
 0x604   : > { %v1846_v47 = vld [vmem:[%s2901_s19 + $0x8] sm:$0xf] }
 0x605   : > { %v1834_v34 = vshrl.u32 %v2100_v13, 16  ;;  %v1837_v8 = vshll.u32 %v2100_v13, 16 }
 0x607   : > { %v1836_v42 = vrot.slane %v1834_v34, 7 }
 0x609   : > { %v1839_v44 = vor.u32 %v1837_v8, %v1836_v42  ;;  %v1840_v45 = vrot.slane %v1836_v42, 4 }
 0x60b   : > { %v1847_v48 = vsel %vm1845_vm15, %v1839_v44, %v1846_v47  ;;  %v1850_v2 = vsel %vm2906_vm12, %v1840_v45, %v1849_v43 }
 0x60c   : > { %1848 = vst [vmem:[%s2901_s19 + $0x8] sm:$0xf] %v1847_v48  ;;  %1851 = vst [vmem:[%s2901_s19 + $0xc] sm:$0x1] %v1850_v2 }
 0x60d PF: > { %s19_s11 = sadd.s32 1, %s2399_s11   ;;  %s2959_s30 = smov %s2395_s10 }
 0x60e   : > { %p16_p5 = scmp.ge.s32.totalorder %s19_s11, 4   ;;  %s2960_s10 = smov %s2962_s12 }
 0x610   :  { %18 = sbr.rel (!%p16_p5) target bundleno = 2 (0x2), region = 110 }

// kernel: kat_forward.23
= control target key start
LH: loop header
LB: loop body
LE: loop exit
PB: predicated region body
PF: predicated region fallthrough
CT: control target
= control target key end

     0   :  { %vm35_vm0 = vcmask 261120   ;;  %s274_s0 = inlined_call_operand.vmem [shape: f32[2,32], index: 0, kind: input, shape index: {}]   ;;  %s275_s1 = inlined_call_operand.vmem [shape: bf16[32,5], index: 1, kind: input, shape index: {}]   ;;  %s276_s2 = inlined_call_operand.vmem [shape: f32[1,32], index: 2, kind: input, shape index: {}]   ;;  %s277_s3 = inlined_call_operand.vmem [shape: f32[1,32], index: 3, kind: input, shape index: {}]   ;;  %s278_s4 = inlined_call_operand.vmem [shape: f32[1,5], index: 4, kind: input, shape index: {}]   ;;  %s279_s5 = inlined_call_operand.hbm [shape: f32[2,5], index: 5, kind: output, shape index: {}]  }
   0x1   :  { %v32_v0 = vld [vmem:[%s274_s0] sm:$0xff] }
   0x2   :  { %10 = vsyncpa [#allocation4], 0  ;;  %v36_v1 = vsel %vm35_vm0, %v32_v0, 0.0  ;;  %v175_v7 = vld [vmem:[%s275_s1] sm:$0xff]   ;;  %vm26_vm1 = vcmask 39936   ;;  %v203_v8 = vmov 0.0  }
   0x3   :  { %37 = vadd.xlane.f32.xlu0 %v36_v1  ;;  %162 = vmatprep.subr.bf16.mxu0 %v203_v8  ;;  %27 = vst.msk [vmem:[#allocation2] sm:$0xff] %vm26_vm1, %v203_v8  ;;  %v176_v9 = vld [vmem:[%s275_s1 + $0x8] sm:$0xff]   ;;  %vm204_vm2 = vmmov 0   ;;  %v153_v14 = vld [vmem:[%s276_s2] ss:$0 sm:$0xff] }
   0x4   :  { %163 = vmatpush3.bf16.msra.mxu0 %v175_v7  ;;  %166 = vmatprep.mubr.msk.bf16.mxu0 %vm204_vm2, %v203_v8  ;;  %v154_v16 = vld [vmem:[%s277_s3] ss:$0 sm:$0xff] }
   0x5   :  { %164 = vmatprep.subr.bf16.mxu0 %v203_v8  ;;  %v158_v26 = vld [vmem:[%s278_s4] ss:$0 sm:$0xff] }
   0x8   :  { %165 = vmatpush3.bf16.msra.mxu0 %v176_v9 }
   0xa   :  { %v64_v20 = vld [vmem:[#allocation2] sm:$0xff] }
  0x90   :  { %v38_v2 = vpop.xlane.xlu0 %37 }
  0x91   :  { %v40_v3 = vmul.f32 0.03125, %v38_v2 }
  0x93   :  { %v41_v4 = vsub.f32 %v32_v0, %v40_v3 }
  0x95   :  { %v42_v5 = vmul.f32 %v41_v4, %v41_v4 }
  0x97   :  { %v43_v6 = vsel %vm35_vm0, %v42_v5, 0.0 }
  0x98   :  { %44 = vadd.xlane.f32.xlu0 %v43_v6 }
 0x125   :  { %v45_v10 = vpop.xlane.xlu0 %44 }
 0x126   :  { %v46_v11 = vmul.f32 0.03125, %v45_v10 }
 0x128   :  { %v47_v12 = vadd.f32 1e-05, %v46_v11 }
 0x12a   :  { %177 = vrsqrt.f32 %v47_v12 }
 0x134   :  { %v178_v13 = vpop.eup %177 }
 0x135   :  { %v49_v15 = vmul.f32 %v178_v13, %v41_v4 }
 0x137   :  { %v56_v17 = vmul.f32 %v153_v14, %v49_v15 }
 0x139   :  { %v63_v18 = vadd.f32 %v154_v16, %v56_v17 }
 0x13b   :  { %v65_v19 = vpack.c.bf16 %v63_v18, %v63_v18 }
 0x13d   :  { %167 = vmatmul.mubr.msk.bf16.vlgmr.msra.gmra.mrb[0].mxu0 %vm35_vm0, %v65_v19 }
 0x210   :  { %v115_v21 = vpop.f32.mrb[0].mxu0 }
 0x211   :  { %v121_v22 = vadd.f32 %v115_v21, %v64_v20  ;;  %v168_v23 = vpop.f32.mrb[1].mxu0 }
 0x212   :  { %v118_v24 = vpop.f32.mrb[2].mxu0 }
 0x213   :  { %123 = vst.msk [vmem:[#allocation2] sm:$0xff] %vm26_vm1, %v121_v22  ;;  %v169_v25 = vpop.f32.mrb[3].mxu0 }
 0x21a   :  { %v127_v27 = vld [vmem:[#allocation2] sm:$0xff] }
 0x21b   :  { %v135_v28 = vadd.f32 %v158_v26, %v127_v27 }
 0x21d   :  { %136 = vst.msk [vmem:[#allocation3] sm:$0xff] %vm26_vm1, %v135_v28 }
 0x21e   :  { %141 = vsyncadd [#allocation4], 96  ;;  %s205_s3 = smov [#allocation3]  }
 0x21f   :  { %s142_s27 = sshll.u32 %s205_s3, 4  ;;  %s143_s27 = int_to_ptr.vmem [resolvable:$true] %s142_s27 }
 0x220   :  { %s179_s28 = scalar_lea.vmem %s143_s27, 32  ;;  %s183_s29 = scalar_lea.vmem %s143_s27, 128 }
 0x221   :  { %p180_p0 = scmp.ne.s32.totalorder %s143_s27, %s179_s28  ;;  %p184_p1 = scmp.lt.s32.totalorder %s143_s27, %s143_s27 }
 0x222   :  { %p185_p2 = scmp.lt.s32.totalorder %s183_s29, %s179_s28 }
 0x224   :  { %p186_p3 = por %p185_p2, %p184_p1 }
 0x226   :  { %p187_p4 = pnand %p186_p3, %p180_p0 }
 0x228   :  { %190 = shalt.err (!%p187_p4)
}
 0x229   :  { %s191_s4 = scalar_lea.hbm %s279_s5, 32 }
 0x22a   :  { %p192_p5 = scmp.ne.s32.totalorder %s279_s5, %s191_s4  ;;  %p195_p6 = scmp.lt.u32.totalorder %s191_s4, %s279_s5 }
 0x22c   :  { %p197_p7 = pnand %p195_p6, %p192_p5 }
 0x22e   :  { %200 = shalt.err (!%p197_p7)
}
 0x22f   :  { %s206_s11 = smov 32   ;;  %s207_s12 = smov 2  }
 0x230   :  { %148 = dma.vmem_to_hbm [thread:$0]  %s143_s27, 32, %s279_s5, [#allocation4], %s206_s11, %s206_s11, %s207_s12  }
 0x231   :  { %201 = dma.done.wait [#allocation4], 128  }
 0x232   :  { %202 = vsyncadd [#allocation4], 4294967168 }
 0x233   :  { %152 = vsyncpa [#allocation4], 1 }

</bundles_post_ra>
